<compile_context>
chip_gen: v5e
topology: v5e:2x2
jax: 0.10.0
libtpu: 0.0.40
codegen_flags: <defaults>
</compile_context>

<pallas_src>
import jax
import jax.numpy as jnp
from jax.experimental import pallas as pl
from jax.experimental.pallas import tpu as pltpu

NEG_SLOPE = 0.2
LANE = 128
VMEM_LIMIT = 48 * 1024 * 1024   # within physical VMEM on v5e/v6e/v7x


# ----------------------------------------------------------------------------
# helpers
# ----------------------------------------------------------------------------
def _round_up(x, m):
    return ((x + m - 1) // m) * m


def _choose_tile(m, kp):
    """Row tile (multiple of 8) and padded row count.

    * M <= 512: one full-M block (no per-step overhead, full MXU M-dim fill).
    * large M: 512-row tiles; cap at 256 when K is wide (v5e VMEM budget),
      which also gives >=2 balanced steps for the parallel axis (v7x megacore).
    """
    if m <= 512:
        mp = _round_up(max(m, 1), 8)
        return mp, mp
    tm = 256 if kp >= 2048 else 512
    return _round_up(m, tm), tm


def _affine_tile(mp):
    """Large lane-dense row tiles for the mem-bound affine pass."""
    if mp <= 2048:
        return mp
    for tm in (2048, 1024, 512, 256, 128, 64, 32, 16, 8):
        if mp % tm == 0:
            return tm
    return 8


def _pad2(a, rows, cols):
    r, c = a.shape
    return jnp.pad(a, ((0, rows - r), (0, cols - c)))


def _cparams():
    return pltpu.CompilerParams(
        dimension_semantics=("parallel",),
        vmem_limit_bytes=VMEM_LIMIT)


# ----------------------------------------------------------------------------
# Pallas kernels
# ----------------------------------------------------------------------------
def _matmul_bias_leaky_kernel(x_ref, w_ref, b_ref, o_ref):
    """o = leaky_relu(x @ w + b); full K resident, one dot per M tile."""
    y = jnp.dot(x_ref[...], w_ref[...], preferred_element_type=jnp.float32)
    y = y + b_ref[...]
    o_ref[...] = jnp.maximum(y, NEG_SLOPE * y).astype(o_ref.dtype)


def _matmul_bias_stats_kernel(x_ref, w_ref, b_ref, o_ref, sum_ref, sq_ref):
    """o = x @ w + b (stored bf16), plus per-block per-channel sum and
    sum-of-squares computed from the f32 accumulator (fused BN statistics)."""
    y = jnp.dot(x_ref[...], w_ref[...], preferred_element_type=jnp.float32)
    y = y + b_ref[...]
    sum_ref[...] = jnp.sum(y, axis=0).reshape(1, 1, -1)
    sq_ref[...] = jnp.sum(y * y, axis=0).reshape(1, 1, -1)
    o_ref[...] = y.astype(o_ref.dtype)


def _affine_leaky_kernel(y_ref, scale_ref, shift_ref, o_ref):
    """o = leaky_relu(scale * y + shift), per-channel scale/shift (bf16 io)."""
    y = y_ref[...].astype(jnp.float32) * scale_ref[...] + shift_ref[...]
    o_ref[...] = jnp.maximum(y, NEG_SLOPE * y).astype(o_ref.dtype)


def _fc_head_kernel(f_ref, w1_ref, b1_ref, w2_ref, b2_ref, o_ref):
    """Fused FC1 -> LeakyReLU -> FC2 -> Sigmoid; FC1 activation never leaves VMEM."""
    h = jnp.dot(f_ref[...], w1_ref[...], preferred_element_type=jnp.float32)
    h = h + b1_ref[...]
    h = jnp.maximum(h, NEG_SLOPE * h)
    y = jnp.dot(h.astype(w2_ref.dtype), w2_ref[...],
                preferred_element_type=jnp.float32)
    y = y + b2_ref[...]
    o_ref[...] = 1.0 / (1.0 + jnp.exp(-y))


# ----------------------------------------------------------------------------
# Pallas wrappers
# ----------------------------------------------------------------------------
def pallas_matmul_bias_leaky(x, w, b):
    """x:[M,K] bf16, w:[K,C] bf16, b:[C] f32 -> [Mp,Cp] bf16 (padded)."""
    m, k = x.shape
    c = w.shape[1]
    kp = _round_up(k, LANE)
    cp = _round_up(c, LANE)
    mp, tm = _choose_tile(m, kp)
    x_p = _pad2(x, mp, kp)
    w_p = _pad2(w, kp, cp)
    b_p = jnp.pad(b.astype(jnp.float32).reshape(1, c), ((0, 0), (0, cp - c)))

    # TODO(synk): on v7x, single-buffer the constant weight/bias blocks
    # (pipeline_mode=pl.Buffered(1)) to halve their VMEM footprint.
    return pl.pallas_call(
        _matmul_bias_leaky_kernel,
        out_shape=jax.ShapeDtypeStruct((mp, cp), jnp.bfloat16),
        grid_spec=pltpu.PrefetchScalarGridSpec(
            num_scalar_prefetch=0,
            grid=(mp // tm,),
            in_specs=[
                pl.BlockSpec((tm, kp), lambda i: (i, 0)),
                pl.BlockSpec((kp, cp), lambda i: (0, 0)),   # weight VMEM-resident
                pl.BlockSpec((1, cp), lambda i: (0, 0)),
            ],
            out_specs=pl.BlockSpec((tm, cp), lambda i: (i, 0)),
        ),
        compiler_params=_cparams(),
    )(x_p, w_p, b_p)


def pallas_matmul_bias_stats(x, w, b):
    """Conv matmul + bias with fused per-channel batch statistics.
    Returns (y [Mp,Cp] bf16, sum [1,Cp] f32, sumsq [1,Cp] f32)."""
    m, k = x.shape
    c = w.shape[1]
    kp = _round_up(k, LANE)
    cp = _round_up(c, LANE)
    mp, tm = _choose_tile(m, kp)
    nb = mp // tm
    x_p = _pad2(x, mp, kp)
    w_p = _pad2(w, kp, cp)
    b_p = jnp.pad(b.astype(jnp.float32).reshape(1, c), ((0, 0), (0, cp - c)))

    y, psum, psq = pl.pallas_call(
        _matmul_bias_stats_kernel,
        out_shape=(
            jax.ShapeDtypeStruct((mp, cp), jnp.bfloat16),
            jax.ShapeDtypeStruct((nb, 1, cp), jnp.float32),
            jax.ShapeDtypeStruct((nb, 1, cp), jnp.float32),
        ),
        grid_spec=pltpu.PrefetchScalarGridSpec(
            num_scalar_prefetch=0,
            grid=(nb,),
            in_specs=[
                pl.BlockSpec((tm, kp), lambda i: (i, 0)),
                pl.BlockSpec((kp, cp), lambda i: (0, 0)),
                pl.BlockSpec((1, cp), lambda i: (0, 0)),
            ],
            out_specs=[
                pl.BlockSpec((tm, cp), lambda i: (i, 0)),
                pl.BlockSpec((1, 1, cp), lambda i: (i, 0, 0)),
                pl.BlockSpec((1, 1, cp), lambda i: (i, 0, 0)),
            ],
        ),
        compiler_params=_cparams(),
    )(x_p, w_p, b_p)

    # Zero-padded rows evaluate to exactly `bias` (0 @ w == 0); remove their
    # contribution so the statistics match the true M rows.
    n_pad = mp - m
    s = jnp.sum(psum, axis=0).reshape(1, cp) - n_pad * b_p
    sq = jnp.sum(psq, axis=0).reshape(1, cp) - n_pad * b_p * b_p
    return y, s, sq


def pallas_affine_leaky(y, scale, shift):
    """y:[Mp,Cp] bf16, scale/shift:[1,Cp] f32 -> leaky(scale*y + shift) bf16."""
    mp, cp = y.shape
    tm = _affine_tile(mp)
    return pl.pallas_call(
        _affine_leaky_kernel,
        out_shape=jax.ShapeDtypeStruct((mp, cp), jnp.bfloat16),
        grid_spec=pltpu.PrefetchScalarGridSpec(
            num_scalar_prefetch=0,
            grid=(mp // tm,),
            in_specs=[
                pl.BlockSpec((tm, cp), lambda i: (i, 0)),
                pl.BlockSpec((1, cp), lambda i: (0, 0)),
                pl.BlockSpec((1, cp), lambda i: (0, 0)),
            ],
            out_specs=pl.BlockSpec((tm, cp), lambda i: (i, 0)),
        ),
        compiler_params=_cparams(),
    )(y, scale, shift)


def pallas_fc_head(f, w1, b1, w2, b2):
    """Fused fc head.  f:[N,K] bf16; PyTorch Linear weights w1:[H,K], w2:[C,H].
    Returns sigmoid(leaky(f @ w1.T + b1) @ w2.T + b2) as f32 [N,C]."""
    n, k = f.shape
    h = w1.shape[0]
    c = w2.shape[0]
    np_ = _round_up(max(n, 1), 8)
    kp = _round_up(k, LANE)
    hp = _round_up(h, LANE)
    cp = _round_up(c, LANE)
    f_p = _pad2(f, np_, kp)
    w1_p = _pad2(jnp.transpose(w1).astype(jnp.bfloat16), kp, hp)
    b1_p = jnp.pad(b1.astype(jnp.float32).reshape(1, h), ((0, 0), (0, hp - h)))
    w2_p = _pad2(jnp.transpose(w2).astype(jnp.bfloat16), hp, cp)
    b2_p = jnp.pad(b2.astype(jnp.float32).reshape(1, c), ((0, 0), (0, cp - c)))

    # TODO(synk): for very large feature dims (nf>=64, img_size>=64 on v7x),
    # add a K grid axis with an accumulator scratch instead of keeping the
    # whole FC1 weight VMEM-resident.
    out = pl.pallas_call(
        _fc_head_kernel,
        out_shape=jax.ShapeDtypeStruct((np_, cp), jnp.float32),
        grid_spec=pltpu.PrefetchScalarGridSpec(
            num_scalar_prefetch=0,
            grid=(1,),
            in_specs=[
                pl.BlockSpec((np_, kp), lambda i: (0, 0)),
                pl.BlockSpec((kp, hp), lambda i: (0, 0)),
                pl.BlockSpec((1, hp), lambda i: (0, 0)),
                pl.BlockSpec((hp, cp), lambda i: (0, 0)),
                pl.BlockSpec((1, cp), lambda i: (0, 0)),
            ],
            out_specs=pl.BlockSpec((np_, cp), lambda i: (0, 0)),
        ),
        compiler_params=_cparams(),
    )(f_p, w1_p, b1_p, w2_p, b2_p)
    return out[:n, :c]


# ----------------------------------------------------------------------------
# Conv2d(k=4, s=2, p=1) as dense im2col (glue) + Pallas matmul (hot path)
# ----------------------------------------------------------------------------
def _im2col_conv(x_nhwc):
    """x: [N,H,W,C] NHWC -> rows [N*Ho*Wo, C*16] with (ci, ky, kx) row order
    (channel-major, patch-minor) so the stack/reshape is copy-free."""
    # TODO(synk): im2col is still XLA-side; moving it in-kernel (halo tiles via
    # pl.ANY + manual DMA) would remove the 4x HBM blow-up on the conv inputs.
    n, h, w, c = x_nhwc.shape
    ho, wo = h // 2, w // 2
    xp = jnp.pad(x_nhwc, ((0, 0), (1, 1), (1, 1), (0, 0)))
    cols = []
    for ky in range(4):
        for kx in range(4):
            cols.append(xp[:, ky:ky + 2 * ho:2, kx:kx + 2 * wo:2, :])
    p = jnp.stack(cols, axis=-1)                 # [N, Ho, Wo, C, 16]
    return p.reshape(n * ho * wo, c * 16), (n, ho, wo)


def _conv_weight_matrix(w):
    """PyTorch Conv2d weight [Cout, Cin, 4, 4] -> [Cin*16, Cout] matching the
    (ci, ky, kx) row ordering of _im2col_conv."""
    return jnp.transpose(w, (1, 2, 3, 0)).reshape(-1, w.shape[0])


def conv_leaky_layer(x_nhwc, w, b):
    cols, (n, ho, wo) = _im2col_conv(x_nhwc)
    wm = _conv_weight_matrix(w).astype(jnp.bfloat16)
    y = pallas_matmul_bias_leaky(cols, wm, b)
    m, c = n * ho * wo, w.shape[0]
    return y[:m, :c].reshape(n, ho, wo, c)


def conv_bn_leaky_layer(x_nhwc, w, b, gamma, beta, eps=1e-5):
    cols, (n, ho, wo) = _im2col_conv(x_nhwc)
    wm = _conv_weight_matrix(w).astype(jnp.bfloat16)
    y, s, sq = pallas_matmul_bias_stats(cols, wm, b)
    m, c = n * ho * wo, w.shape[0]
    cp = y.shape[1]

    mean = s / m
    # TODO(synk): E[x^2]-E[x]^2 can cancel for very large / highly-biased
    # activations; fine at these scales (f32 stats from the f32 accumulator).
    var = sq / m - mean * mean
    g = jnp.pad(gamma.astype(jnp.float32).reshape(1, c),
                ((0, 0), (0, cp - c)), constant_values=1.0)
    be = jnp.pad(beta.astype(jnp.float32).reshape(1, c), ((0, 0), (0, cp - c)))
    scale = g * jax.lax.rsqrt(var + eps)
    shift = be - mean * scale

    out = pallas_affine_leaky(y, scale, shift)
    return out[:m, :c].reshape(n, ho, wo, c)


# ----------------------------------------------------------------------------
# discriminator forward
# ----------------------------------------------------------------------------
def discriminator_forward(x_nchw, params):
    (cw1, cb1), (cw2, cb2, g2, be2), (cw3, cb3, g3, be3), \
        (cw4, cb4, g4, be4), (fw1, fb1), (fw2, fb2) = params
    # NHWC + bf16 once at entry; activations stay bf16 NHWC end-to-end.
    h = jnp.transpose(x_nchw, (0, 2, 3, 1)).astype(jnp.bfloat16)
    h = conv_leaky_layer(h, cw1, cb1)
    h = conv_bn_leaky_layer(h, cw2, cb2, g2, be2)
    h = conv_bn_leaky_layer(h, cw3, cb3, g3, be3)
    h = conv_bn_leaky_layer(h, cw4, cb4, g4, be4)
    n, s1, s2, c = h.shape
    # PyTorch flatten order is (C, H, W)
    f = jnp.transpose(h, (0, 3, 1, 2)).reshape(n, c * s1 * s2)
    d = pallas_fc_head(f, fw1, fb1, fw2, fb2)
    return d.reshape(n, -1, 1, 1)


def init_params(key, in_nc, out_nc, nf, img_size):
    """DCGAN-style init: conv/linear ~ N(0, 0.02), BN gamma ~ N(1, 0.02)."""
    chans = [in_nc, nf, nf * 2, nf * 4, nf * 8]
    keys = iter(jax.random.split(key, 16))
    params = []
    w = 0.02 * jax.random.normal(next(keys), (chans[1], chans[0], 4, 4), jnp.float32)
    params.append((w, jnp.zeros((chans[1],), jnp.float32)))
    for i in range(1, 4):
        w = 0.02 * jax.random.normal(next(keys), (chans[i + 1], chans[i], 4, 4),
                                     jnp.float32)
        b = jnp.zeros((chans[i + 1],), jnp.float32)
        gamma = 1.0 + 0.02 * jax.random.normal(next(keys), (chans[i + 1],), jnp.float32)
        beta = jnp.zeros((chans[i + 1],), jnp.float32)
        params.append((w, b, gamma, beta))
    feat = nf * 8 * (img_size // 16) * (img_size // 16)
    fw1 = 0.02 * jax.random.normal(next(keys), (nf * 8, feat), jnp.float32)
    fb1 = jnp.zeros((nf * 8,), jnp.float32)
    fw2 = 0.02 * jax.random.normal(next(keys), (out_nc, nf * 8), jnp.float32)
    fb2 = jnp.zeros((out_nc,), jnp.float32)
    params.append((fw1, fb1))
    params.append((fw2, fb2))
    return params


# ----------------------------------------------------------------------------
# Pure-JAX reference (correctness checking only)
# ----------------------------------------------------------------------------
def _leaky(x):
    return jnp.maximum(x, NEG_SLOPE * x)


def _conv_ref(x, w, b):
    y = jax.lax.conv_general_dilated(
        x, w, window_strides=(2, 2), padding=[(1, 1), (1, 1)],
        dimension_numbers=("NCHW", "OIHW", "NCHW"),
        precision=jax.lax.Precision.HIGHEST)
    return y + b.reshape(1, -1, 1, 1)


def _bn_ref(x, gamma, beta, eps=1e-5):
    mean = x.mean(axis=(0, 2, 3), keepdims=True)
    var = ((x - mean) ** 2).mean(axis=(0, 2, 3), keepdims=True)
    return (gamma.reshape(1, -1, 1, 1) * (x - mean) * jax.lax.rsqrt(var + eps)
            + beta.reshape(1, -1, 1, 1))


def discriminator_ref(x, params):
    (cw1, cb1), (cw2, cb2, g2, be2), (cw3, cb3, g3, be3), \
        (cw4, cb4, g4, be4), (fw1, fb1), (fw2, fb2) = params
    h = _leaky(_conv_ref(x, cw1, cb1))
    h = _leaky(_bn_ref(_conv_ref(h, cw2, cb2), g2, be2))
    h = _leaky(_bn_ref(_conv_ref(h, cw3, cb3), g3, be3))
    h = _leaky(_bn_ref(_conv_ref(h, cw4, cb4), g4, be4))
    n = h.shape[0]
    f = h.reshape(n, -1)
    f = _leaky(f @ fw1.T + fb1)
    d = jax.nn.sigmoid(f @ fw2.T + fb2)
    return d.reshape(n, -1, 1, 1)


# ----------------------------------------------------------------------------
if __name__ == "__main__":
    key = jax.random.PRNGKey(0)
    kx, kparam = jax.random.split(key)

    in_nc, out_nc, nf, img_size, batch = 3, 1, 8, 64, 2
    x = jax.random.normal(kx, (batch, in_nc, img_size, img_size), jnp.float32)
    params = init_params(kparam, in_nc, out_nc, nf, img_size)

    fwd = jax.jit(discriminator_forward)
    out = jax.block_until_ready(fwd(x, params))
    assert out.shape == (batch, out_nc, 1, 1), out.shape

    ref = discriminator_ref(x, params)
    err = float(jnp.max(jnp.abs(out - ref)))
    assert err < 5e-2, f"max abs err {err}"

    print("KERNEL_OK")
</pallas_src>

<mosaic_0001>
module attributes {stable_mosaic.version = 11 : i64} {
  func.func @_matmul_bias_leaky_kernel(%arg0: i32, %arg1: memref<512x128xbf16, #tpu.memory_space<vmem>>, %arg2: memref<128x128xbf16, #tpu.memory_space<vmem>>, %arg3: memref<1x128xf32, #tpu.memory_space<vmem>>, %arg4: memref<512x128xbf16, #tpu.memory_space<vmem>>) attributes {dimension_semantics = [#tpu.dimension_semantics<parallel>], iteration_bounds = array<i64: 4>, scalar_prefetch = 0 : i64, scratch_operands = 0 : i64, tpu.core_type = #tpu.core_type<tc>, window_params = [{transform_indices = @transform_0, window_bounds = array<i64: 512, 128>}, {pipeline_mode = #tpu.pipeline_mode<synchronous>, transform_indices = @transform_1, window_bounds = array<i64: 128, 128>}, {pipeline_mode = #tpu.pipeline_mode<synchronous>, transform_indices = @transform_2, window_bounds = array<i64: 1, 128>}, {transform_indices = @transform_3, window_bounds = array<i64: 512, 128>}]} {
    %c0 = arith.constant 0 : index
    %c0_0 = arith.constant 0 : index
    %0 = vector.load %arg1[%c0, %c0_0] : memref<512x128xbf16, #tpu.memory_space<vmem>>, vector<512x128xbf16>
    %c0_1 = arith.constant 0 : index
    %c0_2 = arith.constant 0 : index
    %1 = vector.load %arg2[%c0_1, %c0_2] : memref<128x128xbf16, #tpu.memory_space<vmem>>, vector<128x128xbf16>
    %cst = arith.constant dense<0.000000e+00> : vector<512x128xf32>
    %2 = tpu.matmul %0, %1, %cst {dimension_numbers = #tpu.dot_dimension_numbers<[1], [0], [0], [1], [0, 0, 1, 1], [], []>} : vector<512x128xbf16>, vector<128x128xbf16>, vector<512x128xf32> -> vector<512x128xf32>
    %c0_3 = arith.constant 0 : index
    %c0_4 = arith.constant 0 : index
    %3 = vector.load %arg3[%c0_3, %c0_4] : memref<1x128xf32, #tpu.memory_space<vmem>>, vector<1x128xf32>
    %4 = vector.broadcast %3 : vector<1x128xf32> to vector<512x128xf32>
    %5 = arith.addf %2, %4 : vector<512x128xf32>
    %cst_5 = arith.constant 2.000000e-01 : f32
    %6 = vector.broadcast %cst_5 : f32 to vector<512x128xf32>
    %7 = arith.mulf %6, %5 : vector<512x128xf32>
    %8 = arith.maximumf %5, %7 : vector<512x128xf32>
    %9 = arith.truncf %8 : vector<512x128xf32> to vector<512x128xbf16>
    %c0_6 = arith.constant 0 : index
    %c0_7 = arith.constant 0 : index
    %10 = vector.load %arg4[%c0_6, %c0_7] : memref<512x128xbf16, #tpu.memory_space<vmem>>, vector<512x128xbf16>
    tpu.vector_store %arg4[%c0_6, %c0_7], %9 {strides = array<i32>} : memref<512x128xbf16, #tpu.memory_space<vmem>>, vector<512x128xbf16>,
    return
  }
  func.func @transform_0(%arg0: i32) -> (i32, i32) {
    %c0_i32 = arith.constant 0 : i32
    %c0_i32_0 = arith.constant 0 : i32
    return %arg0, %c0_i32 : i32, i32
  }
  func.func @transform_1(%arg0: i32) -> (i32, i32) {
    %c0_i32 = arith.constant 0 : i32
    %c0_i32_0 = arith.constant 0 : i32
    %c0_i32_1 = arith.constant 0 : i32
    return %c0_i32, %c0_i32_0 : i32, i32
  }
  func.func @transform_2(%arg0: i32) -> (i32, i32) {
    %c0_i32 = arith.constant 0 : i32
    %c0_i32_0 = arith.constant 0 : i32
    %c0_i32_1 = arith.constant 0 : i32
    return %c0_i32, %c0_i32_0 : i32, i32
  }
  func.func @transform_3(%arg0: i32) -> (i32, i32) {
    %c0_i32 = arith.constant 0 : i32
    %c0_i32_0 = arith.constant 0 : i32
    return %arg0, %c0_i32 : i32, i32
  }
}

module attributes {stable_mosaic.version = 11 : i64} {
  func.func @_matmul_bias_stats_kernel(%arg0: i32, %arg1: memref<512x128xbf16, #tpu.memory_space<vmem>>, %arg2: memref<128x128xbf16, #tpu.memory_space<vmem>>, %arg3: memref<1x128xf32, #tpu.memory_space<vmem>>, %arg4: memref<512x128xbf16, #tpu.memory_space<vmem>>, %arg5: memref<1x1x128xf32, #tpu.memory_space<vmem>>, %arg6: memref<1x1x128xf32, #tpu.memory_space<vmem>>) attributes {dimension_semantics = [#tpu.dimension_semantics<parallel>], iteration_bounds = array<i64: 1>, scalar_prefetch = 0 : i64, scratch_operands = 0 : i64, tpu.core_type = #tpu.core_type<tc>, window_params = [{transform_indices = @transform_0, window_bounds = array<i64: 512, 128>}, {pipeline_mode = #tpu.pipeline_mode<synchronous>, transform_indices = @transform_1, window_bounds = array<i64: 128, 128>}, {pipeline_mode = #tpu.pipeline_mode<synchronous>, transform_indices = @transform_2, window_bounds = array<i64: 1, 128>}, {transform_indices = @transform_3, window_bounds = array<i64: 512, 128>}, {transform_indices = @transform_4, window_bounds = array<i64: 1, 1, 128>}, {transform_indices = @transform_5, window_bounds = array<i64: 1, 1, 128>}]} {
    %c0 = arith.constant 0 : index
    %c0_0 = arith.constant 0 : index
    %0 = vector.load %arg1[%c0, %c0_0] : memref<512x128xbf16, #tpu.memory_space<vmem>>, vector<512x128xbf16>
    %c0_1 = arith.constant 0 : index
    %c0_2 = arith.constant 0 : index
    %1 = vector.load %arg2[%c0_1, %c0_2] : memref<128x128xbf16, #tpu.memory_space<vmem>>, vector<128x128xbf16>
    %cst = arith.constant dense<0.000000e+00> : vector<512x128xf32>
    %2 = tpu.matmul %0, %1, %cst {dimension_numbers = #tpu.dot_dimension_numbers<[1], [0], [0], [1], [0, 0, 1, 1], [], []>} : vector<512x128xbf16>, vector<128x128xbf16>, vector<512x128xf32> -> vector<512x128xf32>
    %c0_3 = arith.constant 0 : index
    %c0_4 = arith.constant 0 : index
    %3 = vector.load %arg3[%c0_3, %c0_4] : memref<1x128xf32, #tpu.memory_space<vmem>>, vector<1x128xf32>
    %4 = vector.broadcast %3 : vector<1x128xf32> to vector<512x128xf32>
    %5 = arith.addf %2, %4 : vector<512x128xf32>
    %cst_5 = arith.constant dense<0.000000e+00> : vector<128xf32>
    %6 = vector.multi_reduction <add>, %5, %cst_5 [0] : vector<512x128xf32> to vector<128xf32>
    %7 = vector.shape_cast %6 : vector<128xf32> to vector<1x1x128xf32>
    %c0_6 = arith.constant 0 : index
    %c0_7 = arith.constant 0 : index
    %c0_8 = arith.constant 0 : index
    %8 = vector.load %arg5[%c0_6, %c0_7, %c0_8] : memref<1x1x128xf32, #tpu.memory_space<vmem>>, vector<1x1x128xf32>
    tpu.vector_store %arg5[%c0_6, %c0_7, %c0_8], %7 {strides = array<i32>} : memref<1x1x128xf32, #tpu.memory_space<vmem>>, vector<1x1x128xf32>,
    %9 = arith.mulf %5, %5 : vector<512x128xf32>
    %cst_9 = arith.constant dense<0.000000e+00> : vector<128xf32>
    %10 = vector.multi_reduction <add>, %9, %cst_9 [0] : vector<512x128xf32> to vector<128xf32>
    %11 = vector.shape_cast %10 : vector<128xf32> to vector<1x1x128xf32>
    %c0_10 = arith.constant 0 : index
    %c0_11 = arith.constant 0 : index
    %c0_12 = arith.constant 0 : index
    %12 = vector.load %arg6[%c0_10, %c0_11, %c0_12] : memref<1x1x128xf32, #tpu.memory_space<vmem>>, vector<1x1x128xf32>
    tpu.vector_store %arg6[%c0_10, %c0_11, %c0_12], %11 {strides = array<i32>} : memref<1x1x128xf32, #tpu.memory_space<vmem>>, vector<1x1x128xf32>,
    %13 = arith.truncf %5 : vector<512x128xf32> to vector<512x128xbf16>
    %c0_13 = arith.constant 0 : index
    %c0_14 = arith.constant 0 : index
    %14 = vector.load %arg4[%c0_13, %c0_14] : memref<512x128xbf16, #tpu.memory_space<vmem>>, vector<512x128xbf16>
    tpu.vector_store %arg4[%c0_13, %c0_14], %13 {strides = array<i32>} : memref<512x128xbf16, #tpu.memory_space<vmem>>, vector<512x128xbf16>,
    return
  }
  func.func @transform_0(%arg0: i32) -> (i32, i32) {
    %c0_i32 = arith.constant 0 : i32
    %c0_i32_0 = arith.constant 0 : i32
    return %arg0, %c0_i32 : i32, i32
  }
  func.func @transform_1(%arg0: i32) -> (i32, i32) {
    %c0_i32 = arith.constant 0 : i32
    %c0_i32_0 = arith.constant 0 : i32
    %c0_i32_1 = arith.constant 0 : i32
    return %c0_i32, %c0_i32_0 : i32, i32
  }
  func.func @transform_2(%arg0: i32) -> (i32, i32) {
    %c0_i32 = arith.constant 0 : i32
    %c0_i32_0 = arith.constant 0 : i32
    %c0_i32_1 = arith.constant 0 : i32
    return %c0_i32, %c0_i32_0 : i32, i32
  }
  func.func @transform_3(%arg0: i32) -> (i32, i32) {
    %c0_i32 = arith.constant 0 : i32
    %c0_i32_0 = arith.constant 0 : i32
    return %arg0, %c0_i32 : i32, i32
  }
  func.func @transform_4(%arg0: i32) -> (i32, i32, i32) {
    %c0_i32 = arith.constant 0 : i32
    %c0_i32_0 = arith.constant 0 : i32
    %c0_i32_1 = arith.constant 0 : i32
    return %arg0, %c0_i32, %c0_i32_0 : i32, i32, i32
  }
  func.func @transform_5(%arg0: i32) -> (i32, i32, i32) {
    %c0_i32 = arith.constant 0 : i32
    %c0_i32_0 = arith.constant 0 : i32
    %c0_i32_1 = arith.constant 0 : i32
    return %arg0, %c0_i32, %c0_i32_0 : i32, i32, i32
  }
}

module attributes {stable_mosaic.version = 11 : i64} {
  func.func @_affine_leaky_kernel(%arg0: i32, %arg1: memref<512x128xbf16, #tpu.memory_space<vmem>>, %arg2: memref<1x128xf32, #tpu.memory_space<vmem>>, %arg3: memref<1x128xf32, #tpu.memory_space<vmem>>, %arg4: memref<512x128xbf16, #tpu.memory_space<vmem>>) attributes {dimension_semantics = [#tpu.dimension_semantics<parallel>], iteration_bounds = array<i64: 1>, scalar_prefetch = 0 : i64, scratch_operands = 0 : i64, tpu.core_type = #tpu.core_type<tc>, window_params = [{transform_indices = @transform_0, window_bounds = array<i64: 512, 128>}, {pipeline_mode = #tpu.pipeline_mode<synchronous>, transform_indices = @transform_1, window_bounds = array<i64: 1, 128>}, {pipeline_mode = #tpu.pipeline_mode<synchronous>, transform_indices = @transform_2, window_bounds = array<i64: 1, 128>}, {transform_indices = @transform_3, window_bounds = array<i64: 512, 128>}]} {
    %c0 = arith.constant 0 : index
    %c0_0 = arith.constant 0 : index
    %0 = vector.load %arg1[%c0, %c0_0] : memref<512x128xbf16, #tpu.memory_space<vmem>>, vector<512x128xbf16>
    %1 = arith.extf %0 : vector<512x128xbf16> to vector<512x128xf32>
    %c0_1 = arith.constant 0 : index
    %c0_2 = arith.constant 0 : index
    %2 = vector.load %arg2[%c0_1, %c0_2] : memref<1x128xf32, #tpu.memory_space<vmem>>, vector<1x128xf32>
    %3 = vector.broadcast %2 : vector<1x128xf32> to vector<512x128xf32>
    %4 = arith.mulf %1, %3 : vector<512x128xf32>
    %c0_3 = arith.constant 0 : index
    %c0_4 = arith.constant 0 : index
    %5 = vector.load %arg3[%c0_3, %c0_4] : memref<1x128xf32, #tpu.memory_space<vmem>>, vector<1x128xf32>
    %6 = vector.broadcast %5 : vector<1x128xf32> to vector<512x128xf32>
    %7 = arith.addf %4, %6 : vector<512x128xf32>
    %cst = arith.constant 2.000000e-01 : f32
    %8 = vector.broadcast %cst : f32 to vector<512x128xf32>
    %9 = arith.mulf %8, %7 : vector<512x128xf32>
    %10 = arith.maximumf %7, %9 : vector<512x128xf32>
    %11 = arith.truncf %10 : vector<512x128xf32> to vector<512x128xbf16>
    %c0_5 = arith.constant 0 : index
    %c0_6 = arith.constant 0 : index
    %12 = vector.load %arg4[%c0_5, %c0_6] : memref<512x128xbf16, #tpu.memory_space<vmem>>, vector<512x128xbf16>
    tpu.vector_store %arg4[%c0_5, %c0_6], %11 {strides = array<i32>} : memref<512x128xbf16, #tpu.memory_space<vmem>>, vector<512x128xbf16>,
    return
  }
  func.func @transform_0(%arg0: i32) -> (i32, i32) {
    %c0_i32 = arith.constant 0 : i32
    %c0_i32_0 = arith.constant 0 : i32
    return %arg0, %c0_i32 : i32, i32
  }
  func.func @transform_1(%arg0: i32) -> (i32, i32) {
    %c0_i32 = arith.constant 0 : i32
    %c0_i32_0 = arith.constant 0 : i32
    %c0_i32_1 = arith.constant 0 : i32
    return %c0_i32, %c0_i32_0 : i32, i32
  }
  func.func @transform_2(%arg0: i32) -> (i32, i32) {
    %c0_i32 = arith.constant 0 : i32
    %c0_i32_0 = arith.constant 0 : i32
    %c0_i32_1 = arith.constant 0 : i32
    return %c0_i32, %c0_i32_0 : i32, i32
  }
  func.func @transform_3(%arg0: i32) -> (i32, i32) {
    %c0_i32 = arith.constant 0 : i32
    %c0_i32_0 = arith.constant 0 : i32
    return %arg0, %c0_i32 : i32, i32
  }
}

module attributes {stable_mosaic.version = 11 : i64} {
  func.func @_matmul_bias_stats_kernel(%arg0: i32, %arg1: memref<128x256xbf16, #tpu.memory_space<vmem>>, %arg2: memref<256x128xbf16, #tpu.memory_space<vmem>>, %arg3: memref<1x128xf32, #tpu.memory_space<vmem>>, %arg4: memref<128x128xbf16, #tpu.memory_space<vmem>>, %arg5: memref<1x1x128xf32, #tpu.memory_space<vmem>>, %arg6: memref<1x1x128xf32, #tpu.memory_space<vmem>>) attributes {dimension_semantics = [#tpu.dimension_semantics<parallel>], iteration_bounds = array<i64: 1>, scalar_prefetch = 0 : i64, scratch_operands = 0 : i64, tpu.core_type = #tpu.core_type<tc>, window_params = [{transform_indices = @transform_0, window_bounds = array<i64: 128, 256>}, {pipeline_mode = #tpu.pipeline_mode<synchronous>, transform_indices = @transform_1, window_bounds = array<i64: 256, 128>}, {pipeline_mode = #tpu.pipeline_mode<synchronous>, transform_indices = @transform_2, window_bounds = array<i64: 1, 128>}, {transform_indices = @transform_3, window_bounds = array<i64: 128, 128>}, {transform_indices = @transform_4, window_bounds = array<i64: 1, 1, 128>}, {transform_indices = @transform_5, window_bounds = array<i64: 1, 1, 128>}]} {
    %c0 = arith.constant 0 : index
    %c0_0 = arith.constant 0 : index
    %0 = vector.load %arg1[%c0, %c0_0] : memref<128x256xbf16, #tpu.memory_space<vmem>>, vector<128x256xbf16>
    %c0_1 = arith.constant 0 : index
    %c0_2 = arith.constant 0 : index
    %1 = vector.load %arg2[%c0_1, %c0_2] : memref<256x128xbf16, #tpu.memory_space<vmem>>, vector<256x128xbf16>
    %cst = arith.constant dense<0.000000e+00> : vector<128x128xf32>
    %2 = tpu.matmul %0, %1, %cst {dimension_numbers = #tpu.dot_dimension_numbers<[1], [0], [0], [1], [0, 0, 1, 1], [], []>} : vector<128x256xbf16>, vector<256x128xbf16>, vector<128x128xf32> -> vector<128x128xf32>
    %c0_3 = arith.constant 0 : index
    %c0_4 = arith.constant 0 : index
    %3 = vector.load %arg3[%c0_3, %c0_4] : memref<1x128xf32, #tpu.memory_space<vmem>>, vector<1x128xf32>
    %4 = vector.broadcast %3 : vector<1x128xf32> to vector<128x128xf32>
    %5 = arith.addf %2, %4 : vector<128x128xf32>
    %cst_5 = arith.constant dense<0.000000e+00> : vector<128xf32>
    %6 = vector.multi_reduction <add>, %5, %cst_5 [0] : vector<128x128xf32> to vector<128xf32>
    %7 = vector.shape_cast %6 : vector<128xf32> to vector<1x1x128xf32>
    %c0_6 = arith.constant 0 : index
    %c0_7 = arith.constant 0 : index
    %c0_8 = arith.constant 0 : index
    %8 = vector.load %arg5[%c0_6, %c0_7, %c0_8] : memref<1x1x128xf32, #tpu.memory_space<vmem>>, vector<1x1x128xf32>
    tpu.vector_store %arg5[%c0_6, %c0_7, %c0_8], %7 {strides = array<i32>} : memref<1x1x128xf32, #tpu.memory_space<vmem>>, vector<1x1x128xf32>,
    %9 = arith.mulf %5, %5 : vector<128x128xf32>
    %cst_9 = arith.constant dense<0.000000e+00> : vector<128xf32>
    %10 = vector.multi_reduction <add>, %9, %cst_9 [0] : vector<128x128xf32> to vector<128xf32>
    %11 = vector.shape_cast %10 : vector<128xf32> to vector<1x1x128xf32>
    %c0_10 = arith.constant 0 : index
    %c0_11 = arith.constant 0 : index
    %c0_12 = arith.constant 0 : index
    %12 = vector.load %arg6[%c0_10, %c0_11, %c0_12] : memref<1x1x128xf32, #tpu.memory_space<vmem>>, vector<1x1x128xf32>
    tpu.vector_store %arg6[%c0_10, %c0_11, %c0_12], %11 {strides = array<i32>} : memref<1x1x128xf32, #tpu.memory_space<vmem>>, vector<1x1x128xf32>,
    %13 = arith.truncf %5 : vector<128x128xf32> to vector<128x128xbf16>
    %c0_13 = arith.constant 0 : index
    %c0_14 = arith.constant 0 : index
    %14 = vector.load %arg4[%c0_13, %c0_14] : memref<128x128xbf16, #tpu.memory_space<vmem>>, vector<128x128xbf16>
    tpu.vector_store %arg4[%c0_13, %c0_14], %13 {strides = array<i32>} : memref<128x128xbf16, #tpu.memory_space<vmem>>, vector<128x128xbf16>,
    return
  }
  func.func @transform_0(%arg0: i32) -> (i32, i32) {
    %c0_i32 = arith.constant 0 : i32
    %c0_i32_0 = arith.constant 0 : i32
    return %arg0, %c0_i32 : i32, i32
  }
  func.func @transform_1(%arg0: i32) -> (i32, i32) {
    %c0_i32 = arith.constant 0 : i32
    %c0_i32_0 = arith.constant 0 : i32
    %c0_i32_1 = arith.constant 0 : i32
    return %c0_i32, %c0_i32_0 : i32, i32
  }
  func.func @transform_2(%arg0: i32) -> (i32, i32) {
    %c0_i32 = arith.constant 0 : i32
    %c0_i32_0 = arith.constant 0 : i32
    %c0_i32_1 = arith.constant 0 : i32
    return %c0_i32, %c0_i32_0 : i32, i32
  }
  func.func @transform_3(%arg0: i32) -> (i32, i32) {
    %c0_i32 = arith.constant 0 : i32
    %c0_i32_0 = arith.constant 0 : i32
    return %arg0, %c0_i32 : i32, i32
  }
  func.func @transform_4(%arg0: i32) -> (i32, i32, i32) {
    %c0_i32 = arith.constant 0 : i32
    %c0_i32_0 = arith.constant 0 : i32
    %c0_i32_1 = arith.constant 0 : i32
    return %arg0, %c0_i32, %c0_i32_0 : i32, i32, i32
  }
  func.func @transform_5(%arg0: i32) -> (i32, i32, i32) {
    %c0_i32 = arith.constant 0 : i32
    %c0_i32_0 = arith.constant 0 : i32
    %c0_i32_1 = arith.constant 0 : i32
    return %arg0, %c0_i32, %c0_i32_0 : i32, i32, i32
  }
}

module attributes {stable_mosaic.version = 11 : i64} {
  func.func @_affine_leaky_kernel(%arg0: i32, %arg1: memref<128x128xbf16, #tpu.memory_space<vmem>>, %arg2: memref<1x128xf32, #tpu.memory_space<vmem>>, %arg3: memref<1x128xf32, #tpu.memory_space<vmem>>, %arg4: memref<128x128xbf16, #tpu.memory_space<vmem>>) attributes {dimension_semantics = [#tpu.dimension_semantics<parallel>], iteration_bounds = array<i64: 1>, scalar_prefetch = 0 : i64, scratch_operands = 0 : i64, tpu.core_type = #tpu.core_type<tc>, window_params = [{transform_indices = @transform_0, window_bounds = array<i64: 128, 128>}, {pipeline_mode = #tpu.pipeline_mode<synchronous>, transform_indices = @transform_1, window_bounds = array<i64: 1, 128>}, {pipeline_mode = #tpu.pipeline_mode<synchronous>, transform_indices = @transform_2, window_bounds = array<i64: 1, 128>}, {transform_indices = @transform_3, window_bounds = array<i64: 128, 128>}]} {
    %c0 = arith.constant 0 : index
    %c0_0 = arith.constant 0 : index
    %0 = vector.load %arg1[%c0, %c0_0] : memref<128x128xbf16, #tpu.memory_space<vmem>>, vector<128x128xbf16>
    %1 = arith.extf %0 : vector<128x128xbf16> to vector<128x128xf32>
    %c0_1 = arith.constant 0 : index
    %c0_2 = arith.constant 0 : index
    %2 = vector.load %arg2[%c0_1, %c0_2] : memref<1x128xf32, #tpu.memory_space<vmem>>, vector<1x128xf32>
    %3 = vector.broadcast %2 : vector<1x128xf32> to vector<128x128xf32>
    %4 = arith.mulf %1, %3 : vector<128x128xf32>
    %c0_3 = arith.constant 0 : index
    %c0_4 = arith.constant 0 : index
    %5 = vector.load %arg3[%c0_3, %c0_4] : memref<1x128xf32, #tpu.memory_space<vmem>>, vector<1x128xf32>
    %6 = vector.broadcast %5 : vector<1x128xf32> to vector<128x128xf32>
    %7 = arith.addf %4, %6 : vector<128x128xf32>
    %cst = arith.constant 2.000000e-01 : f32
    %8 = vector.broadcast %cst : f32 to vector<128x128xf32>
    %9 = arith.mulf %8, %7 : vector<128x128xf32>
    %10 = arith.maximumf %7, %9 : vector<128x128xf32>
    %11 = arith.truncf %10 : vector<128x128xf32> to vector<128x128xbf16>
    %c0_5 = arith.constant 0 : index
    %c0_6 = arith.constant 0 : index
    %12 = vector.load %arg4[%c0_5, %c0_6] : memref<128x128xbf16, #tpu.memory_space<vmem>>, vector<128x128xbf16>
    tpu.vector_store %arg4[%c0_5, %c0_6], %11 {strides = array<i32>} : memref<128x128xbf16, #tpu.memory_space<vmem>>, vector<128x128xbf16>,
    return
  }
  func.func @transform_0(%arg0: i32) -> (i32, i32) {
    %c0_i32 = arith.constant 0 : i32
    %c0_i32_0 = arith.constant 0 : i32
    return %arg0, %c0_i32 : i32, i32
  }
  func.func @transform_1(%arg0: i32) -> (i32, i32) {
    %c0_i32 = arith.constant 0 : i32
    %c0_i32_0 = arith.constant 0 : i32
    %c0_i32_1 = arith.constant 0 : i32
    return %c0_i32, %c0_i32_0 : i32, i32
  }
  func.func @transform_2(%arg0: i32) -> (i32, i32) {
    %c0_i32 = arith.constant 0 : i32
    %c0_i32_0 = arith.constant 0 : i32
    %c0_i32_1 = arith.constant 0 : i32
    return %c0_i32, %c0_i32_0 : i32, i32
  }
  func.func @transform_3(%arg0: i32) -> (i32, i32) {
    %c0_i32 = arith.constant 0 : i32
    %c0_i32_0 = arith.constant 0 : i32
    return %arg0, %c0_i32 : i32, i32
  }
}

module attributes {stable_mosaic.version = 11 : i64} {
  func.func @_matmul_bias_stats_kernel(%arg0: i32, %arg1: memref<32x512xbf16, #tpu.memory_space<vmem>>, %arg2: memref<512x128xbf16, #tpu.memory_space<vmem>>, %arg3: memref<1x128xf32, #tpu.memory_space<vmem>>, %arg4: memref<32x128xbf16, #tpu.memory_space<vmem>>, %arg5: memref<1x1x128xf32, #tpu.memory_space<vmem>>, %arg6: memref<1x1x128xf32, #tpu.memory_space<vmem>>) attributes {dimension_semantics = [#tpu.dimension_semantics<parallel>], iteration_bounds = array<i64: 1>, scalar_prefetch = 0 : i64, scratch_operands = 0 : i64, tpu.core_type = #tpu.core_type<tc>, window_params = [{transform_indices = @transform_0, window_bounds = array<i64: 32, 512>}, {pipeline_mode = #tpu.pipeline_mode<synchronous>, transform_indices = @transform_1, window_bounds = array<i64: 512, 128>}, {pipeline_mode = #tpu.pipeline_mode<synchronous>, transform_indices = @transform_2, window_bounds = array<i64: 1, 128>}, {transform_indices = @transform_3, window_bounds = array<i64: 32, 128>}, {transform_indices = @transform_4, window_bounds = array<i64: 1, 1, 128>}, {transform_indices = @transform_5, window_bounds = array<i64: 1, 1, 128>}]} {
    %c0 = arith.constant 0 : index
    %c0_0 = arith.constant 0 : index
    %0 = vector.load %arg1[%c0, %c0_0] : memref<32x512xbf16, #tpu.memory_space<vmem>>, vector<32x512xbf16>
    %c0_1 = arith.constant 0 : index
    %c0_2 = arith.constant 0 : index
    %1 = vector.load %arg2[%c0_1, %c0_2] : memref<512x128xbf16, #tpu.memory_space<vmem>>, vector<512x128xbf16>
    %cst = arith.constant dense<0.000000e+00> : vector<32x128xf32>
    %2 = tpu.matmul %0, %1, %cst {dimension_numbers = #tpu.dot_dimension_numbers<[1], [0], [0], [1], [0, 0, 1, 1], [], []>} : vector<32x512xbf16>, vector<512x128xbf16>, vector<32x128xf32> -> vector<32x128xf32>
    %c0_3 = arith.constant 0 : index
    %c0_4 = arith.constant 0 : index
    %3 = vector.load %arg3[%c0_3, %c0_4] : memref<1x128xf32, #tpu.memory_space<vmem>>, vector<1x128xf32>
    %4 = vector.broadcast %3 : vector<1x128xf32> to vector<32x128xf32>
    %5 = arith.addf %2, %4 : vector<32x128xf32>
    %cst_5 = arith.constant dense<0.000000e+00> : vector<128xf32>
    %6 = vector.multi_reduction <add>, %5, %cst_5 [0] : vector<32x128xf32> to vector<128xf32>
    %7 = vector.shape_cast %6 : vector<128xf32> to vector<1x1x128xf32>
    %c0_6 = arith.constant 0 : index
    %c0_7 = arith.constant 0 : index
    %c0_8 = arith.constant 0 : index
    %8 = vector.load %arg5[%c0_6, %c0_7, %c0_8] : memref<1x1x128xf32, #tpu.memory_space<vmem>>, vector<1x1x128xf32>
    tpu.vector_store %arg5[%c0_6, %c0_7, %c0_8], %7 {strides = array<i32>} : memref<1x1x128xf32, #tpu.memory_space<vmem>>, vector<1x1x128xf32>,
    %9 = arith.mulf %5, %5 : vector<32x128xf32>
    %cst_9 = arith.constant dense<0.000000e+00> : vector<128xf32>
    %10 = vector.multi_reduction <add>, %9, %cst_9 [0] : vector<32x128xf32> to vector<128xf32>
    %11 = vector.shape_cast %10 : vector<128xf32> to vector<1x1x128xf32>
    %c0_10 = arith.constant 0 : index
    %c0_11 = arith.constant 0 : index
    %c0_12 = arith.constant 0 : index
    %12 = vector.load %arg6[%c0_10, %c0_11, %c0_12] : memref<1x1x128xf32, #tpu.memory_space<vmem>>, vector<1x1x128xf32>
    tpu.vector_store %arg6[%c0_10, %c0_11, %c0_12], %11 {strides = array<i32>} : memref<1x1x128xf32, #tpu.memory_space<vmem>>, vector<1x1x128xf32>,
    %13 = arith.truncf %5 : vector<32x128xf32> to vector<32x128xbf16>
    %c0_13 = arith.constant 0 : index
    %c0_14 = arith.constant 0 : index
    %14 = vector.load %arg4[%c0_13, %c0_14] : memref<32x128xbf16, #tpu.memory_space<vmem>>, vector<32x128xbf16>
    tpu.vector_store %arg4[%c0_13, %c0_14], %13 {strides = array<i32>} : memref<32x128xbf16, #tpu.memory_space<vmem>>, vector<32x128xbf16>,
    return
  }
  func.func @transform_0(%arg0: i32) -> (i32, i32) {
    %c0_i32 = arith.constant 0 : i32
    %c0_i32_0 = arith.constant 0 : i32
    return %arg0, %c0_i32 : i32, i32
  }
  func.func @transform_1(%arg0: i32) -> (i32, i32) {
    %c0_i32 = arith.constant 0 : i32
    %c0_i32_0 = arith.constant 0 : i32
    %c0_i32_1 = arith.constant 0 : i32
    return %c0_i32, %c0_i32_0 : i32, i32
  }
  func.func @transform_2(%arg0: i32) -> (i32, i32) {
    %c0_i32 = arith.constant 0 : i32
    %c0_i32_0 = arith.constant 0 : i32
    %c0_i32_1 = arith.constant 0 : i32
    return %c0_i32, %c0_i32_0 : i32, i32
  }
  func.func @transform_3(%arg0: i32) -> (i32, i32) {
    %c0_i32 = arith.constant 0 : i32
    %c0_i32_0 = arith.constant 0 : i32
    return %arg0, %c0_i32 : i32, i32
  }
  func.func @transform_4(%arg0: i32) -> (i32, i32, i32) {
    %c0_i32 = arith.constant 0 : i32
    %c0_i32_0 = arith.constant 0 : i32
    %c0_i32_1 = arith.constant 0 : i32
    return %arg0, %c0_i32, %c0_i32_0 : i32, i32, i32
  }
  func.func @transform_5(%arg0: i32) -> (i32, i32, i32) {
    %c0_i32 = arith.constant 0 : i32
    %c0_i32_0 = arith.constant 0 : i32
    %c0_i32_1 = arith.constant 0 : i32
    return %arg0, %c0_i32, %c0_i32_0 : i32, i32, i32
  }
}

module attributes {stable_mosaic.version = 11 : i64} {
  func.func @_affine_leaky_kernel(%arg0: i32, %arg1: memref<32x128xbf16, #tpu.memory_space<vmem>>, %arg2: memref<1x128xf32, #tpu.memory_space<vmem>>, %arg3: memref<1x128xf32, #tpu.memory_space<vmem>>, %arg4: memref<32x128xbf16, #tpu.memory_space<vmem>>) attributes {dimension_semantics = [#tpu.dimension_semantics<parallel>], iteration_bounds = array<i64: 1>, scalar_prefetch = 0 : i64, scratch_operands = 0 : i64, tpu.core_type = #tpu.core_type<tc>, window_params = [{transform_indices = @transform_0, window_bounds = array<i64: 32, 128>}, {pipeline_mode = #tpu.pipeline_mode<synchronous>, transform_indices = @transform_1, window_bounds = array<i64: 1, 128>}, {pipeline_mode = #tpu.pipeline_mode<synchronous>, transform_indices = @transform_2, window_bounds = array<i64: 1, 128>}, {transform_indices = @transform_3, window_bounds = array<i64: 32, 128>}]} {
    %c0 = arith.constant 0 : index
    %c0_0 = arith.constant 0 : index
    %0 = vector.load %arg1[%c0, %c0_0] : memref<32x128xbf16, #tpu.memory_space<vmem>>, vector<32x128xbf16>
    %1 = arith.extf %0 : vector<32x128xbf16> to vector<32x128xf32>
    %c0_1 = arith.constant 0 : index
    %c0_2 = arith.constant 0 : index
    %2 = vector.load %arg2[%c0_1, %c0_2] : memref<1x128xf32, #tpu.memory_space<vmem>>, vector<1x128xf32>
    %3 = vector.broadcast %2 : vector<1x128xf32> to vector<32x128xf32>
    %4 = arith.mulf %1, %3 : vector<32x128xf32>
    %c0_3 = arith.constant 0 : index
    %c0_4 = arith.constant 0 : index
    %5 = vector.load %arg3[%c0_3, %c0_4] : memref<1x128xf32, #tpu.memory_space<vmem>>, vector<1x128xf32>
    %6 = vector.broadcast %5 : vector<1x128xf32> to vector<32x128xf32>
    %7 = arith.addf %4, %6 : vector<32x128xf32>
    %cst = arith.constant 2.000000e-01 : f32
    %8 = vector.broadcast %cst : f32 to vector<32x128xf32>
    %9 = arith.mulf %8, %7 : vector<32x128xf32>
    %10 = arith.maximumf %7, %9 : vector<32x128xf32>
    %11 = arith.truncf %10 : vector<32x128xf32> to vector<32x128xbf16>
    %c0_5 = arith.constant 0 : index
    %c0_6 = arith.constant 0 : index
    %12 = vector.load %arg4[%c0_5, %c0_6] : memref<32x128xbf16, #tpu.memory_space<vmem>>, vector<32x128xbf16>
    tpu.vector_store %arg4[%c0_5, %c0_6], %11 {strides = array<i32>} : memref<32x128xbf16, #tpu.memory_space<vmem>>, vector<32x128xbf16>,
    return
  }
  func.func @transform_0(%arg0: i32) -> (i32, i32) {
    %c0_i32 = arith.constant 0 : i32
    %c0_i32_0 = arith.constant 0 : i32
    return %arg0, %c0_i32 : i32, i32
  }
  func.func @transform_1(%arg0: i32) -> (i32, i32) {
    %c0_i32 = arith.constant 0 : i32
    %c0_i32_0 = arith.constant 0 : i32
    %c0_i32_1 = arith.constant 0 : i32
    return %c0_i32, %c0_i32_0 : i32, i32
  }
  func.func @transform_2(%arg0: i32) -> (i32, i32) {
    %c0_i32 = arith.constant 0 : i32
    %c0_i32_0 = arith.constant 0 : i32
    %c0_i32_1 = arith.constant 0 : i32
    return %c0_i32, %c0_i32_0 : i32, i32
  }
  func.func @transform_3(%arg0: i32) -> (i32, i32) {
    %c0_i32 = arith.constant 0 : i32
    %c0_i32_0 = arith.constant 0 : i32
    return %arg0, %c0_i32 : i32, i32
  }
}

module attributes {stable_mosaic.version = 11 : i64} {
  func.func @_fc_head_kernel(%arg0: i32, %arg1: memref<8x1024xbf16, #tpu.memory_space<vmem>>, %arg2: memref<1024x128xbf16, #tpu.memory_space<vmem>>, %arg3: memref<1x128xf32, #tpu.memory_space<vmem>>, %arg4: memref<128x128xbf16, #tpu.memory_space<vmem>>, %arg5: memref<1x128xf32, #tpu.memory_space<vmem>>, %arg6: memref<8x128xf32, #tpu.memory_space<vmem>>) attributes {dimension_semantics = [#tpu.dimension_semantics<parallel>], iteration_bounds = array<i64: 1>, scalar_prefetch = 0 : i64, scratch_operands = 0 : i64, tpu.core_type = #tpu.core_type<tc>, window_params = [{pipeline_mode = #tpu.pipeline_mode<synchronous>, transform_indices = @transform_0, window_bounds = array<i64: 8, 1024>}, {pipeline_mode = #tpu.pipeline_mode<synchronous>, transform_indices = @transform_1, window_bounds = array<i64: 1024, 128>}, {pipeline_mode = #tpu.pipeline_mode<synchronous>, transform_indices = @transform_2, window_bounds = array<i64: 1, 128>}, {pipeline_mode = #tpu.pipeline_mode<synchronous>, transform_indices = @transform_3, window_bounds = array<i64: 128, 128>}, {pipeline_mode = #tpu.pipeline_mode<synchronous>, transform_indices = @transform_4, window_bounds = array<i64: 1, 128>}, {pipeline_mode = #tpu.pipeline_mode<synchronous>, transform_indices = @transform_5, window_bounds = array<i64: 8, 128>}]} {
    %c0 = arith.constant 0 : index
    %c0_0 = arith.constant 0 : index
    %0 = vector.load %arg1[%c0, %c0_0] : memref<8x1024xbf16, #tpu.memory_space<vmem>>, vector<8x1024xbf16>
    %c0_1 = arith.constant 0 : index
    %c0_2 = arith.constant 0 : index
    %1 = vector.load %arg2[%c0_1, %c0_2] : memref<1024x128xbf16, #tpu.memory_space<vmem>>, vector<1024x128xbf16>
    %cst = arith.constant dense<0.000000e+00> : vector<8x128xf32>
    %2 = tpu.matmul %0, %1, %cst {dimension_numbers = #tpu.dot_dimension_numbers<[1], [0], [0], [1], [0, 0, 1, 1], [], []>} : vector<8x1024xbf16>, vector<1024x128xbf16>, vector<8x128xf32> -> vector<8x128xf32>
    %c0_3 = arith.constant 0 : index
    %c0_4 = arith.constant 0 : index
    %3 = vector.load %arg3[%c0_3, %c0_4] : memref<1x128xf32, #tpu.memory_space<vmem>>, vector<1x128xf32>
    %4 = vector.broadcast %3 : vector<1x128xf32> to vector<8x128xf32>
    %5 = arith.addf %2, %4 : vector<8x128xf32>
    %cst_5 = arith.constant 2.000000e-01 : f32
    %6 = vector.broadcast %cst_5 : f32 to vector<8x128xf32>
    %7 = arith.mulf %6, %5 : vector<8x128xf32>
    %8 = arith.maximumf %5, %7 : vector<8x128xf32>
    %9 = arith.truncf %8 : vector<8x128xf32> to vector<8x128xbf16>
    %c0_6 = arith.constant 0 : index
    %c0_7 = arith.constant 0 : index
    %10 = vector.load %arg4[%c0_6, %c0_7] : memref<128x128xbf16, #tpu.memory_space<vmem>>, vector<128x128xbf16>
    %cst_8 = arith.constant dense<0.000000e+00> : vector<8x128xf32>
    %11 = tpu.matmul %9, %10, %cst_8 {dimension_numbers = #tpu.dot_dimension_numbers<[1], [0], [0], [1], [0, 0, 1, 1], [], []>} : vector<8x128xbf16>, vector<128x128xbf16>, vector<8x128xf32> -> vector<8x128xf32>
    %c0_9 = arith.constant 0 : index
    %c0_10 = arith.constant 0 : index
    %12 = vector.load %arg5[%c0_9, %c0_10] : memref<1x128xf32, #tpu.memory_space<vmem>>, vector<1x128xf32>
    %13 = vector.broadcast %12 : vector<1x128xf32> to vector<8x128xf32>
    %14 = arith.addf %11, %13 : vector<8x128xf32>
    %cst_11 = arith.constant 0.000000e+00 : f32
    %15 = vector.broadcast %cst_11 : f32 to vector<8x128xf32>
    %16 = arith.subf %15, %14 : vector<8x128xf32>
    %17 = math.exp %16 : vector<8x128xf32>
    %cst_12 = arith.constant 1.000000e+00 : f32
    %18 = vector.broadcast %cst_12 : f32 to vector<8x128xf32>
    %19 = arith.addf %18, %17 : vector<8x128xf32>
    %cst_13 = arith.constant 1.000000e+00 : f32
    %20 = vector.broadcast %cst_13 : f32 to vector<8x128xf32>
    %21 = arith.divf %20, %19 : vector<8x128xf32>
    %c0_14 = arith.constant 0 : index
    %c0_15 = arith.constant 0 : index
    %22 = vector.load %arg6[%c0_14, %c0_15] : memref<8x128xf32, #tpu.memory_space<vmem>>, vector<8x128xf32>
    tpu.vector_store %arg6[%c0_14, %c0_15], %21 {strides = array<i32>} : memref<8x128xf32, #tpu.memory_space<vmem>>, vector<8x128xf32>,
    return
  }
  func.func @transform_0(%arg0: i32) -> (i32, i32) {
    %c0_i32 = arith.constant 0 : i32
    %c0_i32_0 = arith.constant 0 : i32
    %c0_i32_1 = arith.constant 0 : i32
    return %c0_i32, %c0_i32_0 : i32, i32
  }
  func.func @transform_1(%arg0: i32) -> (i32, i32) {
    %c0_i32 = arith.constant 0 : i32
    %c0_i32_0 = arith.constant 0 : i32
    %c0_i32_1 = arith.constant 0 : i32
    return %c0_i32, %c0_i32_0 : i32, i32
  }
  func.func @transform_2(%arg0: i32) -> (i32, i32) {
    %c0_i32 = arith.constant 0 : i32
    %c0_i32_0 = arith.constant 0 : i32
    %c0_i32_1 = arith.constant 0 : i32
    return %c0_i32, %c0_i32_0 : i32, i32
  }
  func.func @transform_3(%arg0: i32) -> (i32, i32) {
    %c0_i32 = arith.constant 0 : i32
    %c0_i32_0 = arith.constant 0 : i32
    %c0_i32_1 = arith.constant 0 : i32
    return %c0_i32, %c0_i32_0 : i32, i32
  }
  func.func @transform_4(%arg0: i32) -> (i32, i32) {
    %c0_i32 = arith.constant 0 : i32
    %c0_i32_0 = arith.constant 0 : i32
    %c0_i32_1 = arith.constant 0 : i32
    return %c0_i32, %c0_i32_0 : i32, i32
  }
  func.func @transform_5(%arg0: i32) -> (i32, i32) {
    %c0_i32 = arith.constant 0 : i32
    %c0_i32_0 = arith.constant 0 : i32
    %c0_i32_1 = arith.constant 0 : i32
    return %c0_i32, %c0_i32_0 : i32, i32
  }
}

</mosaic_0001>

<bundles_post_ra>
// kernel: discriminator_forward.8
= control target key start
LH: loop header
LB: loop body
LE: loop exit
PB: predicated region body
PF: predicated region fallthrough
CT: control target
= control target key end

     0   :  { %s1442_s12 = smov 0   ;;  %s1627_s0 = inlined_call_operand.vmem [shape: bf16[2048,128], index: 0, kind: input, shape index: {}]   ;;  %s1628_s1 = inlined_call_operand.vmem [shape: bf16[128,128], index: 1, kind: input, shape index: {}]   ;;  %s1629_s2 = inlined_call_operand.vmem [shape: f32[1,128], index: 2, kind: input, shape index: {}]   ;;  %s1630_s3 = inlined_call_operand.vmem [shape: bf16[2048,128], index: 3, kind: output, shape index: {}]  }
   0x1 LB: > { %s979_s13 = sadd.s32 4294967295, %s1420_s12   ;;  %p983_p0 = scmp.ge.s32.totalorder %s1420_s12, 1  ;;  %s1420_s12 = sphi %s1442_s12, %s13_s12  }
   0x2   : > { %p138_p1 = scmp.lt.s32.totalorder %s1420_s12, 5 }
   0x4   : > { %p139_p2 = pnand %p983_p0, %p138_p1 }
   0x5   : > { %s984_s22 = sshll.u32 (!%p139_p2), %s979_s13, 6 }
   0x6   : > { %142 = sbr.rel (%p139_p2) target bundleno = 306 (0x132), region = 32  ;;  %p163_p3 = scmp.lt.s32.totalorder (!%p139_p2), %s984_s22, 255 }
   0xb   : > { %v1189_v0 = vld [vmem:[%s1628_s1 + $0x38] sm:$0xff]  ;;  %v1188_v1 = vld [vmem:[%s1628_s1 + $0x30] sm:$0xff]  ;;  %v1187_v2 = vld [vmem:[%s1628_s1 + $0x28] sm:$0xff]  ;;  %s1632_s22 = smov (!%p163_p3, %s984_s22), 255 }
   0xc   : > { %498 = vmatpush.bf16.msra.mxu0 %v1189_v0  ;;  %1381 = vmatpush.bf16.msra.mxu1 %v1189_v0  ;;  %v1186_v3 = vld [vmem:[%s1628_s1 + $0x20] sm:$0xff]  ;;  %v1185_v4 = vld [vmem:[%s1628_s1 + $0x18] sm:$0xff]  ;;  %v1184_v5 = vld [vmem:[%s1628_s1 + $0x10] sm:$0xff]  ;;  %s985_s29 = sshll.u32 %s1632_s22, 2 }
   0xd   : > { %1382 = vmatpush.bf16.msra.mxu2 %v1189_v0  ;;  %1383 = vmatpush.bf16.msra.mxu3 %v1189_v0  ;;  %v1183_v6 = vld [vmem:[%s1628_s1 + $0x8] sm:$0xff]  ;;  %v1182_v7 = vld [vmem:[%s1628_s1] sm:$0xff]  ;;  %s1482_s7 = scalar_lea.vmem %s1627_s0, %s985_s29  ;;  %s1532_s13 = scalar_lea.vmem %s1630_s3, %s985_s29 }
   0xe   : > { %v1150_v8 = vld [vmem:[%s1482_s7] sm:$0xff]  ;;  %v1151_v12 = vld [vmem:[%s1482_s7 + $0x8] sm:$0xff]  ;;  %v1152_v16 = vld [vmem:[%s1482_s7 + $0x10] sm:$0xff] }
   0xf   : > { %v1158_v9 = vld [vmem:[%s1482_s7 + $0x40] sm:$0xff]  ;;  %v1159_v13 = vld [vmem:[%s1482_s7 + $0x48] sm:$0xff]  ;;  %v1160_v17 = vld [vmem:[%s1482_s7 + $0x50] sm:$0xff] }
  0x10   : > { %499 = vmatpush.bf16.msra.mxu0 %v1188_v1  ;;  %1384 = vmatpush.bf16.msra.mxu1 %v1188_v1  ;;  %v1166_v10 = vld [vmem:[%s1482_s7 + $0x80] sm:$0xff]  ;;  %v1167_v14 = vld [vmem:[%s1482_s7 + $0x88] sm:$0xff]  ;;  %v1168_v18 = vld [vmem:[%s1482_s7 + $0x90] sm:$0xff] }
  0x11   : > { %1385 = vmatpush.bf16.msra.mxu2 %v1188_v1  ;;  %1386 = vmatpush.bf16.msra.mxu3 %v1188_v1  ;;  %v1174_v11 = vld [vmem:[%s1482_s7 + $0xc0] sm:$0xff]  ;;  %v1175_v15 = vld [vmem:[%s1482_s7 + $0xc8] sm:$0xff]  ;;  %v1176_v19 = vld [vmem:[%s1482_s7 + $0xd0] sm:$0xff] }
  0x12   : > { %v1153_v20 = vld [vmem:[%s1482_s7 + $0x18] sm:$0xff]  ;;  %v1154_v24 = vld [vmem:[%s1482_s7 + $0x20] sm:$0xff]  ;;  %v1155_v28 = vld [vmem:[%s1482_s7 + $0x28] sm:$0xff] }
  0x13   : > { %v1161_v21 = vld [vmem:[%s1482_s7 + $0x58] sm:$0xff]  ;;  %v1162_v25 = vld [vmem:[%s1482_s7 + $0x60] sm:$0xff]  ;;  %v1163_v29 = vld [vmem:[%s1482_s7 + $0x68] sm:$0xff] }
  0x14   : > { %500 = vmatpush.bf16.msra.mxu0 %v1187_v2  ;;  %1387 = vmatpush.bf16.msra.mxu1 %v1187_v2  ;;  %v1169_v22 = vld [vmem:[%s1482_s7 + $0x98] sm:$0xff]  ;;  %v1170_v26 = vld [vmem:[%s1482_s7 + $0xa0] sm:$0xff]  ;;  %v1171_v30 = vld [vmem:[%s1482_s7 + $0xa8] sm:$0xff] }
  0x15   : > { %1388 = vmatpush.bf16.msra.mxu2 %v1187_v2  ;;  %1389 = vmatpush.bf16.msra.mxu3 %v1187_v2  ;;  %v1177_v23 = vld [vmem:[%s1482_s7 + $0xd8] sm:$0xff]  ;;  %v1178_v27 = vld [vmem:[%s1482_s7 + $0xe0] sm:$0xff]  ;;  %v1179_v31 = vld [vmem:[%s1482_s7 + $0xe8] sm:$0xff] }
  0x16   : > { %v1156_v32 = vld [vmem:[%s1482_s7 + $0x30] sm:$0xff]  ;;  %v1157_v36 = vld [vmem:[%s1482_s7 + $0x38] sm:$0xff]  ;;  %v1519_v42 = vld [vmem:[%s1629_s2] ss:$0 sm:$0xff] }
  0x17   : > { %v1164_v33 = vld [vmem:[%s1482_s7 + $0x70] sm:$0xff]  ;;  %v1165_v37 = vld [vmem:[%s1482_s7 + $0x78] sm:$0xff] }
  0x18   : > { %501 = vmatpush.bf16.msra.mxu0 %v1186_v3  ;;  %1390 = vmatpush.bf16.msra.mxu1 %v1186_v3  ;;  %v1172_v34 = vld [vmem:[%s1482_s7 + $0xb0] sm:$0xff]  ;;  %v1173_v38 = vld [vmem:[%s1482_s7 + $0xb8] sm:$0xff] }
  0x19   : > { %1391 = vmatpush.bf16.msra.mxu2 %v1186_v3  ;;  %1392 = vmatpush.bf16.msra.mxu3 %v1186_v3  ;;  %v1180_v35 = vld [vmem:[%s1482_s7 + $0xf0] sm:$0xff]  ;;  %v1181_v39 = vld [vmem:[%s1482_s7 + $0xf8] sm:$0xff] }
  0x1c   : > { %502 = vmatpush.bf16.msra.mxu0 %v1185_v4  ;;  %1393 = vmatpush.bf16.msra.mxu1 %v1185_v4 }
  0x1d   : > { %1394 = vmatpush.bf16.msra.mxu2 %v1185_v4  ;;  %1395 = vmatpush.bf16.msra.mxu3 %v1185_v4 }
  0x20   : > { %503 = vmatpush.bf16.msra.mxu0 %v1184_v5  ;;  %1396 = vmatpush.bf16.msra.mxu1 %v1184_v5 }
  0x21   : > { %1397 = vmatpush.bf16.msra.mxu2 %v1184_v5  ;;  %1398 = vmatpush.bf16.msra.mxu3 %v1184_v5 }
  0x24   : > { %504 = vmatpush.bf16.msra.mxu0 %v1183_v6  ;;  %1399 = vmatpush.bf16.msra.mxu1 %v1183_v6 }
  0x25   : > { %1400 = vmatpush.bf16.msra.mxu2 %v1183_v6  ;;  %1401 = vmatpush.bf16.msra.mxu3 %v1183_v6 }
  0x28   : > { %505 = vmatpush.bf16.msra.mxu0 %v1182_v7  ;;  %1402 = vmatpush.bf16.msra.mxu1 %v1182_v7 }
  0x29   : > { %1403 = vmatpush.bf16.msra.mxu2 %v1182_v7  ;;  %1404 = vmatpush.bf16.msra.mxu3 %v1182_v7 }
  0x2b   : > { %506 = vmatmul.bf16.vlgmr.msra.gmra.mxu0 %v1150_v8  ;;  %546 = vmatmul.bf16.vlgmr.msra.gmra.mxu1 %v1158_v9 }
  0x2c   : > { %586 = vmatmul.bf16.vlgmr.msra.gmra.mxu2 %v1166_v10  ;;  %626 = vmatmul.bf16.vlgmr.msra.gmra.mxu3 %v1174_v11 }
  0x3b   : > { %511 = vmatmul.bf16.gmra.mxu0 %v1151_v12  ;;  %551 = vmatmul.bf16.gmra.mxu1 %v1159_v13 }
  0x3c   : > { %591 = vmatmul.bf16.gmra.mxu2 %v1167_v14  ;;  %631 = vmatmul.bf16.gmra.mxu3 %v1175_v15 }
  0x4b   : > { %516 = vmatmul.bf16.gmra.mxu0 %v1152_v16  ;;  %556 = vmatmul.bf16.gmra.mxu1 %v1160_v17 }
  0x4c   : > { %596 = vmatmul.bf16.gmra.mxu2 %v1168_v18  ;;  %636 = vmatmul.bf16.gmra.mxu3 %v1176_v19 }
  0x5b   : > { %521 = vmatmul.bf16.gmra.mxu0 %v1153_v20  ;;  %561 = vmatmul.bf16.gmra.mxu1 %v1161_v21 }
  0x5c   : > { %601 = vmatmul.bf16.gmra.mxu2 %v1169_v22  ;;  %641 = vmatmul.bf16.gmra.mxu3 %v1177_v23 }
  0x6b   : > { %526 = vmatmul.bf16.gmra.mxu0 %v1154_v24  ;;  %566 = vmatmul.bf16.gmra.mxu1 %v1162_v25 }
  0x6c   : > { %606 = vmatmul.bf16.gmra.mxu2 %v1170_v26  ;;  %646 = vmatmul.bf16.gmra.mxu3 %v1178_v27 }
  0x7b   : > { %531 = vmatmul.bf16.gmra.mxu0 %v1155_v28  ;;  %571 = vmatmul.bf16.gmra.mxu1 %v1163_v29 }
  0x7c   : > { %611 = vmatmul.bf16.gmra.mxu2 %v1171_v30  ;;  %651 = vmatmul.bf16.gmra.mxu3 %v1179_v31 }
  0x8b   : > { %536 = vmatmul.bf16.gmra.mxu0 %v1156_v32  ;;  %576 = vmatmul.bf16.gmra.mxu1 %v1164_v33 }
  0x8c   : > { %616 = vmatmul.bf16.gmra.mxu2 %v1172_v34  ;;  %656 = vmatmul.bf16.gmra.mxu3 %v1180_v35 }
  0x9b   : > { %541 = vmatmul.bf16.gmra.mxu0 %v1157_v36  ;;  %581 = vmatmul.bf16.gmra.mxu1 %v1165_v37 }
  0x9c   : > { %621 = vmatmul.bf16.gmra.mxu2 %v1173_v38  ;;  %661 = vmatmul.bf16.gmra.mxu3 %v1181_v39 }
  0xa8   : > { %v507_v40 = vpop.f32.mrf.mxu0  ;;  %v547_v41 = vpop.f32.mrf.mxu1 }
  0xa9   : > { %v508_v43 = vadd.f32 %v1519_v42, %v507_v40  ;;  %v548_v44 = vadd.f32 %v1519_v42, %v547_v41 }
  0xab   : > { %v667_v49 = vmul.f32 0.2, %v508_v43  ;;  %v683_v50 = vmul.f32 0.2, %v548_v44 }
  0xad   : > { %v731_v57 = vmax.f32 %v508_v43, %v667_v49  ;;  %v747_v58 = vmax.f32 %v548_v44, %v683_v50 }
  0xaf   : > { %v587_v45 = vpop.f32.mrf.mxu2  ;;  %v627_v46 = vpop.f32.mrf.mxu3 }
  0xb0   : > { %v509_v47 = vpop.f32.mrf.mxu0  ;;  %v549_v48 = vpop.f32.mrf.mxu1  ;;  %v588_v55 = vadd.f32 %v1519_v42, %v587_v45  ;;  %v628_v56 = vadd.f32 %v1519_v42, %v627_v46 }
  0xb1   : > { %v510_v51 = vadd.f32 %v1519_v42, %v509_v47  ;;  %v550_v52 = vadd.f32 %v1519_v42, %v549_v48 }
  0xb2   : > { %v699_v1 = vmul.f32 0.2, %v588_v55  ;;  %v715_v2 = vmul.f32 0.2, %v628_v56 }
  0xb3   : > { %v668_v53 = vmul.f32 0.2, %v510_v51  ;;  %v684_v54 = vmul.f32 0.2, %v550_v52 }
  0xb4   : > { %v763_v9 = vmax.f32 %v588_v55, %v699_v1  ;;  %v779_v10 = vmax.f32 %v628_v56, %v715_v2 }
  0xb5   : > { %v732_v59 = vmax.f32 %v510_v51, %v668_v53  ;;  %v748_v60 = vmax.f32 %v550_v52, %v684_v54 }
  0xb7   : > { %v1193_v61 = vpack.c.bf16 %v732_v59, %v731_v57  ;;  %v1233_v62 = vpack.c.bf16 %v748_v60, %v747_v58  ;;  %v589_v63 = vpop.f32.mrf.mxu2  ;;  %v629_v0 = vpop.f32.mrf.mxu3 }
  0xb8   : > { %v590_v3 = vadd.f32 %v1519_v42, %v589_v63  ;;  %v630_v4 = vadd.f32 %v1519_v42, %v629_v0  ;;  %v512_v5 = vpop.f32.mrf.mxu0  ;;  %v552_v6 = vpop.f32.mrf.mxu1 }
  0xb9   : > { %1194 = vst [vmem:[%s1532_s13] sm:$0xff] %v1193_v61   ;;  %v513_v13 = vadd.f32 %v1519_v42, %v512_v5  ;;  %v553_v14 = vadd.f32 %v1519_v42, %v552_v6 }
  0xba   : > { %1357 = vst [vmem:[%s1532_s13 + $0x40] sm:$0xff] %v1233_v62   ;;  %v700_v7 = vmul.f32 0.2, %v590_v3  ;;  %v716_v8 = vmul.f32 0.2, %v630_v4 }
  0xbb   : > { %v669_v21 = vmul.f32 0.2, %v513_v13  ;;  %v685_v22 = vmul.f32 0.2, %v553_v14 }
  0xbc   : > { %v764_v11 = vmax.f32 %v590_v3, %v700_v7  ;;  %v780_v12 = vmax.f32 %v630_v4, %v716_v8 }
  0xbd   : > { %v733_v29 = vmax.f32 %v513_v13, %v669_v21  ;;  %v749_v30 = vmax.f32 %v553_v14, %v685_v22 }
  0xbe   : > { %v1273_v15 = vpack.c.bf16 %v764_v11, %v763_v9  ;;  %v1313_v16 = vpack.c.bf16 %v780_v12, %v779_v10 }
  0xbf   : > { %v592_v17 = vpop.f32.mrf.mxu2  ;;  %v632_v18 = vpop.f32.mrf.mxu3 }
  0xc0   : > { %1365 = vst [vmem:[%s1532_s13 + $0x80] sm:$0xff] %v1273_v15   ;;  %v514_v19 = vpop.f32.mrf.mxu0  ;;  %v554_v20 = vpop.f32.mrf.mxu1  ;;  %v593_v27 = vadd.f32 %v1519_v42, %v592_v17  ;;  %v633_v28 = vadd.f32 %v1519_v42, %v632_v18 }
  0xc1   : > { %1373 = vst [vmem:[%s1532_s13 + $0xc0] sm:$0xff] %v1313_v16   ;;  %v515_v23 = vadd.f32 %v1519_v42, %v514_v19  ;;  %v555_v24 = vadd.f32 %v1519_v42, %v554_v20 }
  0xc2   : > { %v701_v37 = vmul.f32 0.2, %v593_v27  ;;  %v717_v38 = vmul.f32 0.2, %v633_v28 }
  0xc3   : > { %v670_v25 = vmul.f32 0.2, %v515_v23  ;;  %v686_v26 = vmul.f32 0.2, %v555_v24 }
  0xc4   : > { %v765_v46 = vmax.f32 %v593_v27, %v701_v37  ;;  %v781_v47 = vmax.f32 %v633_v28, %v717_v38 }
  0xc5   : > { %v734_v31 = vmax.f32 %v515_v23, %v670_v25  ;;  %v750_v32 = vmax.f32 %v555_v24, %v686_v26 }
  0xc7   : > { %v1198_v33 = vpack.c.bf16 %v734_v31, %v733_v29  ;;  %v1238_v34 = vpack.c.bf16 %v750_v32, %v749_v30  ;;  %v594_v35 = vpop.f32.mrf.mxu2  ;;  %v634_v36 = vpop.f32.mrf.mxu3 }
  0xc8   : > { %v595_v39 = vadd.f32 %v1519_v42, %v594_v35  ;;  %v635_v40 = vadd.f32 %v1519_v42, %v634_v36  ;;  %v517_v41 = vpop.f32.mrf.mxu0  ;;  %v557_v43 = vpop.f32.mrf.mxu1 }
  0xc9   : > { %1350 = vst [vmem:[%s1532_s13 + $0x8] sm:$0xff] %v1198_v33   ;;  %v518_v50 = vadd.f32 %v1519_v42, %v517_v41  ;;  %v558_v51 = vadd.f32 %v1519_v42, %v557_v43 }
  0xca   : > { %1358 = vst [vmem:[%s1532_s13 + $0x48] sm:$0xff] %v1238_v34   ;;  %v702_v44 = vmul.f32 0.2, %v595_v39  ;;  %v718_v45 = vmul.f32 0.2, %v635_v40 }
  0xcb   : > { %v671_v58 = vmul.f32 0.2, %v518_v50  ;;  %v687_v59 = vmul.f32 0.2, %v558_v51 }
  0xcc   : > { %v766_v48 = vmax.f32 %v595_v39, %v702_v44  ;;  %v782_v49 = vmax.f32 %v635_v40, %v718_v45 }
  0xcd   : > { %v735_v2 = vmax.f32 %v518_v50, %v671_v58  ;;  %v751_v3 = vmax.f32 %v558_v51, %v687_v59 }
  0xce   : > { %v1278_v52 = vpack.c.bf16 %v766_v48, %v765_v46  ;;  %v1318_v53 = vpack.c.bf16 %v782_v49, %v781_v47 }
  0xcf   : > { %v597_v54 = vpop.f32.mrf.mxu2  ;;  %v637_v55 = vpop.f32.mrf.mxu3 }
  0xd0   : > { %1366 = vst [vmem:[%s1532_s13 + $0x88] sm:$0xff] %v1278_v52   ;;  %v519_v56 = vpop.f32.mrf.mxu0  ;;  %v559_v57 = vpop.f32.mrf.mxu1  ;;  %v598_v0 = vadd.f32 %v1519_v42, %v597_v54  ;;  %v638_v1 = vadd.f32 %v1519_v42, %v637_v55 }
  0xd1   : > { %1374 = vst [vmem:[%s1532_s13 + $0xc8] sm:$0xff] %v1318_v53   ;;  %v520_v60 = vadd.f32 %v1519_v42, %v519_v56  ;;  %v560_v61 = vadd.f32 %v1519_v42, %v559_v57 }
  0xd2   : > { %v703_v10 = vmul.f32 0.2, %v598_v0  ;;  %v719_v11 = vmul.f32 0.2, %v638_v1 }
  0xd3   : > { %v672_v62 = vmul.f32 0.2, %v520_v60  ;;  %v688_v63 = vmul.f32 0.2, %v560_v61 }
  0xd4   : > { %v767_v18 = vmax.f32 %v598_v0, %v703_v10  ;;  %v783_v19 = vmax.f32 %v638_v1, %v719_v11 }
  0xd5   : > { %v736_v4 = vmax.f32 %v520_v60, %v672_v62  ;;  %v752_v5 = vmax.f32 %v560_v61, %v688_v63 }
  0xd7   : > { %v1203_v6 = vpack.c.bf16 %v736_v4, %v735_v2  ;;  %v1243_v7 = vpack.c.bf16 %v752_v5, %v751_v3  ;;  %v599_v8 = vpop.f32.mrf.mxu2  ;;  %v639_v9 = vpop.f32.mrf.mxu3 }
  0xd8   : > { %v600_v12 = vadd.f32 %v1519_v42, %v599_v8  ;;  %v640_v13 = vadd.f32 %v1519_v42, %v639_v9  ;;  %v522_v14 = vpop.f32.mrf.mxu0  ;;  %v562_v15 = vpop.f32.mrf.mxu1 }
  0xd9   : > { %1351 = vst [vmem:[%s1532_s13 + $0x10] sm:$0xff] %v1203_v6   ;;  %v523_v22 = vadd.f32 %v1519_v42, %v522_v14  ;;  %v563_v23 = vadd.f32 %v1519_v42, %v562_v15 }
  0xda   : > { %1359 = vst [vmem:[%s1532_s13 + $0x50] sm:$0xff] %v1243_v7   ;;  %v704_v16 = vmul.f32 0.2, %v600_v12  ;;  %v720_v17 = vmul.f32 0.2, %v640_v13 }
  0xdb   : > { %v673_v30 = vmul.f32 0.2, %v523_v22  ;;  %v689_v31 = vmul.f32 0.2, %v563_v23 }
  0xdc   : > { %v768_v20 = vmax.f32 %v600_v12, %v704_v16  ;;  %v784_v21 = vmax.f32 %v640_v13, %v720_v17 }
  0xdd   : > { %v737_v38 = vmax.f32 %v523_v22, %v673_v30  ;;  %v753_v39 = vmax.f32 %v563_v23, %v689_v31 }
  0xde   : > { %v1283_v24 = vpack.c.bf16 %v768_v20, %v767_v18  ;;  %v1323_v25 = vpack.c.bf16 %v784_v21, %v783_v19 }
  0xdf   : > { %v602_v26 = vpop.f32.mrf.mxu2  ;;  %v642_v27 = vpop.f32.mrf.mxu3 }
  0xe0   : > { %1367 = vst [vmem:[%s1532_s13 + $0x90] sm:$0xff] %v1283_v24   ;;  %v524_v28 = vpop.f32.mrf.mxu0  ;;  %v564_v29 = vpop.f32.mrf.mxu1  ;;  %v603_v36 = vadd.f32 %v1519_v42, %v602_v26  ;;  %v643_v37 = vadd.f32 %v1519_v42, %v642_v27 }
  0xe1   : > { %1375 = vst [vmem:[%s1532_s13 + $0xd0] sm:$0xff] %v1323_v25   ;;  %v525_v32 = vadd.f32 %v1519_v42, %v524_v28  ;;  %v565_v33 = vadd.f32 %v1519_v42, %v564_v29 }
  0xe2   : > { %v705_v47 = vmul.f32 0.2, %v603_v36  ;;  %v721_v48 = vmul.f32 0.2, %v643_v37 }
  0xe3   : > { %v674_v34 = vmul.f32 0.2, %v525_v32  ;;  %v690_v35 = vmul.f32 0.2, %v565_v33 }
  0xe4   : > { %v769_v55 = vmax.f32 %v603_v36, %v705_v47  ;;  %v785_v56 = vmax.f32 %v643_v37, %v721_v48 }
  0xe5   : > { %v738_v40 = vmax.f32 %v525_v32, %v674_v34  ;;  %v754_v41 = vmax.f32 %v565_v33, %v690_v35 }
  0xe7   : > { %v1208_v43 = vpack.c.bf16 %v738_v40, %v737_v38  ;;  %v1248_v44 = vpack.c.bf16 %v754_v41, %v753_v39  ;;  %v604_v45 = vpop.f32.mrf.mxu2  ;;  %v644_v46 = vpop.f32.mrf.mxu3 }
  0xe8   : > { %v605_v49 = vadd.f32 %v1519_v42, %v604_v45  ;;  %v645_v50 = vadd.f32 %v1519_v42, %v644_v46  ;;  %v527_v51 = vpop.f32.mrf.mxu0  ;;  %v567_v52 = vpop.f32.mrf.mxu1 }
  0xe9   : > { %1352 = vst [vmem:[%s1532_s13 + $0x18] sm:$0xff] %v1208_v43   ;;  %v528_v59 = vadd.f32 %v1519_v42, %v527_v51  ;;  %v568_v60 = vadd.f32 %v1519_v42, %v567_v52 }
  0xea   : > { %1360 = vst [vmem:[%s1532_s13 + $0x58] sm:$0xff] %v1248_v44   ;;  %v706_v53 = vmul.f32 0.2, %v605_v49  ;;  %v722_v54 = vmul.f32 0.2, %v645_v50 }
  0xeb   : > { %v675_v3 = vmul.f32 0.2, %v528_v59  ;;  %v691_v4 = vmul.f32 0.2, %v568_v60 }
  0xec   : > { %v770_v57 = vmax.f32 %v605_v49, %v706_v53  ;;  %v786_v58 = vmax.f32 %v645_v50, %v722_v54 }
  0xed   : > { %v739_v11 = vmax.f32 %v528_v59, %v675_v3  ;;  %v755_v12 = vmax.f32 %v568_v60, %v691_v4 }
  0xee   : > { %v1288_v61 = vpack.c.bf16 %v770_v57, %v769_v55  ;;  %v1328_v62 = vpack.c.bf16 %v786_v58, %v785_v56 }
  0xef   : > { %v607_v63 = vpop.f32.mrf.mxu2  ;;  %v647_v0 = vpop.f32.mrf.mxu3 }
  0xf0   : > { %1368 = vst [vmem:[%s1532_s13 + $0x98] sm:$0xff] %v1288_v61   ;;  %v529_v1 = vpop.f32.mrf.mxu0  ;;  %v569_v2 = vpop.f32.mrf.mxu1  ;;  %v608_v9 = vadd.f32 %v1519_v42, %v607_v63  ;;  %v648_v10 = vadd.f32 %v1519_v42, %v647_v0 }
  0xf1   : > { %1376 = vst [vmem:[%s1532_s13 + $0xd8] sm:$0xff] %v1328_v62   ;;  %v530_v5 = vadd.f32 %v1519_v42, %v529_v1  ;;  %v570_v6 = vadd.f32 %v1519_v42, %v569_v2 }
  0xf2   : > { %v707_v19 = vmul.f32 0.2, %v608_v9  ;;  %v723_v20 = vmul.f32 0.2, %v648_v10 }
  0xf3   : > { %v676_v7 = vmul.f32 0.2, %v530_v5  ;;  %v692_v8 = vmul.f32 0.2, %v570_v6 }
  0xf4   : > { %v771_v27 = vmax.f32 %v608_v9, %v707_v19  ;;  %v787_v28 = vmax.f32 %v648_v10, %v723_v20 }
  0xf5   : > { %v740_v13 = vmax.f32 %v530_v5, %v676_v7  ;;  %v756_v14 = vmax.f32 %v570_v6, %v692_v8 }
  0xf7   : > { %v1213_v15 = vpack.c.bf16 %v740_v13, %v739_v11  ;;  %v1253_v16 = vpack.c.bf16 %v756_v14, %v755_v12  ;;  %v609_v17 = vpop.f32.mrf.mxu2  ;;  %v649_v18 = vpop.f32.mrf.mxu3 }
  0xf8   : > { %v610_v21 = vadd.f32 %v1519_v42, %v609_v17  ;;  %v650_v22 = vadd.f32 %v1519_v42, %v649_v18  ;;  %v532_v23 = vpop.f32.mrf.mxu0  ;;  %v572_v24 = vpop.f32.mrf.mxu1 }
  0xf9   : > { %1353 = vst [vmem:[%s1532_s13 + $0x20] sm:$0xff] %v1213_v15   ;;  %v533_v31 = vadd.f32 %v1519_v42, %v532_v23  ;;  %v573_v32 = vadd.f32 %v1519_v42, %v572_v24 }
  0xfa   : > { %1361 = vst [vmem:[%s1532_s13 + $0x60] sm:$0xff] %v1253_v16   ;;  %v708_v25 = vmul.f32 0.2, %v610_v21  ;;  %v724_v26 = vmul.f32 0.2, %v650_v22 }
  0xfb   : > { %v677_v39 = vmul.f32 0.2, %v533_v31  ;;  %v693_v40 = vmul.f32 0.2, %v573_v32 }
  0xfc   : > { %v772_v29 = vmax.f32 %v610_v21, %v708_v25  ;;  %v788_v30 = vmax.f32 %v650_v22, %v724_v26 }
  0xfd   : > { %v741_v48 = vmax.f32 %v533_v31, %v677_v39  ;;  %v757_v49 = vmax.f32 %v573_v32, %v693_v40 }
  0xfe   : > { %v1293_v33 = vpack.c.bf16 %v772_v29, %v771_v27  ;;  %v1333_v34 = vpack.c.bf16 %v788_v30, %v787_v28 }
  0xff   : > { %v612_v35 = vpop.f32.mrf.mxu2  ;;  %v652_v36 = vpop.f32.mrf.mxu3 }
 0x100   : > { %1369 = vst [vmem:[%s1532_s13 + $0xa0] sm:$0xff] %v1293_v33   ;;  %v534_v37 = vpop.f32.mrf.mxu0  ;;  %v574_v38 = vpop.f32.mrf.mxu1  ;;  %v613_v46 = vadd.f32 %v1519_v42, %v612_v35  ;;  %v653_v47 = vadd.f32 %v1519_v42, %v652_v36 }
 0x101   : > { %1377 = vst [vmem:[%s1532_s13 + $0xe0] sm:$0xff] %v1333_v34   ;;  %v535_v41 = vadd.f32 %v1519_v42, %v534_v37  ;;  %v575_v43 = vadd.f32 %v1519_v42, %v574_v38 }
 0x102   : > { %v709_v56 = vmul.f32 0.2, %v613_v46  ;;  %v725_v57 = vmul.f32 0.2, %v653_v47 }
 0x103   : > { %v678_v44 = vmul.f32 0.2, %v535_v41  ;;  %v694_v45 = vmul.f32 0.2, %v575_v43 }
 0x104   : > { %v773_v0 = vmax.f32 %v613_v46, %v709_v56  ;;  %v789_v1 = vmax.f32 %v653_v47, %v725_v57 }
 0x105   : > { %v742_v50 = vmax.f32 %v535_v41, %v678_v44  ;;  %v758_v51 = vmax.f32 %v575_v43, %v694_v45 }
 0x107   : > { %v1218_v52 = vpack.c.bf16 %v742_v50, %v741_v48  ;;  %v1258_v53 = vpack.c.bf16 %v758_v51, %v757_v49  ;;  %v614_v54 = vpop.f32.mrf.mxu2  ;;  %v654_v55 = vpop.f32.mrf.mxu3 }
 0x108   : > { %v615_v58 = vadd.f32 %v1519_v42, %v614_v54  ;;  %v655_v59 = vadd.f32 %v1519_v42, %v654_v55  ;;  %v537_v60 = vpop.f32.mrf.mxu0  ;;  %v577_v61 = vpop.f32.mrf.mxu1 }
 0x109   : > { %1354 = vst [vmem:[%s1532_s13 + $0x28] sm:$0xff] %v1218_v52   ;;  %v538_v4 = vadd.f32 %v1519_v42, %v537_v60  ;;  %v578_v5 = vadd.f32 %v1519_v42, %v577_v61 }
 0x10a   : > { %1362 = vst [vmem:[%s1532_s13 + $0x68] sm:$0xff] %v1258_v53   ;;  %v710_v62 = vmul.f32 0.2, %v615_v58  ;;  %v726_v63 = vmul.f32 0.2, %v655_v59 }
 0x10b   : > { %v679_v12 = vmul.f32 0.2, %v538_v4  ;;  %v695_v13 = vmul.f32 0.2, %v578_v5 }
 0x10c   : > { %v774_v2 = vmax.f32 %v615_v58, %v710_v62  ;;  %v790_v3 = vmax.f32 %v655_v59, %v726_v63 }
 0x10d   : > { %v743_v20 = vmax.f32 %v538_v4, %v679_v12  ;;  %v759_v21 = vmax.f32 %v578_v5, %v695_v13 }
 0x10e   : > { %v1298_v6 = vpack.c.bf16 %v774_v2, %v773_v0  ;;  %v1338_v7 = vpack.c.bf16 %v790_v3, %v789_v1 }
 0x10f   : > { %v617_v8 = vpop.f32.mrf.mxu2  ;;  %v657_v9 = vpop.f32.mrf.mxu3 }
 0x110   : > { %1370 = vst [vmem:[%s1532_s13 + $0xa8] sm:$0xff] %v1298_v6   ;;  %v539_v10 = vpop.f32.mrf.mxu0  ;;  %v579_v11 = vpop.f32.mrf.mxu1  ;;  %v618_v18 = vadd.f32 %v1519_v42, %v617_v8  ;;  %v658_v19 = vadd.f32 %v1519_v42, %v657_v9 }
 0x111   : > { %1378 = vst [vmem:[%s1532_s13 + $0xe8] sm:$0xff] %v1338_v7   ;;  %v540_v14 = vadd.f32 %v1519_v42, %v539_v10  ;;  %v580_v15 = vadd.f32 %v1519_v42, %v579_v11 }
 0x112   : > { %v711_v28 = vmul.f32 0.2, %v618_v18  ;;  %v727_v29 = vmul.f32 0.2, %v658_v19 }
 0x113   : > { %v680_v16 = vmul.f32 0.2, %v540_v14  ;;  %v696_v17 = vmul.f32 0.2, %v580_v15 }
 0x114   : > { %v775_v36 = vmax.f32 %v618_v18, %v711_v28  ;;  %v791_v37 = vmax.f32 %v658_v19, %v727_v29 }
 0x115   : > { %v744_v22 = vmax.f32 %v540_v14, %v680_v16  ;;  %v760_v23 = vmax.f32 %v580_v15, %v696_v17 }
 0x117   : > { %v1223_v24 = vpack.c.bf16 %v744_v22, %v743_v20  ;;  %v1263_v25 = vpack.c.bf16 %v760_v23, %v759_v21  ;;  %v619_v26 = vpop.f32.mrf.mxu2  ;;  %v659_v27 = vpop.f32.mrf.mxu3 }
 0x118   : > { %v620_v30 = vadd.f32 %v1519_v42, %v619_v26  ;;  %v660_v31 = vadd.f32 %v1519_v42, %v659_v27  ;;  %v542_v32 = vpop.f32.mrf.mxu0  ;;  %v582_v33 = vpop.f32.mrf.mxu1 }
 0x119   : > { %1355 = vst [vmem:[%s1532_s13 + $0x30] sm:$0xff] %v1223_v24   ;;  %v543_v40 = vadd.f32 %v1519_v42, %v542_v32  ;;  %v583_v41 = vadd.f32 %v1519_v42, %v582_v33 }
 0x11a   : > { %1363 = vst [vmem:[%s1532_s13 + $0x70] sm:$0xff] %v1263_v25   ;;  %v712_v34 = vmul.f32 0.2, %v620_v30  ;;  %v728_v35 = vmul.f32 0.2, %v660_v31 }
 0x11b   : > { %v681_v49 = vmul.f32 0.2, %v543_v40  ;;  %v697_v50 = vmul.f32 0.2, %v583_v41 }
 0x11c   : > { %v776_v38 = vmax.f32 %v620_v30, %v712_v34  ;;  %v792_v39 = vmax.f32 %v660_v31, %v728_v35 }
 0x11d   : > { %v745_v57 = vmax.f32 %v543_v40, %v681_v49  ;;  %v761_v58 = vmax.f32 %v583_v41, %v697_v50 }
 0x11e   : > { %v1303_v43 = vpack.c.bf16 %v776_v38, %v775_v36  ;;  %v1343_v44 = vpack.c.bf16 %v792_v39, %v791_v37 }
 0x11f   : > { %v622_v45 = vpop.f32.mrf.mxu2  ;;  %v662_v46 = vpop.f32.mrf.mxu3 }
 0x120   : > { %1371 = vst [vmem:[%s1532_s13 + $0xb0] sm:$0xff] %v1303_v43   ;;  %v544_v47 = vpop.f32.mrf.mxu0  ;;  %v584_v48 = vpop.f32.mrf.mxu1  ;;  %v623_v55 = vadd.f32 %v1519_v42, %v622_v45  ;;  %v663_v56 = vadd.f32 %v1519_v42, %v662_v46 }
 0x121   : > { %1379 = vst [vmem:[%s1532_s13 + $0xf0] sm:$0xff] %v1343_v44   ;;  %v545_v51 = vadd.f32 %v1519_v42, %v544_v47  ;;  %v585_v52 = vadd.f32 %v1519_v42, %v584_v48 }
 0x122   : > { %v713_v1 = vmul.f32 0.2, %v623_v55  ;;  %v729_v2 = vmul.f32 0.2, %v663_v56 }
 0x123   : > { %v682_v53 = vmul.f32 0.2, %v545_v51  ;;  %v698_v54 = vmul.f32 0.2, %v585_v52 }
 0x124   : > { %v777_v7 = vmax.f32 %v623_v55, %v713_v1  ;;  %v793_v8 = vmax.f32 %v663_v56, %v729_v2 }
 0x125   : > { %v746_v59 = vmax.f32 %v545_v51, %v682_v53  ;;  %v762_v60 = vmax.f32 %v585_v52, %v698_v54 }
 0x127   : > { %v1228_v61 = vpack.c.bf16 %v746_v59, %v745_v57  ;;  %v1268_v62 = vpack.c.bf16 %v762_v60, %v761_v58  ;;  %v624_v63 = vpop.f32.mrf.mxu2  ;;  %v664_v0 = vpop.f32.mrf.mxu3 }
 0x128   : > { %v625_v3 = vadd.f32 %v1519_v42, %v624_v63  ;;  %v665_v4 = vadd.f32 %v1519_v42, %v664_v0 }
 0x129   : > { %1356 = vst [vmem:[%s1532_s13 + $0x38] sm:$0xff] %v1228_v61  }
 0x12a   : > { %1364 = vst [vmem:[%s1532_s13 + $0x78] sm:$0xff] %v1268_v62   ;;  %v714_v5 = vmul.f32 0.2, %v625_v3  ;;  %v730_v6 = vmul.f32 0.2, %v665_v4 }
 0x12c   : > { %v778_v9 = vmax.f32 %v625_v3, %v714_v5  ;;  %v794_v10 = vmax.f32 %v665_v4, %v730_v6 }
 0x12e   : > { %v1308_v11 = vpack.c.bf16 %v778_v9, %v777_v7  ;;  %v1348_v12 = vpack.c.bf16 %v794_v10, %v793_v8 }
 0x130   : > { %1372 = vst [vmem:[%s1532_s13 + $0xb8] sm:$0xff] %v1308_v11  }
 0x131   : > { %1380 = vst [vmem:[%s1532_s13 + $0xf8] sm:$0xff] %v1348_v12  }
 0x132 PF: > { %s13_s12 = sadd.s32 1, %s1420_s12  }
 0x133   : > { %p10_p4 = scmp.ge.s32.totalorder %s13_s12, 6  }
 0x135   :  { %12 = sbr.rel (!%p10_p4) target bundleno = 1 (0x1), region = 62 }

// kernel: discriminator_forward.9
= control target key start
LH: loop header
LB: loop body
LE: loop exit
PB: predicated region body
PF: predicated region fallthrough
CT: control target
= control target key end

     0   :  { %s1921_s1 = inlined_call_operand.vmem [shape: bf16[128,128], index: 1, kind: input, shape index: {}]   ;;  %s1922_s2 = inlined_call_operand.vmem [shape: f32[1,128], index: 2, kind: input, shape index: {}]   ;;  %s1923_s0 = inlined_call_operand.vmem [shape: bf16[512,128], index: 0, kind: input, shape index: {}]   ;;  %s1924_s3 = inlined_call_operand.vmem [shape: bf16[512,128], index: 3, kind: output, shape index: {0}]   ;;  %s1925_s4 = inlined_call_operand.vmem [shape: f32[1,1,128], index: 4, kind: output, shape index: {1}]   ;;  %s1926_s5 = inlined_call_operand.vmem [shape: f32[1,1,128], index: 5, kind: output, shape index: {2}]  }
   0x1   :  { %v1053_v0 = vld [vmem:[%s1921_s1 + $0x38] sm:$0xff]  ;;  %v1052_v1 = vld [vmem:[%s1921_s1 + $0x30] sm:$0xff]  ;;  %v1051_v2 = vld [vmem:[%s1921_s1 + $0x28] sm:$0xff] }
   0x2   :  { %341 = vmatpush.bf16.msra.mxu0 %v1053_v0  ;;  %1245 = vmatpush.bf16.msra.mxu1 %v1053_v0  ;;  %v1050_v3 = vld [vmem:[%s1921_s1 + $0x20] sm:$0xff]  ;;  %v1049_v4 = vld [vmem:[%s1921_s1 + $0x18] sm:$0xff]  ;;  %v1048_v5 = vld [vmem:[%s1921_s1 + $0x10] sm:$0xff] }
   0x3   :  { %1246 = vmatpush.bf16.msra.mxu2 %v1053_v0  ;;  %1247 = vmatpush.bf16.msra.mxu3 %v1053_v0  ;;  %v1047_v6 = vld [vmem:[%s1921_s1 + $0x8] sm:$0xff]  ;;  %v1046_v7 = vld [vmem:[%s1921_s1] sm:$0xff]  ;;  %v1016_v13 = vld [vmem:[%s1923_s0 + $0x10] sm:$0xff] }
   0x4   :  { %v1014_v8 = vld [vmem:[%s1923_s0] sm:$0xff]  ;;  %v1015_v10 = vld [vmem:[%s1923_s0 + $0x8] sm:$0xff]  ;;  %v1024_v14 = vld [vmem:[%s1923_s0 + $0x50] sm:$0xff] }
   0x5   :  { %v1022_v9 = vld [vmem:[%s1923_s0 + $0x40] sm:$0xff]  ;;  %v1023_v11 = vld [vmem:[%s1923_s0 + $0x48] sm:$0xff]  ;;  %v1017_v16 = vld [vmem:[%s1923_s0 + $0x18] sm:$0xff] }
   0x6   :  { %342 = vmatpush.bf16.msra.mxu0 %v1052_v1  ;;  %1248 = vmatpush.bf16.msra.mxu1 %v1052_v1  ;;  %v1030_v12 = vld [vmem:[%s1923_s0 + $0x80] sm:$0xff]  ;;  %v1031_v15 = vld [vmem:[%s1923_s0 + $0x88] sm:$0xff]  ;;  %v1025_v17 = vld [vmem:[%s1923_s0 + $0x58] sm:$0xff] }
   0x7   :  { %1249 = vmatpush.bf16.msra.mxu2 %v1052_v1  ;;  %1250 = vmatpush.bf16.msra.mxu3 %v1052_v1  ;;  %v1032_v18 = vld [vmem:[%s1923_s0 + $0x90] sm:$0xff]  ;;  %v1038_v19 = vld [vmem:[%s1923_s0 + $0xc0] sm:$0xff]  ;;  %v1033_v22 = vld [vmem:[%s1923_s0 + $0x98] sm:$0xff] }
   0x8   :  { %v1018_v20 = vld [vmem:[%s1923_s0 + $0x20] sm:$0xff]  ;;  %v1039_v23 = vld [vmem:[%s1923_s0 + $0xc8] sm:$0xff]  ;;  %v1040_v27 = vld [vmem:[%s1923_s0 + $0xd0] sm:$0xff] }
   0x9   :  { %v1026_v21 = vld [vmem:[%s1923_s0 + $0x60] sm:$0xff]  ;;  %v1019_v24 = vld [vmem:[%s1923_s0 + $0x28] sm:$0xff]  ;;  %v1020_v28 = vld [vmem:[%s1923_s0 + $0x30] sm:$0xff] }
   0xa   :  { %343 = vmatpush.bf16.msra.mxu0 %v1051_v2  ;;  %1251 = vmatpush.bf16.msra.mxu1 %v1051_v2  ;;  %v1027_v25 = vld [vmem:[%s1923_s0 + $0x68] sm:$0xff]  ;;  %v1034_v26 = vld [vmem:[%s1923_s0 + $0xa0] sm:$0xff]  ;;  %v1028_v29 = vld [vmem:[%s1923_s0 + $0x70] sm:$0xff] }
   0xb   :  { %1252 = vmatpush.bf16.msra.mxu2 %v1051_v2  ;;  %1253 = vmatpush.bf16.msra.mxu3 %v1051_v2  ;;  %v1035_v30 = vld [vmem:[%s1923_s0 + $0xa8] sm:$0xff]  ;;  %v1041_v31 = vld [vmem:[%s1923_s0 + $0xd8] sm:$0xff]  ;;  %v1036_v34 = vld [vmem:[%s1923_s0 + $0xb0] sm:$0xff] }
   0xc   :  { %v1021_v32 = vld [vmem:[%s1923_s0 + $0x38] sm:$0xff]  ;;  %v1042_v35 = vld [vmem:[%s1923_s0 + $0xe0] sm:$0xff]  ;;  %v1043_v40 = vld [vmem:[%s1923_s0 + $0xe8] sm:$0xff] }
   0xd   :  { %v1029_v33 = vld [vmem:[%s1923_s0 + $0x78] sm:$0xff]  ;;  %v1411_v38 = vld [vmem:[%s1922_s2] ss:$0 sm:$0xff]  ;;  %v1044_v58 = vld [vmem:[%s1923_s0 + $0xf0] sm:$0xff] }
   0xe   :  { %344 = vmatpush.bf16.msra.mxu0 %v1050_v3  ;;  %1254 = vmatpush.bf16.msra.mxu1 %v1050_v3  ;;  %v1037_v39 = vld [vmem:[%s1923_s0 + $0xb8] sm:$0xff] }
   0xf   :  { %1255 = vmatpush.bf16.msra.mxu2 %v1050_v3  ;;  %1256 = vmatpush.bf16.msra.mxu3 %v1050_v3 }
  0x12   :  { %345 = vmatpush.bf16.msra.mxu0 %v1049_v4  ;;  %1257 = vmatpush.bf16.msra.mxu1 %v1049_v4 }
  0x13   :  { %1258 = vmatpush.bf16.msra.mxu2 %v1049_v4  ;;  %1259 = vmatpush.bf16.msra.mxu3 %v1049_v4 }
  0x16   :  { %346 = vmatpush.bf16.msra.mxu0 %v1048_v5  ;;  %1260 = vmatpush.bf16.msra.mxu1 %v1048_v5 }
  0x17   :  { %1261 = vmatpush.bf16.msra.mxu2 %v1048_v5  ;;  %1262 = vmatpush.bf16.msra.mxu3 %v1048_v5 }
  0x1a   :  { %347 = vmatpush.bf16.msra.mxu0 %v1047_v6  ;;  %1263 = vmatpush.bf16.msra.mxu1 %v1047_v6 }
  0x1b   :  { %1264 = vmatpush.bf16.msra.mxu2 %v1047_v6  ;;  %1265 = vmatpush.bf16.msra.mxu3 %v1047_v6 }
  0x1e   :  { %348 = vmatpush.bf16.msra.mxu0 %v1046_v7  ;;  %1266 = vmatpush.bf16.msra.mxu1 %v1046_v7 }
  0x1f   :  { %1267 = vmatpush.bf16.msra.mxu2 %v1046_v7  ;;  %1268 = vmatpush.bf16.msra.mxu3 %v1046_v7 }
  0x21   :  { %349 = vmatmul.bf16.vlgmr.msra.gmra.mxu0 %v1014_v8  ;;  %389 = vmatmul.bf16.vlgmr.msra.gmra.mxu1 %v1022_v9 }
  0x22   :  { %429 = vmatmul.bf16.vlgmr.msra.gmra.mxu2 %v1030_v12  ;;  %469 = vmatmul.bf16.vlgmr.msra.gmra.mxu3 %v1038_v19  ;;  %v1045_v12 = vld [vmem:[%s1923_s0 + $0xf8] sm:$0xff] }
  0x31   :  { %354 = vmatmul.bf16.gmra.mxu0 %v1015_v10  ;;  %394 = vmatmul.bf16.gmra.mxu1 %v1023_v11 }
  0x32   :  { %434 = vmatmul.bf16.gmra.mxu2 %v1031_v15  ;;  %474 = vmatmul.bf16.gmra.mxu3 %v1039_v23 }
  0x41   :  { %359 = vmatmul.bf16.gmra.mxu0 %v1016_v13  ;;  %399 = vmatmul.bf16.gmra.mxu1 %v1024_v14 }
  0x42   :  { %439 = vmatmul.bf16.gmra.mxu2 %v1032_v18  ;;  %479 = vmatmul.bf16.gmra.mxu3 %v1040_v27 }
  0x51   :  { %364 = vmatmul.bf16.gmra.mxu0 %v1017_v16  ;;  %404 = vmatmul.bf16.gmra.mxu1 %v1025_v17 }
  0x52   :  { %444 = vmatmul.bf16.gmra.mxu2 %v1033_v22  ;;  %484 = vmatmul.bf16.gmra.mxu3 %v1041_v31 }
  0x61   :  { %369 = vmatmul.bf16.gmra.mxu0 %v1018_v20  ;;  %409 = vmatmul.bf16.gmra.mxu1 %v1026_v21 }
  0x62   :  { %449 = vmatmul.bf16.gmra.mxu2 %v1034_v26  ;;  %489 = vmatmul.bf16.gmra.mxu3 %v1042_v35 }
  0x71   :  { %374 = vmatmul.bf16.gmra.mxu0 %v1019_v24  ;;  %414 = vmatmul.bf16.gmra.mxu1 %v1027_v25 }
  0x72   :  { %454 = vmatmul.bf16.gmra.mxu2 %v1035_v30  ;;  %494 = vmatmul.bf16.gmra.mxu3 %v1043_v40 }
  0x81   :  { %379 = vmatmul.bf16.gmra.mxu0 %v1020_v28  ;;  %419 = vmatmul.bf16.gmra.mxu1 %v1028_v29 }
  0x82   :  { %459 = vmatmul.bf16.gmra.mxu2 %v1036_v34  ;;  %499 = vmatmul.bf16.gmra.mxu3 %v1044_v58 }
  0x91   :  { %384 = vmatmul.bf16.gmra.mxu0 %v1021_v32  ;;  %424 = vmatmul.bf16.gmra.mxu1 %v1029_v33 }
  0x92   :  { %464 = vmatmul.bf16.gmra.mxu2 %v1037_v39  ;;  %504 = vmatmul.bf16.gmra.mxu3 %v1045_v12 }
  0x9e   :  { %v350_v36 = vpop.f32.mrf.mxu0  ;;  %v390_v37 = vpop.f32.mrf.mxu1 }
  0x9f   :  { %v351_v41 = vadd.f32 %v1411_v38, %v350_v36  ;;  %v1421_v43 = vadd.f32 %v1411_v38, %v390_v37 }
  0xa1   :  { %v580_v47 = vmul.f32 %v351_v41, %v351_v41 }
  0xa5   :  { %v430_v1 = vpop.f32.mrf.mxu2  ;;  %v470_v36 = vpop.f32.mrf.mxu3 }
  0xa6   :  { %v352_v42 = vpop.f32.mrf.mxu0  ;;  %v392_v44 = vpop.f32.mrf.mxu1  ;;  %v1459_v9 = vadd.f32 %v1411_v38, %v430_v1 }
  0xa7   :  { %v353_v45 = vadd.f32 %v1411_v38, %v352_v42  ;;  %v1425_v46 = vadd.f32 %v1411_v38, %v392_v44  ;;  %v1531_v44 = vadd.f32 %v1411_v38, %v470_v36 }
  0xa9   :  { %v510_v48 = vadd.f32 %v353_v45, %v351_v41  ;;  %v581_v49 = vmul.f32 %v353_v45, %v353_v45  ;;  %v1057_v50 = vpack.c.bf16 %v353_v45, %v351_v41  ;;  %v1097_v51 = vpack.c.bf16 %v1425_v46, %v1421_v43 }
  0xab   :  { %v644_v52 = vadd.f32 %v581_v49, %v580_v47  ;;  %1058 = vst [vmem:[%s1924_s3] sm:$0xff] %v1057_v50  }
  0xac   :  { %1221 = vst [vmem:[%s1924_s3 + $0x40] sm:$0xff] %v1097_v51  }
  0xad   :  { %v432_v10 = vpop.f32.mrf.mxu2  ;;  %v472_v47 = vpop.f32.mrf.mxu3 }
  0xae   :  { %v355_v53 = vpop.f32.mrf.mxu0  ;;  %v395_v54 = vpop.f32.mrf.mxu1  ;;  %v1462_v11 = vadd.f32 %v1411_v38, %v432_v10  ;;  %v1537_v49 = vadd.f32 %v1411_v38, %v472_v47 }
  0xaf   :  { %v356_v55 = vadd.f32 %v1411_v38, %v355_v53  ;;  %v1440_v61 = vadd.f32 %v1411_v38, %v395_v54 }
  0xb0   :  { %v1137_v13 = vpack.c.bf16 %v1462_v11, %v1459_v9  ;;  %v1177_v51 = vpack.c.bf16 %v1537_v49, %v1531_v44 }
  0xb1   :  { %v511_v56 = vadd.f32 %v510_v48, %v356_v55  ;;  %v582_v57 = vmul.f32 %v356_v55, %v356_v55 }
  0xb2   :  { %1229 = vst [vmem:[%s1924_s3 + $0x80] sm:$0xff] %v1137_v13  }
  0xb3   :  { %v645_v59 = vadd.f32 %v644_v52, %v582_v57  ;;  %1237 = vst [vmem:[%s1924_s3 + $0xc0] sm:$0xff] %v1177_v51  }
  0xb5   :  { %v435_v20 = vpop.f32.mrf.mxu2 }
  0xb6   :  { %v357_v60 = vpop.f32.mrf.mxu0  ;;  %v397_v62 = vpop.f32.mrf.mxu1  ;;  %v1495_v25 = vadd.f32 %v1411_v38, %v435_v20 }
  0xb7   :  { %v358_v63 = vadd.f32 %v1411_v38, %v357_v60  ;;  %v1444_v0 = vadd.f32 %v1411_v38, %v397_v62 }
  0xb9   :  { %v1446_v2 = vadd.f32 %v511_v56, %v358_v63  ;;  %v583_v3 = vmul.f32 %v358_v63, %v358_v63  ;;  %v1062_v4 = vpack.c.bf16 %v358_v63, %v356_v55  ;;  %v1102_v5 = vpack.c.bf16 %v1444_v0, %v1440_v61 }
  0xbb   :  { %v1450_v6 = vadd.f32 %v645_v59, %v583_v3  ;;  %1214 = vst [vmem:[%s1924_s3 + $0x8] sm:$0xff] %v1062_v4   ;;  %v475_v59 = vpop.f32.mrf.mxu3 }
  0xbc   :  { %1222 = vst [vmem:[%s1924_s3 + $0x48] sm:$0xff] %v1102_v5   ;;  %v1575_v4 = vadd.f32 %v1411_v38, %v475_v59 }
  0xbd   :  { %v437_v26 = vpop.f32.mrf.mxu2 }
  0xbe   :  { %v360_v7 = vpop.f32.mrf.mxu0  ;;  %v400_v8 = vpop.f32.mrf.mxu1  ;;  %v1498_v27 = vadd.f32 %v1411_v38, %v437_v26 }
  0xbf   :  { %v1473_v15 = vadd.f32 %v1411_v38, %v400_v8  ;;  %v1476_v17 = vadd.f32 %v1411_v38, %v360_v7 }
  0xc0   :  { %v1142_v28 = vpack.c.bf16 %v1498_v27, %v1495_v25 }
  0xc2   :  { %1230 = vst [vmem:[%s1924_s3 + $0x88] sm:$0xff] %v1142_v28  }
  0xc3   :  { %v477_v7 = vpop.f32.mrf.mxu3 }
  0xc4   :  { %v1581_v10 = vadd.f32 %v1411_v38, %v477_v7 }
  0xc5   :  { %v440_v35 = vpop.f32.mrf.mxu2 }
  0xc6   :  { %v362_v14 = vpop.f32.mrf.mxu0  ;;  %v402_v16 = vpop.f32.mrf.mxu1  ;;  %v1528_v42 = vadd.f32 %v1411_v38, %v440_v35  ;;  %v1182_v13 = vpack.c.bf16 %v1581_v10, %v1575_v4 }
  0xc7   :  { %v1479_v18 = vadd.f32 %v1411_v38, %v362_v14  ;;  %v1482_v19 = vadd.f32 %v1411_v38, %v402_v16 }
  0xc8   :  { %1238 = vst [vmem:[%s1924_s3 + $0xc8] sm:$0xff] %v1182_v13  }
  0xc9   :  { %v1067_v21 = vpack.c.bf16 %v1479_v18, %v1476_v17  ;;  %v1107_v22 = vpack.c.bf16 %v1482_v19, %v1473_v15 }
  0xcb   :  { %1215 = vst [vmem:[%s1924_s3 + $0x10] sm:$0xff] %v1067_v21   ;;  %v480_v26 = vpop.f32.mrf.mxu3 }
  0xcc   :  { %1223 = vst [vmem:[%s1924_s3 + $0x50] sm:$0xff] %v1107_v22  }
  0xcd   :  { %v442_v45 = vpop.f32.mrf.mxu2 }
  0xce   :  { %v365_v23 = vpop.f32.mrf.mxu0  ;;  %v405_v24 = vpop.f32.mrf.mxu1  ;;  %v1534_v48 = vadd.f32 %v1411_v38, %v442_v45 }
  0xcf   :  { %v1506_v30 = vadd.f32 %v1411_v38, %v405_v24  ;;  %v1509_v32 = vadd.f32 %v1411_v38, %v365_v23 }
  0xd0   :  { %v1147_v50 = vpack.c.bf16 %v1534_v48, %v1528_v42 }
  0xd1   :  { %v586_v59 = vmul.f32 %v1509_v32, %v1509_v32 }
  0xd2   :  { %1231 = vst [vmem:[%s1924_s3 + $0x90] sm:$0xff] %v1147_v50   ;;  %v585_v50 = vmul.f32 %v1479_v18, %v1479_v18 }
  0xd5   :  { %v445_v58 = vpop.f32.mrf.mxu2 }
  0xd6   :  { %v367_v29 = vpop.f32.mrf.mxu0  ;;  %v407_v31 = vpop.f32.mrf.mxu1  ;;  %v1572_v3 = vadd.f32 %v1411_v38, %v445_v58 }
  0xd7   :  { %v1512_v33 = vadd.f32 %v1411_v38, %v367_v29  ;;  %v1515_v34 = vadd.f32 %v1411_v38, %v407_v31 }
  0xd9   :  { %v1072_v37 = vpack.c.bf16 %v1512_v33, %v1509_v32  ;;  %v1112_v39 = vpack.c.bf16 %v1515_v34, %v1506_v30 }
  0xdb   :  { %1216 = vst [vmem:[%s1924_s3 + $0x18] sm:$0xff] %v1072_v37   ;;  %v1613_v37 = vadd.f32 %v1411_v38, %v480_v26 }
  0xdc   :  { %1224 = vst [vmem:[%s1924_s3 + $0x58] sm:$0xff] %v1112_v39  }
  0xdd   :  { %v447_v5 = vpop.f32.mrf.mxu2 }
  0xde   :  { %v370_v40 = vpop.f32.mrf.mxu0  ;;  %v410_v41 = vpop.f32.mrf.mxu1  ;;  %v1578_v8 = vadd.f32 %v1411_v38, %v447_v5 }
  0xdf   :  { %v1550_v53 = vadd.f32 %v1411_v38, %v410_v41  ;;  %v1553_v55 = vadd.f32 %v1411_v38, %v370_v40  ;;  %v482_v40 = vpop.f32.mrf.mxu3  ;;  %v584_v41 = vmul.f32 %v1476_v17, %v1476_v17 }
  0xe0   :  { %v1152_v12 = vpack.c.bf16 %v1578_v8, %v1572_v3  ;;  %v1621_v47 = vadd.f32 %v1411_v38, %v482_v40 }
  0xe1   :  { %v647_v58 = vadd.f32 %v1450_v6, %v584_v41 }
  0xe2   :  { %1232 = vst [vmem:[%s1924_s3 + $0x98] sm:$0xff] %v1152_v12  }
  0xe5   :  { %v450_v24 = vpop.f32.mrf.mxu2 }
  0xe6   :  { %v372_v52 = vpop.f32.mrf.mxu0  ;;  %v412_v54 = vpop.f32.mrf.mxu1  ;;  %v1610_v36 = vadd.f32 %v1411_v38, %v450_v24 }
  0xe7   :  { %v1556_v56 = vadd.f32 %v1411_v38, %v372_v52  ;;  %v1559_v57 = vadd.f32 %v1411_v38, %v412_v54  ;;  %v513_v52 = vadd.f32 %v1446_v2, %v1476_v17  ;;  %v1187_v54 = vpack.c.bf16 %v1621_v47, %v1613_v37  ;;  %v485_v13 = vpop.f32.mrf.mxu3 }
  0xe8   :  { %v587_v2 = vmul.f32 %v1512_v33, %v1512_v33 }
  0xe9   :  { %v1077_v60 = vpack.c.bf16 %v1556_v56, %v1553_v55  ;;  %v1117_v62 = vpack.c.bf16 %v1559_v57, %v1550_v53  ;;  %1239 = vst [vmem:[%s1924_s3 + $0xd0] sm:$0xff] %v1187_v54  }
  0xeb   :  { %1217 = vst [vmem:[%s1924_s3 + $0x20] sm:$0xff] %v1077_v60   ;;  %v514_v60 = vadd.f32 %v513_v52, %v1479_v18 }
  0xec   :  { %1225 = vst [vmem:[%s1924_s3 + $0x60] sm:$0xff] %v1117_v62   ;;  %v648_v62 = vadd.f32 %v647_v58, %v585_v50 }
  0xed   :  { %v452_v39 = vpop.f32.mrf.mxu2 }
  0xee   :  { %v375_v63 = vpop.f32.mrf.mxu0  ;;  %v415_v1 = vpop.f32.mrf.mxu1  ;;  %v1618_v45 = vadd.f32 %v1411_v38, %v452_v39 }
  0xef   :  { %v1594_v16 = vadd.f32 %v1411_v38, %v415_v1  ;;  %v376_v21 = vadd.f32 %v1411_v38, %v375_v63  ;;  %v515_v1 = vadd.f32 %v514_v60, %v1509_v32  ;;  %v589_v32 = vmul.f32 %v1556_v56, %v1556_v56 }
  0xf0   :  { %v1157_v51 = vpack.c.bf16 %v1618_v45, %v1610_v36 }
  0xf1   :  { %v516_v24 = vadd.f32 %v515_v1, %v1512_v33  ;;  %v590_v39 = vmul.f32 %v376_v21, %v376_v21 }
  0xf2   :  { %1233 = vst [vmem:[%s1924_s3 + $0xa0] sm:$0xff] %v1157_v51  }
  0xf5   :  { %v455_v12 = vpop.f32.mrf.mxu2 }
  0xf6   :  { %v377_v14 = vpop.f32.mrf.mxu0  ;;  %v417_v20 = vpop.f32.mrf.mxu1  ;;  %v1668_v54 = vadd.f32 %v1411_v38, %v455_v12 }
  0xf7   :  { %v378_v22 = vadd.f32 %v1411_v38, %v377_v14  ;;  %v1599_v23 = vadd.f32 %v1411_v38, %v417_v20  ;;  %v649_v14 = vadd.f32 %v648_v62, %v586_v59  ;;  %v588_v20 = vmul.f32 %v1553_v55, %v1553_v55  ;;  %v487_v59 = vpop.f32.mrf.mxu3 }
  0xf8   :  { %v1677_v62 = vadd.f32 %v1411_v38, %v487_v59 }
  0xf9   :  { %v1082_v28 = vpack.c.bf16 %v378_v22, %v376_v21  ;;  %v1122_v29 = vpack.c.bf16 %v1599_v23, %v1594_v16  ;;  %v591_v52 = vmul.f32 %v378_v22, %v378_v22 }
  0xfb   :  { %1218 = vst [vmem:[%s1924_s3 + $0x28] sm:$0xff] %v1082_v28   ;;  %v650_v28 = vadd.f32 %v649_v14, %v587_v2 }
  0xfc   :  { %1226 = vst [vmem:[%s1924_s3 + $0x68] sm:$0xff] %v1122_v29  }
  0xfd   :  { %v457_v58 = vpop.f32.mrf.mxu2 }
  0xfe   :  { %v380_v31 = vpop.f32.mrf.mxu0  ;;  %v420_v35 = vpop.f32.mrf.mxu1  ;;  %v1674_v60 = vadd.f32 %v1411_v38, %v457_v58 }
  0xff   :  { %v1644_v6 = vadd.f32 %v1411_v38, %v420_v35  ;;  %v381_v5 = vadd.f32 %v1411_v38, %v380_v31  ;;  %v517_v31 = vadd.f32 %v516_v24, %v1553_v55  ;;  %v651_v35 = vadd.f32 %v650_v28, %v588_v20 }
 0x100   :  { %v1671_v55 = vadd.f32 %v1411_v38, %v485_v13 }
 0x101   :  { %v518_v33 = vadd.f32 %v517_v31, %v1556_v56  ;;  %v652_v40 = vadd.f32 %v651_v35, %v589_v32 }
 0x102   :  { %v1192_v14 = vpack.c.bf16 %v1677_v62, %v1671_v55 }
 0x103   :  { %v519_v51 = vadd.f32 %v518_v33, %v376_v21  ;;  %v653_v56 = vadd.f32 %v652_v40, %v590_v39  ;;  %v490_v39 = vpop.f32.mrf.mxu3 }
 0x104   :  { %1240 = vst [vmem:[%s1924_s3 + $0xd8] sm:$0xff] %v1192_v14  }
 0x105   :  { %v520_v2 = vadd.f32 %v519_v51, %v378_v22  ;;  %v654_v1 = vadd.f32 %v653_v56, %v591_v52  ;;  %v460_v33 = vpop.f32.mrf.mxu2  ;;  %v597_v56 = vmul.f32 %v1425_v46, %v1425_v46 }
 0x106   :  { %v382_v17 = vpop.f32.mrf.mxu0  ;;  %v422_v63 = vpop.f32.mrf.mxu1 }
 0x107   :  { %v383_v7 = vadd.f32 %v1411_v38, %v382_v17  ;;  %v1650_v18 = vadd.f32 %v1411_v38, %v422_v63  ;;  %v592_v17 = vmul.f32 %v381_v5, %v381_v5  ;;  %v1162_v63 = vpack.c.bf16 %v1674_v60, %v1668_v54 }
 0x108   :  { %v521_v12 = vadd.f32 %v520_v2, %v381_v5 }
 0x109   :  { %v1087_v26 = vpack.c.bf16 %v383_v7, %v381_v5  ;;  %v1127_v29 = vpack.c.bf16 %v1650_v18, %v1644_v6  ;;  %v593_v13 = vmul.f32 %v383_v7, %v383_v7  ;;  %1234 = vst [vmem:[%s1924_s3 + $0xa8] sm:$0xff] %v1162_v63   ;;  %v655_v20 = vadd.f32 %v654_v1, %v592_v17 }
 0x10a   :  { %v522_v24 = vadd.f32 %v521_v12, %v383_v7  ;;  %v1715_v1 = vadd.f32 %v1411_v38, %v460_v33  ;;  %v1718_v12 = vadd.f32 %v1411_v38, %v490_v39 }
 0x10b   :  { %1219 = vst [vmem:[%s1924_s3 + $0x30] sm:$0xff] %v1087_v26   ;;  %v656_v32 = vadd.f32 %v655_v20, %v593_v13  ;;  %v492_v14 = vpop.f32.mrf.mxu3 }
 0x10c   :  { %1227 = vst [vmem:[%s1924_s3 + $0x70] sm:$0xff] %v1127_v29  }
 0x10d   :  { %v462_v13 = vpop.f32.mrf.mxu2 }
 0x10e   :  { %v385_v41 = vpop.f32.mrf.mxu0  ;;  %v425_v50 = vpop.f32.mrf.mxu1  ;;  %v1721_v20 = vadd.f32 %v1411_v38, %v462_v13 }
 0x10f   :  { %v386_v21 = vadd.f32 %v1411_v38, %v385_v41  ;;  %v1691_v28 = vadd.f32 %v1411_v38, %v425_v50  ;;  %v596_v50 = vmul.f32 %v1421_v43, %v1421_v43 }
 0x111   :  { %v594_v26 = vmul.f32 %v386_v21, %v386_v21  ;;  %v523_v29 = vadd.f32 %v522_v24, %v386_v21  ;;  %v599_v24 = vmul.f32 %v1444_v0, %v1444_v0 }
 0x113   :  { %v657_v7 = vadd.f32 %v656_v32, %v594_v26  ;;  %v600_v32 = vmul.f32 %v1473_v15, %v1473_v15 }
 0x116   :  { %v387_v22 = vpop.f32.mrf.mxu0  ;;  %v427_v5 = vpop.f32.mrf.mxu1 }
 0x117   :  { %v388_v31 = vadd.f32 %v1411_v38, %v387_v22  ;;  %v1695_v35 = vadd.f32 %v1411_v38, %v427_v5  ;;  %v1167_v22 = vpack.c.bf16 %v1721_v20, %v1715_v1 }
 0x119   :  { %v524_v40 = vadd.f32 %v523_v29, %v388_v31  ;;  %v595_v41 = vmul.f32 %v388_v31, %v388_v31  ;;  %v1092_v51 = vpack.c.bf16 %v388_v31, %v386_v21  ;;  %v1132_v52 = vpack.c.bf16 %v1695_v35, %v1691_v28  ;;  %1235 = vst [vmem:[%s1924_s3 + $0xb0] sm:$0xff] %v1167_v22  }
 0x11a   :  { %v598_v21 = vmul.f32 %v1440_v61, %v1440_v61 }
 0x11b   :  { %v525_v58 = vadd.f32 %v524_v40, %v1421_v43  ;;  %v658_v59 = vadd.f32 %v657_v7, %v595_v41  ;;  %1220 = vst [vmem:[%s1924_s3 + $0x38] sm:$0xff] %v1092_v51   ;;  %v602_v7 = vmul.f32 %v1506_v30, %v1506_v30  ;;  %v465_v41 = vpop.f32.mrf.mxu2  ;;  %v495_v51 = vpop.f32.mrf.mxu3 }
 0x11c   :  { %1228 = vst [vmem:[%s1924_s3 + $0x78] sm:$0xff] %v1132_v52   ;;  %v603_v52 = vmul.f32 %v1515_v34, %v1515_v34  ;;  %v1764_v13 = vadd.f32 %v1411_v38, %v495_v51  ;;  %v611_v51 = vmul.f32 %v1695_v35, %v1695_v35 }
 0x11d   :  { %v526_v2 = vadd.f32 %v525_v58, %v1425_v46  ;;  %v659_v17 = vadd.f32 %v658_v59, %v596_v50  ;;  %v1724_v46 = vadd.f32 %v1411_v38, %v492_v14 }
 0x11f   :  { %v527_v43 = vadd.f32 %v526_v2, %v1440_v61  ;;  %v660_v63 = vadd.f32 %v659_v17, %v597_v56  ;;  %v1197_v5 = vpack.c.bf16 %v1724_v46, %v1718_v12  ;;  %v605_v2 = vmul.f32 %v1559_v57, %v1559_v57 }
 0x121   :  { %v528_v61 = vadd.f32 %v527_v43, %v1444_v0  ;;  %v661_v26 = vadd.f32 %v660_v63, %v598_v21  ;;  %v601_v0 = vmul.f32 %v1482_v19, %v1482_v19  ;;  %1241 = vst [vmem:[%s1924_s3 + $0xe0] sm:$0xff] %v1197_v5   ;;  %v606_v21 = vmul.f32 %v1594_v16, %v1594_v16 }
 0x123   :  { %v529_v29 = vadd.f32 %v528_v61, %v1473_v15  ;;  %v662_v31 = vadd.f32 %v661_v26, %v599_v24  ;;  %v497_v14 = vpop.f32.mrf.mxu3  ;;  %v607_v61 = vmul.f32 %v1599_v23, %v1599_v23 }
 0x125   :  { %v530_v33 = vadd.f32 %v529_v29, %v1482_v19  ;;  %v663_v39 = vadd.f32 %v662_v31, %v600_v32  ;;  %v604_v19 = vmul.f32 %v1550_v53, %v1550_v53  ;;  %v608_v29 = vmul.f32 %v1644_v6, %v1644_v6 }
 0x127   :  { %v664_v40 = vadd.f32 %v663_v39, %v601_v0  ;;  %v531_v15 = vadd.f32 %v530_v33, %v1506_v30  ;;  %v609_v33 = vmul.f32 %v1650_v18, %v1650_v18 }
 0x129   :  { %v532_v50 = vadd.f32 %v531_v15, %v1515_v34  ;;  %v665_v58 = vadd.f32 %v664_v40, %v602_v7  ;;  %v1761_v34 = vadd.f32 %v1411_v38, %v465_v41 }
 0x12b   :  { %v533_v59 = vadd.f32 %v532_v50, %v1550_v53  ;;  %v666_v56 = vadd.f32 %v665_v58, %v603_v52  ;;  %v467_v53 = vpop.f32.mrf.mxu2  ;;  %v500_v40 = vpop.f32.mrf.mxu3  ;;  %v613_v58 = vmul.f32 %v1462_v11, %v1462_v11 }
 0x12c   :  { %v1767_v24 = vadd.f32 %v1411_v38, %v467_v53 }
 0x12d   :  { %v534_v17 = vadd.f32 %v533_v59, %v1559_v57  ;;  %v667_v30 = vadd.f32 %v666_v56, %v604_v19  ;;  %v1770_v57 = vadd.f32 %v1411_v38, %v497_v14  ;;  %v617_v14 = vmul.f32 %v1534_v48, %v1534_v48 }
 0x12e   :  { %v1172_v22 = vpack.c.bf16 %v1767_v24, %v1761_v34 }
 0x12f   :  { %v535_v43 = vadd.f32 %v534_v17, %v1594_v16  ;;  %v668_v63 = vadd.f32 %v667_v30, %v605_v2  ;;  %v1202_v5 = vpack.c.bf16 %v1770_v57, %v1764_v13 }
 0x130   :  { %1236 = vst [vmem:[%s1924_s3 + $0xb8] sm:$0xff] %v1172_v22  }
 0x131   :  { %v536_v16 = vadd.f32 %v535_v43, %v1599_v23  ;;  %v669_v26 = vadd.f32 %v668_v63, %v606_v21  ;;  %1242 = vst [vmem:[%s1924_s3 + $0xe8] sm:$0xff] %v1202_v5  }
 0x133   :  { %v537_v32 = vadd.f32 %v536_v16, %v1644_v6  ;;  %v670_v31 = vadd.f32 %v669_v26, %v607_v61  ;;  %v610_v6 = vmul.f32 %v1691_v28, %v1691_v28  ;;  %v502_v17 = vpop.f32.mrf.mxu3  ;;  %v618_v16 = vmul.f32 %v1572_v3, %v1572_v3 }
 0x134   :  { %v1810_v30 = vadd.f32 %v1411_v38, %v502_v17 }
 0x135   :  { %v671_v0 = vadd.f32 %v670_v31, %v608_v29  ;;  %v538_v23 = vadd.f32 %v537_v32, %v1650_v18  ;;  %v612_v18 = vmul.f32 %v1459_v9, %v1459_v9  ;;  %v620_v31 = vmul.f32 %v1610_v36, %v1610_v36 }
 0x137   :  { %v672_v39 = vadd.f32 %v671_v0, %v609_v33  ;;  %v539_v7 = vadd.f32 %v538_v23, %v1691_v28  ;;  %v614_v28 = vmul.f32 %v1495_v25, %v1495_v25 }
 0x139   :  { %v673_v15 = vadd.f32 %v672_v39, %v610_v6  ;;  %v540_v41 = vadd.f32 %v539_v7, %v1695_v35  ;;  %v1807_v35 = vadd.f32 %v1411_v38, %v500_v40  ;;  %v622_v39 = vmul.f32 %v1668_v54, %v1668_v54 }
 0x13b   :  { %v541_v52 = vadd.f32 %v540_v41, %v1459_v9  ;;  %v674_v50 = vadd.f32 %v673_v15, %v611_v51  ;;  %v615_v9 = vmul.f32 %v1498_v27, %v1498_v27  ;;  %v1207_v43 = vpack.c.bf16 %v1810_v30, %v1807_v35  ;;  %v505_v5 = vpop.f32.mrf.mxu3 }
 0x13c   :  { %v623_v41 = vmul.f32 %v1674_v60, %v1674_v60 }
 0x13d   :  { %v542_v19 = vadd.f32 %v541_v52, %v1462_v11  ;;  %v675_v59 = vadd.f32 %v674_v50, %v612_v18  ;;  %1243 = vst [vmem:[%s1924_s3 + $0xf0] sm:$0xff] %v1207_v43   ;;  %v624_v52 = vmul.f32 %v1715_v1, %v1715_v1 }
 0x13f   :  { %v543_v56 = vadd.f32 %v542_v19, %v1495_v25  ;;  %v676_v2 = vadd.f32 %v675_v59, %v613_v58  ;;  %v616_v25 = vmul.f32 %v1528_v42, %v1528_v42  ;;  %v626_v59 = vmul.f32 %v1761_v34, %v1761_v34 }
 0x141   :  { %v544_v21 = vadd.f32 %v543_v56, %v1498_v27  ;;  %v677_v11 = vadd.f32 %v676_v2, %v614_v28  ;;  %v628_v2 = vmul.f32 %v1531_v44, %v1531_v44 }
 0x143   :  { %v545_v63 = vadd.f32 %v544_v21, %v1528_v42  ;;  %v678_v53 = vadd.f32 %v677_v11, %v615_v9  ;;  %v619_v42 = vmul.f32 %v1578_v8, %v1578_v8  ;;  %v507_v40 = vpop.f32.mrf.mxu3 }
 0x144   :  { %v1845_v15 = vadd.f32 %v1411_v38, %v507_v40  ;;  %v641_v40 = vmul.f32 %v1810_v30, %v1810_v30 }
 0x145   :  { %v679_v61 = vadd.f32 %v678_v53, %v616_v25  ;;  %v546_v27 = vadd.f32 %v545_v63, %v1534_v48  ;;  %v621_v48 = vmul.f32 %v1618_v45, %v1618_v45 }
 0x147   :  { %v547_v26 = vadd.f32 %v546_v27, %v1572_v3  ;;  %v680_v22 = vadd.f32 %v679_v61, %v617_v14 }
 0x149   :  { %v548_v32 = vadd.f32 %v547_v26, %v1578_v8  ;;  %v681_v29 = vadd.f32 %v680_v22, %v618_v16  ;;  %v1842_v8 = vadd.f32 %v1411_v38, %v505_v5 }
 0x14b   :  { %v549_v0 = vadd.f32 %v548_v32, %v1610_v36  ;;  %v682_v23 = vadd.f32 %v681_v29, %v619_v42  ;;  %v1212_v51 = vpack.c.bf16 %v1845_v15, %v1842_v8 }
 0x14d   :  { %v550_v33 = vadd.f32 %v549_v0, %v1618_v45  ;;  %v683_v3 = vadd.f32 %v682_v23, %v620_v31  ;;  %1244 = vst [vmem:[%s1924_s3 + $0xf8] sm:$0xff] %v1212_v51   ;;  %v643_v51 = vmul.f32 %v1845_v15, %v1845_v15 }
 0x14f   :  { %v551_v7 = vadd.f32 %v550_v33, %v1668_v54  ;;  %v684_v6 = vadd.f32 %v683_v3, %v621_v48  ;;  %v639_v33 = vmul.f32 %v1770_v57, %v1770_v57 }
 0x151   :  { %v552_v36 = vadd.f32 %v551_v7, %v1674_v60  ;;  %v685_v45 = vadd.f32 %v684_v6, %v622_v39  ;;  %v625_v60 = vmul.f32 %v1721_v20, %v1721_v20  ;;  %v640_v7 = vmul.f32 %v1807_v35, %v1807_v35 }
 0x153   :  { %v686_v18 = vadd.f32 %v685_v45, %v623_v41  ;;  %v553_v54 = vadd.f32 %v552_v36, %v1715_v1  ;;  %v627_v1 = vmul.f32 %v1767_v24, %v1767_v24  ;;  %v642_v41 = vmul.f32 %v1842_v8, %v1842_v8 }
 0x155   :  { %v687_v38 = vadd.f32 %v686_v18, %v624_v52  ;;  %v554_v50 = vadd.f32 %v553_v54, %v1721_v20  ;;  %v629_v20 = vmul.f32 %v1537_v49, %v1537_v49 }
 0x157   :  { %v688_v58 = vadd.f32 %v687_v38, %v625_v60  ;;  %v555_v19 = vadd.f32 %v554_v50, %v1761_v34  ;;  %v630_v34 = vmul.f32 %v1575_v4, %v1575_v4 }
 0x159   :  { %v689_v28 = vadd.f32 %v688_v58, %v626_v59  ;;  %v556_v56 = vadd.f32 %v555_v19, %v1767_v24  ;;  %v631_v24 = vmul.f32 %v1581_v10, %v1581_v10 }
 0x15b   :  { %v557_v17 = vadd.f32 %v556_v56, %v1531_v44  ;;  %v690_v9 = vadd.f32 %v689_v28, %v627_v1  ;;  %v632_v44 = vmul.f32 %v1613_v37, %v1613_v37 }
 0x15d   :  { %v558_v21 = vadd.f32 %v557_v17, %v1537_v49  ;;  %v691_v11 = vadd.f32 %v690_v9, %v628_v2  ;;  %v633_v49 = vmul.f32 %v1621_v47, %v1621_v47 }
 0x15f   :  { %v559_v43 = vadd.f32 %v558_v21, %v1575_v4  ;;  %v692_v25 = vadd.f32 %v691_v11, %v629_v20  ;;  %v634_v4 = vmul.f32 %v1671_v55, %v1671_v55 }
 0x161   :  { %v560_v63 = vadd.f32 %v559_v43, %v1581_v10  ;;  %v693_v53 = vadd.f32 %v692_v25, %v630_v34  ;;  %v635_v10 = vmul.f32 %v1677_v62, %v1677_v62 }
 0x163   :  { %v561_v14 = vadd.f32 %v560_v63, %v1613_v37  ;;  %v694_v61 = vadd.f32 %v693_v53, %v631_v24  ;;  %v636_v37 = vmul.f32 %v1718_v12, %v1718_v12 }
 0x165   :  { %v695_v27 = vadd.f32 %v694_v61, %v632_v44  ;;  %v562_v16 = vadd.f32 %v561_v14, %v1621_v47  ;;  %v637_v47 = vmul.f32 %v1724_v46, %v1724_v46 }
 0x167   :  { %v563_v26 = vadd.f32 %v562_v16, %v1671_v55  ;;  %v696_v22 = vadd.f32 %v695_v27, %v633_v49  ;;  %v638_v55 = vmul.f32 %v1764_v13, %v1764_v13 }
 0x169   :  { %v564_v5 = vadd.f32 %v563_v26, %v1677_v62  ;;  %v697_v42 = vadd.f32 %v696_v22, %v634_v4 }
 0x16b   :  { %v565_v32 = vadd.f32 %v564_v5, %v1718_v12  ;;  %v698_v29 = vadd.f32 %v697_v42, %v635_v10 }
 0x16d   :  { %v566_v31 = vadd.f32 %v565_v32, %v1724_v46  ;;  %v699_v0 = vadd.f32 %v698_v29, %v636_v37 }
 0x16f   :  { %v567_v23 = vadd.f32 %v566_v31, %v1764_v13  ;;  %v700_v48 = vadd.f32 %v699_v0, %v637_v47 }
 0x171   :  { %v568_v62 = vadd.f32 %v567_v23, %v1770_v57  ;;  %v701_v3 = vadd.f32 %v700_v48, %v638_v55 }
 0x173   :  { %v702_v12 = vadd.f32 %v701_v3, %v639_v33  ;;  %v569_v39 = vadd.f32 %v568_v62, %v1807_v35 }
 0x175   :  { %v703_v46 = vadd.f32 %v702_v12, %v640_v7  ;;  %v570_v6 = vadd.f32 %v569_v39, %v1810_v30 }
 0x177   :  { %v704_v13 = vadd.f32 %v703_v46, %v641_v40  ;;  %v571_v36 = vadd.f32 %v570_v6, %v1842_v8 }
 0x179   :  { %v705_v57 = vadd.f32 %v704_v13, %v642_v41  ;;  %v572_v45 = vadd.f32 %v571_v36, %v1845_v15 }
 0x17b   :  { %v573_v18 = vrot.slane %v572_v45, 4  ;;  %v706_v35 = vadd.f32 %v705_v57, %v643_v51 }
 0x17d   :  { %v574_v54 = vadd.f32 %v573_v18, %v572_v45  ;;  %v707_v52 = vrot.slane %v706_v35, 4 }
 0x17f   :  { %v575_v38 = vrot.slane %v574_v54, 2  ;;  %v708_v50 = vadd.f32 %v707_v52, %v706_v35 }
 0x181   :  { %v576_v60 = vadd.f32 %v575_v38, %v574_v54  ;;  %v709_v30 = vrot.slane %v708_v50, 2 }
 0x183   :  { %v577_v58 = vrot.slane %v576_v60, 1  ;;  %v710_v19 = vadd.f32 %v709_v30, %v708_v50 }
 0x185   :  { %v578_v59 = vadd.f32 %v577_v58, %v576_v60  ;;  %v711_v28 = vrot.slane %v710_v19, 1 }
 0x187   :  { %579 = vst [vmem:[%s1925_s4] sm:$0x1] %v578_v59  ;;  %v712_v8 = vadd.f32 %v711_v28, %v710_v19 }
 0x189   :  { %713 = vst [vmem:[%s1926_s5] sm:$0x1] %v712_v8 }

// kernel: discriminator_forward.10
= control target key start
LH: loop header
LB: loop body
LE: loop exit
PB: predicated region body
PF: predicated region fallthrough
CT: control target
= control target key end

     0   :  { %s1240_s0 = inlined_call_operand.vmem [shape: bf16[512,128], index: 0, kind: input, shape index: {}]   ;;  %s1241_s1 = inlined_call_operand.vmem [shape: f32[1,128], index: 1, kind: input, shape index: {}]   ;;  %s1242_s2 = inlined_call_operand.vmem [shape: f32[1,128], index: 2, kind: input, shape index: {}]   ;;  %s1243_s3 = inlined_call_operand.vmem [shape: bf16[512,128], index: 3, kind: output, shape index: {}]  }
   0x1   :  { %v539_v0 = vld [vmem:[%s1240_s0] sm:$0xff]   ;;  %v826_v5 = vld [vmem:[%s1240_s0 + $0x8] sm:$0xff]   ;;  %v827_v8 = vld [vmem:[%s1240_s0 + $0x10] sm:$0xff]  }
   0x2   :  { %v916_v1 = vld [vmem:[%s1241_s1] ss:$0 sm:$0xff]  ;;  %v540_v2 = vunpack.c.l.bf16 %v539_v0  ;;  %v541_v3 = vunpack.c.h.bf16 %v539_v0  ;;  %v544_v6 = vunpack.c.l.bf16 %v826_v5  ;;  %v545_v7 = vunpack.c.h.bf16 %v826_v5  ;;  %v828_v9 = vld [vmem:[%s1240_s0 + $0x18] sm:$0xff]   ;;  %v830_v43 = vld [vmem:[%s1240_s0 + $0x28] sm:$0xff]  }
   0x3   :  { %v921_v4 = vld [vmem:[%s1242_s2] ss:$0 sm:$0xff]  ;;  %v548_v12 = vunpack.c.l.bf16 %v827_v8  ;;  %v549_v13 = vunpack.c.h.bf16 %v827_v8  ;;  %v552_v16 = vunpack.c.l.bf16 %v828_v9  ;;  %v553_v17 = vunpack.c.h.bf16 %v828_v9  ;;  %v831_v48 = vld [vmem:[%s1240_s0 + $0x30] sm:$0xff]   ;;  %v832_v53 = vld [vmem:[%s1240_s0 + $0x38] sm:$0xff]  }
   0x4   :  { %v146_v10 = vmul.f32 %v916_v1, %v540_v2  ;;  %v147_v11 = vmul.f32 %v916_v1, %v541_v3  ;;  %v148_v14 = vmul.f32 %v916_v1, %v544_v6  ;;  %v149_v15 = vmul.f32 %v916_v1, %v545_v7  ;;  %v829_v34 = vld [vmem:[%s1240_s0 + $0x20] sm:$0xff]  }
   0x5   :  { %v150_v20 = vmul.f32 %v916_v1, %v548_v12  ;;  %v151_v21 = vmul.f32 %v916_v1, %v549_v13  ;;  %v152_v24 = vmul.f32 %v916_v1, %v552_v16  ;;  %v153_v25 = vmul.f32 %v916_v1, %v553_v17  ;;  %v833_v16 = vld [vmem:[%s1240_s0 + $0x40] sm:$0xff]  }
   0x6   :  { %v214_v18 = vadd.f32 %v921_v4, %v146_v10  ;;  %v215_v19 = vadd.f32 %v921_v4, %v147_v11  ;;  %v216_v22 = vadd.f32 %v921_v4, %v148_v14  ;;  %v217_v23 = vadd.f32 %v921_v4, %v149_v15 }
   0x7   :  { %v218_v28 = vadd.f32 %v921_v4, %v150_v20  ;;  %v219_v29 = vadd.f32 %v921_v4, %v151_v21  ;;  %v220_v32 = vadd.f32 %v921_v4, %v152_v24  ;;  %v221_v33 = vadd.f32 %v921_v4, %v153_v25 }
   0x8   :  { %v278_v26 = vmul.f32 0.2, %v214_v18  ;;  %v279_v27 = vmul.f32 0.2, %v215_v19  ;;  %v280_v30 = vmul.f32 0.2, %v216_v22  ;;  %v556_v47 = vunpack.c.l.bf16 %v829_v34 }
   0x9   :  { %v281_v31 = vmul.f32 0.2, %v217_v23  ;;  %v282_v37 = vmul.f32 0.2, %v218_v28  ;;  %v283_v38 = vmul.f32 0.2, %v219_v29  ;;  %v557_v52 = vunpack.c.h.bf16 %v829_v34 }
   0xa   :  { %v342_v35 = vmax.f32 %v214_v18, %v278_v26  ;;  %v343_v36 = vmax.f32 %v215_v19, %v279_v27  ;;  %v344_v39 = vmax.f32 %v216_v22, %v280_v30  ;;  %v284_v41 = vmul.f32 0.2, %v220_v32  ;;  %v835_v34 = vld [vmem:[%s1240_s0 + $0x50] sm:$0xff]  }
   0xb   :  { %v345_v40 = vmax.f32 %v217_v23, %v281_v31  ;;  %v285_v42 = vmul.f32 0.2, %v221_v33  ;;  %v346_v45 = vmax.f32 %v218_v28, %v282_v37  ;;  %v347_v46 = vmax.f32 %v219_v29, %v283_v38  ;;  %v834_v29 = vld [vmem:[%s1240_s0 + $0x48] sm:$0xff]  }
   0xc   :  { %v669_v44 = vpack.c.bf16 %v343_v36, %v342_v35  ;;  %v348_v50 = vmax.f32 %v220_v32, %v284_v41  ;;  %v154_v55 = vmul.f32 %v916_v1, %v556_v47  ;;  %v560_v56 = vunpack.c.l.bf16 %v830_v43 }
   0xd   :  { %v674_v49 = vpack.c.bf16 %v345_v40, %v344_v39  ;;  %v349_v51 = vmax.f32 %v221_v33, %v285_v42  ;;  %v679_v54 = vpack.c.bf16 %v347_v46, %v346_v45  ;;  %v561_v57 = vunpack.c.h.bf16 %v830_v43  ;;  %v836_v39 = vld [vmem:[%s1240_s0 + $0x58] sm:$0xff]  }
   0xe   :  { %670 = vst [vmem:[%s1243_s3] sm:$0xff] %v669_v44   ;;  %v155_v59 = vmul.f32 %v916_v1, %v557_v52  ;;  %v564_v60 = vunpack.c.l.bf16 %v831_v48  ;;  %v565_v61 = vunpack.c.h.bf16 %v831_v48  ;;  %v222_v62 = vadd.f32 %v921_v4, %v154_v55 }
   0xf   :  { %857 = vst [vmem:[%s1243_s3 + $0x8] sm:$0xff] %v674_v49   ;;  %v684_v58 = vpack.c.bf16 %v349_v51, %v348_v50  ;;  %v156_v63 = vmul.f32 %v916_v1, %v560_v56  ;;  %v157_v0 = vmul.f32 %v916_v1, %v561_v57  ;;  %v568_v2 = vunpack.c.l.bf16 %v832_v53 }
  0x10   :  { %858 = vst [vmem:[%s1243_s3 + $0x10] sm:$0xff] %v679_v54   ;;  %v223_v3 = vadd.f32 %v921_v4, %v155_v59  ;;  %v158_v5 = vmul.f32 %v916_v1, %v564_v60  ;;  %v159_v6 = vmul.f32 %v916_v1, %v565_v61  ;;  %v569_v7 = vunpack.c.h.bf16 %v832_v53  ;;  %v837_v60 = vld [vmem:[%s1240_s0 + $0x60] sm:$0xff]  }
  0x11   :  { %859 = vst [vmem:[%s1243_s3 + $0x18] sm:$0xff] %v684_v58   ;;  %v286_v8 = vmul.f32 0.2, %v222_v62  ;;  %v224_v9 = vadd.f32 %v921_v4, %v156_v63  ;;  %v225_v10 = vadd.f32 %v921_v4, %v157_v0  ;;  %v160_v11 = vmul.f32 %v916_v1, %v568_v2 }
  0x12   :  { %v287_v12 = vmul.f32 0.2, %v223_v3  ;;  %v226_v13 = vadd.f32 %v921_v4, %v158_v5  ;;  %v227_v14 = vadd.f32 %v921_v4, %v159_v6  ;;  %v161_v15 = vmul.f32 %v916_v1, %v569_v7 }
  0x13   :  { %v350_v17 = vmax.f32 %v222_v62, %v286_v8  ;;  %v288_v18 = vmul.f32 0.2, %v224_v9  ;;  %v289_v19 = vmul.f32 0.2, %v225_v10  ;;  %v228_v20 = vadd.f32 %v921_v4, %v160_v11 }
  0x14   :  { %v351_v21 = vmax.f32 %v223_v3, %v287_v12  ;;  %v290_v22 = vmul.f32 0.2, %v226_v13  ;;  %v291_v23 = vmul.f32 0.2, %v227_v14  ;;  %v229_v24 = vadd.f32 %v921_v4, %v161_v15  ;;  %v838_v15 = vld [vmem:[%s1240_s0 + $0x68] sm:$0xff]  }
  0x15   :  { %v352_v25 = vmax.f32 %v224_v9, %v288_v18  ;;  %v353_v26 = vmax.f32 %v225_v10, %v289_v19  ;;  %v292_v27 = vmul.f32 0.2, %v228_v20  ;;  %v572_v28 = vunpack.c.l.bf16 %v833_v16 }
  0x16   :  { %v689_v30 = vpack.c.bf16 %v351_v21, %v350_v17  ;;  %v354_v31 = vmax.f32 %v226_v13, %v290_v22  ;;  %v355_v32 = vmax.f32 %v227_v14, %v291_v23  ;;  %v293_v33 = vmul.f32 0.2, %v229_v24 }
  0x17   :  { %v694_v35 = vpack.c.bf16 %v353_v26, %v352_v25  ;;  %v356_v36 = vmax.f32 %v228_v20, %v292_v27  ;;  %v573_v37 = vunpack.c.h.bf16 %v833_v16  ;;  %v162_v38 = vmul.f32 %v916_v1, %v572_v28  ;;  %v839_v20 = vld [vmem:[%s1240_s0 + $0x70] sm:$0xff]   ;;  %v840_v25 = vld [vmem:[%s1240_s0 + $0x78] sm:$0xff]  }
  0x18   :  { %860 = vst [vmem:[%s1243_s3 + $0x20] sm:$0xff] %v689_v30   ;;  %v699_v40 = vpack.c.bf16 %v355_v32, %v354_v31  ;;  %v357_v41 = vmax.f32 %v229_v24, %v293_v33  ;;  %v576_v42 = vunpack.c.l.bf16 %v834_v29  ;;  %v577_v43 = vunpack.c.h.bf16 %v834_v29 }
  0x19   :  { %861 = vst [vmem:[%s1243_s3 + $0x28] sm:$0xff] %v694_v35   ;;  %v163_v44 = vmul.f32 %v916_v1, %v573_v37  ;;  %v230_v45 = vadd.f32 %v921_v4, %v162_v38  ;;  %v580_v46 = vunpack.c.l.bf16 %v835_v34  ;;  %v581_v47 = vunpack.c.h.bf16 %v835_v34 }
  0x1a   :  { %862 = vst [vmem:[%s1243_s3 + $0x30] sm:$0xff] %v699_v40   ;;  %v704_v48 = vpack.c.bf16 %v357_v41, %v356_v36  ;;  %v164_v49 = vmul.f32 %v916_v1, %v576_v42  ;;  %v165_v50 = vmul.f32 %v916_v1, %v577_v43  ;;  %v584_v51 = vunpack.c.l.bf16 %v836_v39 }
  0x1b   :  { %v231_v52 = vadd.f32 %v921_v4, %v163_v44  ;;  %v294_v53 = vmul.f32 0.2, %v230_v45  ;;  %v166_v54 = vmul.f32 %v916_v1, %v580_v46  ;;  %v167_v55 = vmul.f32 %v916_v1, %v581_v47  ;;  %v841_v46 = vld [vmem:[%s1240_s0 + $0x80] sm:$0xff]  }
  0x1c   :  { %863 = vst [vmem:[%s1243_s3 + $0x38] sm:$0xff] %v704_v48   ;;  %v232_v56 = vadd.f32 %v921_v4, %v164_v49  ;;  %v233_v57 = vadd.f32 %v921_v4, %v165_v50  ;;  %v585_v58 = vunpack.c.h.bf16 %v836_v39  ;;  %v168_v59 = vmul.f32 %v916_v1, %v584_v51 }
  0x1d   :  { %v295_v61 = vmul.f32 0.2, %v231_v52  ;;  %v358_v62 = vmax.f32 %v230_v45, %v294_v53  ;;  %v234_v63 = vadd.f32 %v921_v4, %v166_v54  ;;  %v235_v0 = vadd.f32 %v921_v4, %v167_v55 }
  0x1e   :  { %v296_v2 = vmul.f32 0.2, %v232_v56  ;;  %v297_v3 = vmul.f32 0.2, %v233_v57  ;;  %v169_v5 = vmul.f32 %v916_v1, %v585_v58  ;;  %v236_v6 = vadd.f32 %v921_v4, %v168_v59  ;;  %v842_v59 = vld [vmem:[%s1240_s0 + $0x88] sm:$0xff]  }
  0x1f   :  { %v359_v7 = vmax.f32 %v231_v52, %v295_v61  ;;  %v298_v8 = vmul.f32 0.2, %v234_v63  ;;  %v299_v9 = vmul.f32 0.2, %v235_v0  ;;  %v588_v10 = vunpack.c.l.bf16 %v837_v60 }
  0x20   :  { %v360_v11 = vmax.f32 %v232_v56, %v296_v2  ;;  %v361_v12 = vmax.f32 %v233_v57, %v297_v3  ;;  %v237_v13 = vadd.f32 %v921_v4, %v169_v5  ;;  %v300_v14 = vmul.f32 0.2, %v236_v6 }
  0x21   :  { %v709_v16 = vpack.c.bf16 %v359_v7, %v358_v62  ;;  %v362_v17 = vmax.f32 %v234_v63, %v298_v8  ;;  %v363_v18 = vmax.f32 %v235_v0, %v299_v9  ;;  %v589_v19 = vunpack.c.h.bf16 %v837_v60 }
  0x22   :  { %v714_v21 = vpack.c.bf16 %v361_v12, %v360_v11  ;;  %v301_v22 = vmul.f32 0.2, %v237_v13  ;;  %v364_v23 = vmax.f32 %v236_v6, %v300_v14  ;;  %v170_v24 = vmul.f32 %v916_v1, %v588_v10  ;;  %v843_v6 = vld [vmem:[%s1240_s0 + $0x90] sm:$0xff]   ;;  %v844_v11 = vld [vmem:[%s1240_s0 + $0x98] sm:$0xff]  }
  0x23   :  { %864 = vst [vmem:[%s1243_s3 + $0x40] sm:$0xff] %v709_v16   ;;  %v719_v26 = vpack.c.bf16 %v363_v18, %v362_v17  ;;  %v171_v27 = vmul.f32 %v916_v1, %v589_v19  ;;  %v592_v28 = vunpack.c.l.bf16 %v838_v15  ;;  %v593_v29 = vunpack.c.h.bf16 %v838_v15 }
  0x24   :  { %865 = vst [vmem:[%s1243_s3 + $0x48] sm:$0xff] %v714_v21   ;;  %v365_v30 = vmax.f32 %v237_v13, %v301_v22  ;;  %v238_v31 = vadd.f32 %v921_v4, %v170_v24  ;;  %v596_v32 = vunpack.c.l.bf16 %v839_v20  ;;  %v597_v33 = vunpack.c.h.bf16 %v839_v20 }
  0x25   :  { %866 = vst [vmem:[%s1243_s3 + $0x50] sm:$0xff] %v719_v26   ;;  %v239_v34 = vadd.f32 %v921_v4, %v171_v27  ;;  %v172_v35 = vmul.f32 %v916_v1, %v592_v28  ;;  %v173_v36 = vmul.f32 %v916_v1, %v593_v29  ;;  %v600_v37 = vunpack.c.l.bf16 %v840_v25 }
  0x26   :  { %v724_v38 = vpack.c.bf16 %v365_v30, %v364_v23  ;;  %v302_v39 = vmul.f32 0.2, %v238_v31  ;;  %v174_v40 = vmul.f32 %v916_v1, %v596_v32  ;;  %v175_v41 = vmul.f32 %v916_v1, %v597_v33  ;;  %v845_v32 = vld [vmem:[%s1240_s0 + $0xa0] sm:$0xff]  }
  0x27   :  { %v303_v42 = vmul.f32 0.2, %v239_v34  ;;  %v240_v43 = vadd.f32 %v921_v4, %v172_v35  ;;  %v241_v44 = vadd.f32 %v921_v4, %v173_v36  ;;  %v601_v45 = vunpack.c.h.bf16 %v840_v25 }
  0x28   :  { %867 = vst [vmem:[%s1243_s3 + $0x58] sm:$0xff] %v724_v38   ;;  %v366_v47 = vmax.f32 %v238_v31, %v302_v39  ;;  %v242_v48 = vadd.f32 %v921_v4, %v174_v40  ;;  %v243_v49 = vadd.f32 %v921_v4, %v175_v41  ;;  %v176_v50 = vmul.f32 %v916_v1, %v600_v37 }
  0x29   :  { %v367_v51 = vmax.f32 %v239_v34, %v303_v42  ;;  %v304_v52 = vmul.f32 0.2, %v240_v43  ;;  %v305_v53 = vmul.f32 0.2, %v241_v44  ;;  %v177_v54 = vmul.f32 %v916_v1, %v601_v45  ;;  %v846_v45 = vld [vmem:[%s1240_s0 + $0xa8] sm:$0xff]  }
  0x2a   :  { %v306_v55 = vmul.f32 0.2, %v242_v48  ;;  %v307_v56 = vmul.f32 0.2, %v243_v49  ;;  %v244_v57 = vadd.f32 %v921_v4, %v176_v50  ;;  %v604_v58 = vunpack.c.l.bf16 %v841_v46 }
  0x2b   :  { %v729_v60 = vpack.c.bf16 %v367_v51, %v366_v47  ;;  %v368_v61 = vmax.f32 %v240_v43, %v304_v52  ;;  %v369_v62 = vmax.f32 %v241_v44, %v305_v53  ;;  %v245_v63 = vadd.f32 %v921_v4, %v177_v54  ;;  %v847_v54 = vld [vmem:[%s1240_s0 + $0xb0] sm:$0xff]  }
  0x2c   :  { %v370_v0 = vmax.f32 %v242_v48, %v306_v55  ;;  %v371_v2 = vmax.f32 %v243_v49, %v307_v56  ;;  %v308_v3 = vmul.f32 0.2, %v244_v57  ;;  %v605_v5 = vunpack.c.h.bf16 %v841_v46 }
  0x2d   :  { %868 = vst [vmem:[%s1243_s3 + $0x60] sm:$0xff] %v729_v60   ;;  %v734_v7 = vpack.c.bf16 %v369_v62, %v368_v61  ;;  %v309_v8 = vmul.f32 0.2, %v245_v63  ;;  %v178_v9 = vmul.f32 %v916_v1, %v604_v58  ;;  %v608_v10 = vunpack.c.l.bf16 %v842_v59 }
  0x2e   :  { %v739_v12 = vpack.c.bf16 %v371_v2, %v370_v0  ;;  %v372_v13 = vmax.f32 %v244_v57, %v308_v3  ;;  %v179_v14 = vmul.f32 %v916_v1, %v605_v5  ;;  %v609_v15 = vunpack.c.h.bf16 %v842_v59 }
  0x2f   :  { %869 = vst [vmem:[%s1243_s3 + $0x68] sm:$0xff] %v734_v7   ;;  %v373_v16 = vmax.f32 %v245_v63, %v309_v8  ;;  %v246_v17 = vadd.f32 %v921_v4, %v178_v9  ;;  %v180_v18 = vmul.f32 %v916_v1, %v608_v10  ;;  %v612_v19 = vunpack.c.l.bf16 %v843_v6  ;;  %v848_v63 = vld [vmem:[%s1240_s0 + $0xb8] sm:$0xff]  }
  0x30   :  { %870 = vst [vmem:[%s1243_s3 + $0x70] sm:$0xff] %v739_v12   ;;  %v247_v20 = vadd.f32 %v921_v4, %v179_v14  ;;  %v181_v21 = vmul.f32 %v916_v1, %v609_v15  ;;  %v613_v22 = vunpack.c.h.bf16 %v843_v6  ;;  %v616_v23 = vunpack.c.l.bf16 %v844_v11  ;;  %v849_v14 = vld [vmem:[%s1240_s0 + $0xc0] sm:$0xff]  }
  0x31   :  { %v744_v24 = vpack.c.bf16 %v373_v16, %v372_v13  ;;  %v310_v25 = vmul.f32 0.2, %v246_v17  ;;  %v248_v26 = vadd.f32 %v921_v4, %v180_v18  ;;  %v182_v27 = vmul.f32 %v916_v1, %v612_v19 }
  0x32   :  { %v311_v28 = vmul.f32 0.2, %v247_v20  ;;  %v249_v29 = vadd.f32 %v921_v4, %v181_v21  ;;  %v183_v30 = vmul.f32 %v916_v1, %v613_v22  ;;  %v617_v31 = vunpack.c.h.bf16 %v844_v11 }
  0x33   :  { %871 = vst [vmem:[%s1243_s3 + $0x78] sm:$0xff] %v744_v24   ;;  %v374_v33 = vmax.f32 %v246_v17, %v310_v25  ;;  %v312_v34 = vmul.f32 0.2, %v248_v26  ;;  %v250_v35 = vadd.f32 %v921_v4, %v182_v27  ;;  %v184_v36 = vmul.f32 %v916_v1, %v616_v23 }
  0x34   :  { %v375_v37 = vmax.f32 %v247_v20, %v311_v28  ;;  %v313_v38 = vmul.f32 0.2, %v249_v29  ;;  %v251_v39 = vadd.f32 %v921_v4, %v183_v30  ;;  %v185_v40 = vmul.f32 %v916_v1, %v617_v31  ;;  %v850_v31 = vld [vmem:[%s1240_s0 + $0xc8] sm:$0xff]  }
  0x35   :  { %v376_v41 = vmax.f32 %v248_v26, %v312_v34  ;;  %v314_v42 = vmul.f32 0.2, %v250_v35  ;;  %v252_v43 = vadd.f32 %v921_v4, %v184_v36  ;;  %v620_v44 = vunpack.c.l.bf16 %v845_v32 }
  0x36   :  { %v749_v46 = vpack.c.bf16 %v375_v37, %v374_v33  ;;  %v377_v47 = vmax.f32 %v249_v29, %v313_v38  ;;  %v315_v48 = vmul.f32 0.2, %v251_v39  ;;  %v253_v49 = vadd.f32 %v921_v4, %v185_v40  ;;  %v851_v40 = vld [vmem:[%s1240_s0 + $0xd0] sm:$0xff]  }
  0x37   :  { %v378_v50 = vmax.f32 %v250_v35, %v314_v42  ;;  %v316_v51 = vmul.f32 0.2, %v252_v43  ;;  %v621_v52 = vunpack.c.h.bf16 %v845_v32  ;;  %v186_v53 = vmul.f32 %v916_v1, %v620_v44 }
  0x38   :  { %872 = vst [vmem:[%s1243_s3 + $0x80] sm:$0xff] %v749_v46   ;;  %v754_v55 = vpack.c.bf16 %v377_v47, %v376_v41  ;;  %v379_v56 = vmax.f32 %v251_v39, %v315_v48  ;;  %v317_v57 = vmul.f32 0.2, %v253_v49  ;;  %v624_v58 = vunpack.c.l.bf16 %v846_v45 }
  0x39   :  { %v380_v59 = vmax.f32 %v252_v43, %v316_v51  ;;  %v187_v60 = vmul.f32 %v916_v1, %v621_v52  ;;  %v254_v61 = vadd.f32 %v921_v4, %v186_v53  ;;  %v625_v62 = vunpack.c.h.bf16 %v846_v45 }
  0x3a   :  { %873 = vst [vmem:[%s1243_s3 + $0x88] sm:$0xff] %v754_v55   ;;  %v759_v0 = vpack.c.bf16 %v379_v56, %v378_v50  ;;  %v381_v2 = vmax.f32 %v253_v49, %v317_v57  ;;  %v188_v3 = vmul.f32 %v916_v1, %v624_v58  ;;  %v628_v5 = vunpack.c.l.bf16 %v847_v54  ;;  %v852_v49 = vld [vmem:[%s1240_s0 + $0xd8] sm:$0xff]  }
  0x3b   :  { %v255_v6 = vadd.f32 %v921_v4, %v187_v60  ;;  %v318_v7 = vmul.f32 0.2, %v254_v61  ;;  %v189_v8 = vmul.f32 %v916_v1, %v625_v62  ;;  %v629_v9 = vunpack.c.h.bf16 %v847_v54  ;;  %v853_v62 = vld [vmem:[%s1240_s0 + $0xe0] sm:$0xff]  }
  0x3c   :  { %874 = vst [vmem:[%s1243_s3 + $0x90] sm:$0xff] %v759_v0   ;;  %v764_v10 = vpack.c.bf16 %v381_v2, %v380_v59  ;;  %v256_v11 = vadd.f32 %v921_v4, %v188_v3  ;;  %v190_v12 = vmul.f32 %v916_v1, %v628_v5  ;;  %v632_v13 = vunpack.c.l.bf16 %v848_v63 }
  0x3d   :  { %v319_v15 = vmul.f32 0.2, %v255_v6  ;;  %v382_v16 = vmax.f32 %v254_v61, %v318_v7  ;;  %v257_v17 = vadd.f32 %v921_v4, %v189_v8  ;;  %v191_v18 = vmul.f32 %v916_v1, %v629_v9 }
  0x3e   :  { %875 = vst [vmem:[%s1243_s3 + $0x98] sm:$0xff] %v764_v10   ;;  %v320_v19 = vmul.f32 0.2, %v256_v11  ;;  %v258_v20 = vadd.f32 %v921_v4, %v190_v12  ;;  %v633_v21 = vunpack.c.h.bf16 %v848_v63  ;;  %v192_v22 = vmul.f32 %v916_v1, %v632_v13  ;;  %v854_v13 = vld [vmem:[%s1240_s0 + $0xe8] sm:$0xff]  }
  0x3f   :  { %v383_v23 = vmax.f32 %v255_v6, %v319_v15  ;;  %v321_v24 = vmul.f32 0.2, %v257_v17  ;;  %v259_v25 = vadd.f32 %v921_v4, %v191_v18  ;;  %v636_v26 = vunpack.c.l.bf16 %v849_v14 }
  0x40   :  { %v384_v27 = vmax.f32 %v256_v11, %v320_v19  ;;  %v322_v28 = vmul.f32 0.2, %v258_v20  ;;  %v193_v29 = vmul.f32 %v916_v1, %v633_v21  ;;  %v260_v30 = vadd.f32 %v921_v4, %v192_v22 }
  0x41   :  { %v769_v32 = vpack.c.bf16 %v383_v23, %v382_v16  ;;  %v385_v33 = vmax.f32 %v257_v17, %v321_v24  ;;  %v323_v34 = vmul.f32 0.2, %v259_v25  ;;  %v637_v35 = vunpack.c.h.bf16 %v849_v14 }
  0x42   :  { %v386_v36 = vmax.f32 %v258_v20, %v322_v28  ;;  %v261_v37 = vadd.f32 %v921_v4, %v193_v29  ;;  %v324_v38 = vmul.f32 0.2, %v260_v30  ;;  %v194_v39 = vmul.f32 %v916_v1, %v636_v26  ;;  %v855_v26 = vld [vmem:[%s1240_s0 + $0xf0] sm:$0xff]  }
  0x43   :  { %876 = vst [vmem:[%s1243_s3 + $0xa0] sm:$0xff] %v769_v32   ;;  %v774_v41 = vpack.c.bf16 %v385_v33, %v384_v27  ;;  %v387_v42 = vmax.f32 %v259_v25, %v323_v34  ;;  %v195_v43 = vmul.f32 %v916_v1, %v637_v35  ;;  %v640_v44 = vunpack.c.l.bf16 %v850_v31  ;;  %v856_v35 = vld [vmem:[%s1240_s0 + $0xf8] sm:$0xff]  }
  0x44   :  { %v325_v45 = vmul.f32 0.2, %v261_v37  ;;  %v388_v46 = vmax.f32 %v260_v30, %v324_v38  ;;  %v262_v47 = vadd.f32 %v921_v4, %v194_v39  ;;  %v641_v48 = vunpack.c.h.bf16 %v850_v31 }
  0x45   :  { %877 = vst [vmem:[%s1243_s3 + $0xa8] sm:$0xff] %v774_v41   ;;  %v779_v50 = vpack.c.bf16 %v387_v42, %v386_v36  ;;  %v263_v51 = vadd.f32 %v921_v4, %v195_v43  ;;  %v196_v52 = vmul.f32 %v916_v1, %v640_v44  ;;  %v644_v53 = vunpack.c.l.bf16 %v851_v40 }
  0x46   :  { %v389_v54 = vmax.f32 %v261_v37, %v325_v45  ;;  %v326_v55 = vmul.f32 0.2, %v262_v47  ;;  %v197_v56 = vmul.f32 %v916_v1, %v641_v48  ;;  %v645_v57 = vunpack.c.h.bf16 %v851_v40 }
  0x47   :  { %878 = vst [vmem:[%s1243_s3 + $0xb0] sm:$0xff] %v779_v50   ;;  %v327_v58 = vmul.f32 0.2, %v263_v51  ;;  %v264_v59 = vadd.f32 %v921_v4, %v196_v52  ;;  %v198_v60 = vmul.f32 %v916_v1, %v644_v53  ;;  %v648_v61 = vunpack.c.l.bf16 %v852_v49 }
  0x48   :  { %v784_v63 = vpack.c.bf16 %v389_v54, %v388_v46  ;;  %v390_v0 = vmax.f32 %v262_v47, %v326_v55  ;;  %v265_v2 = vadd.f32 %v921_v4, %v197_v56  ;;  %v199_v3 = vmul.f32 %v916_v1, %v645_v57 }
  0x49   :  { %v391_v5 = vmax.f32 %v263_v51, %v327_v58  ;;  %v328_v6 = vmul.f32 0.2, %v264_v59  ;;  %v266_v7 = vadd.f32 %v921_v4, %v198_v60  ;;  %v649_v8 = vunpack.c.h.bf16 %v852_v49 }
  0x4a   :  { %879 = vst [vmem:[%s1243_s3 + $0xb8] sm:$0xff] %v784_v63   ;;  %v329_v9 = vmul.f32 0.2, %v265_v2  ;;  %v267_v10 = vadd.f32 %v921_v4, %v199_v3  ;;  %v200_v11 = vmul.f32 %v916_v1, %v648_v61  ;;  %v652_v12 = vunpack.c.l.bf16 %v853_v62 }
  0x4b   :  { %v789_v14 = vpack.c.bf16 %v391_v5, %v390_v0  ;;  %v392_v15 = vmax.f32 %v264_v59, %v328_v6  ;;  %v330_v16 = vmul.f32 0.2, %v266_v7  ;;  %v201_v17 = vmul.f32 %v916_v1, %v649_v8 }
  0x4c   :  { %v393_v18 = vmax.f32 %v265_v2, %v329_v9  ;;  %v331_v19 = vmul.f32 0.2, %v267_v10  ;;  %v268_v20 = vadd.f32 %v921_v4, %v200_v11  ;;  %v653_v21 = vunpack.c.h.bf16 %v853_v62 }
  0x4d   :  { %880 = vst [vmem:[%s1243_s3 + $0xc0] sm:$0xff] %v789_v14   ;;  %v394_v22 = vmax.f32 %v266_v7, %v330_v16  ;;  %v269_v23 = vadd.f32 %v921_v4, %v201_v17  ;;  %v202_v24 = vmul.f32 %v916_v1, %v652_v12  ;;  %v656_v25 = vunpack.c.l.bf16 %v854_v13 }
  0x4e   :  { %v794_v27 = vpack.c.bf16 %v393_v18, %v392_v15  ;;  %v395_v28 = vmax.f32 %v267_v10, %v331_v19  ;;  %v332_v29 = vmul.f32 0.2, %v268_v20  ;;  %v203_v30 = vmul.f32 %v916_v1, %v653_v21 }
  0x4f   :  { %v333_v31 = vmul.f32 0.2, %v269_v23  ;;  %v270_v32 = vadd.f32 %v921_v4, %v202_v24  ;;  %v657_v33 = vunpack.c.h.bf16 %v854_v13  ;;  %v204_v34 = vmul.f32 %v916_v1, %v656_v25 }
  0x50   :  { %881 = vst [vmem:[%s1243_s3 + $0xc8] sm:$0xff] %v794_v27   ;;  %v799_v36 = vpack.c.bf16 %v395_v28, %v394_v22  ;;  %v396_v37 = vmax.f32 %v268_v20, %v332_v29  ;;  %v271_v38 = vadd.f32 %v921_v4, %v203_v30  ;;  %v660_v39 = vunpack.c.l.bf16 %v855_v26 }
  0x51   :  { %v397_v40 = vmax.f32 %v269_v23, %v333_v31  ;;  %v334_v41 = vmul.f32 0.2, %v270_v32  ;;  %v205_v42 = vmul.f32 %v916_v1, %v657_v33  ;;  %v272_v43 = vadd.f32 %v921_v4, %v204_v34 }
  0x52   :  { %882 = vst [vmem:[%s1243_s3 + $0xd0] sm:$0xff] %v799_v36   ;;  %v335_v44 = vmul.f32 0.2, %v271_v38  ;;  %v661_v45 = vunpack.c.h.bf16 %v855_v26  ;;  %v206_v46 = vmul.f32 %v916_v1, %v660_v39  ;;  %v664_v47 = vunpack.c.l.bf16 %v856_v35 }
  0x53   :  { %v804_v48 = vpack.c.bf16 %v397_v40, %v396_v37  ;;  %v398_v49 = vmax.f32 %v270_v32, %v334_v41  ;;  %v273_v50 = vadd.f32 %v921_v4, %v205_v42  ;;  %v336_v51 = vmul.f32 0.2, %v272_v43 }
  0x54   :  { %v399_v52 = vmax.f32 %v271_v38, %v335_v44  ;;  %v207_v53 = vmul.f32 %v916_v1, %v661_v45  ;;  %v274_v54 = vadd.f32 %v921_v4, %v206_v46  ;;  %v665_v55 = vunpack.c.h.bf16 %v856_v35 }
  0x55   :  { %883 = vst [vmem:[%s1243_s3 + $0xd8] sm:$0xff] %v804_v48   ;;  %v337_v56 = vmul.f32 0.2, %v273_v50  ;;  %v400_v57 = vmax.f32 %v272_v43, %v336_v51  ;;  %v208_v58 = vmul.f32 %v916_v1, %v664_v47 }
  0x56   :  { %v809_v59 = vpack.c.bf16 %v399_v52, %v398_v49  ;;  %v275_v60 = vadd.f32 %v921_v4, %v207_v53  ;;  %v338_v61 = vmul.f32 0.2, %v274_v54  ;;  %v209_v62 = vmul.f32 %v916_v1, %v665_v55 }
  0x57   :  { %v401_v63 = vmax.f32 %v273_v50, %v337_v56  ;;  %v276_v0 = vadd.f32 %v921_v4, %v208_v58 }
  0x58   :  { %884 = vst [vmem:[%s1243_s3 + $0xe0] sm:$0xff] %v809_v59   ;;  %v339_v2 = vmul.f32 0.2, %v275_v60  ;;  %v402_v3 = vmax.f32 %v274_v54, %v338_v61  ;;  %v277_v5 = vadd.f32 %v921_v4, %v209_v62 }
  0x59   :  { %v814_v6 = vpack.c.bf16 %v401_v63, %v400_v57  ;;  %v340_v7 = vmul.f32 0.2, %v276_v0 }
  0x5a   :  { %v403_v8 = vmax.f32 %v275_v60, %v339_v2  ;;  %v341_v9 = vmul.f32 0.2, %v277_v5 }
  0x5b   :  { %885 = vst [vmem:[%s1243_s3 + $0xe8] sm:$0xff] %v814_v6   ;;  %v404_v1 = vmax.f32 %v276_v0, %v340_v7 }
  0x5c   :  { %v819_v10 = vpack.c.bf16 %v403_v8, %v402_v3  ;;  %v405_v11 = vmax.f32 %v277_v5, %v341_v9 }
  0x5e   :  { %886 = vst [vmem:[%s1243_s3 + $0xf0] sm:$0xff] %v819_v10   ;;  %v824_v12 = vpack.c.bf16 %v405_v11, %v404_v1 }
  0x60   :  { %887 = vst [vmem:[%s1243_s3 + $0xf8] sm:$0xff] %v824_v12  }

// kernel: discriminator_forward.12
= control target key start
LH: loop header
LB: loop body
LE: loop exit
PB: predicated region body
PF: predicated region fallthrough
CT: control target
= control target key end

     0   :  { %s352_s0 = inlined_call_operand.vmem [shape: bf16[128,128], index: 0, kind: input, shape index: {}]   ;;  %s353_s1 = inlined_call_operand.vmem [shape: f32[1,128], index: 1, kind: input, shape index: {}]   ;;  %s354_s2 = inlined_call_operand.vmem [shape: f32[1,128], index: 2, kind: input, shape index: {}]   ;;  %s355_s3 = inlined_call_operand.vmem [shape: bf16[128,128], index: 3, kind: output, shape index: {}]  }
   0x1   :  { %v155_v0 = vld [vmem:[%s352_s0] sm:$0xff]   ;;  %v226_v5 = vld [vmem:[%s352_s0 + $0x8] sm:$0xff]   ;;  %v227_v8 = vld [vmem:[%s352_s0 + $0x10] sm:$0xff]  }
   0x2   :  { %v268_v1 = vld [vmem:[%s353_s1] ss:$0 sm:$0xff]  ;;  %v156_v2 = vunpack.c.l.bf16 %v155_v0  ;;  %v157_v3 = vunpack.c.h.bf16 %v155_v0  ;;  %v160_v6 = vunpack.c.l.bf16 %v226_v5  ;;  %v161_v7 = vunpack.c.h.bf16 %v226_v5  ;;  %v228_v9 = vld [vmem:[%s352_s0 + $0x18] sm:$0xff]   ;;  %v230_v43 = vld [vmem:[%s352_s0 + $0x28] sm:$0xff]  }
   0x3   :  { %v273_v4 = vld [vmem:[%s354_s2] ss:$0 sm:$0xff]  ;;  %v164_v12 = vunpack.c.l.bf16 %v227_v8  ;;  %v165_v13 = vunpack.c.h.bf16 %v227_v8  ;;  %v168_v16 = vunpack.c.l.bf16 %v228_v9  ;;  %v169_v17 = vunpack.c.h.bf16 %v228_v9  ;;  %v231_v48 = vld [vmem:[%s352_s0 + $0x30] sm:$0xff]   ;;  %v232_v53 = vld [vmem:[%s352_s0 + $0x38] sm:$0xff]  }
   0x4   :  { %v50_v10 = vmul.f32 %v268_v1, %v156_v2  ;;  %v51_v11 = vmul.f32 %v268_v1, %v157_v3  ;;  %v52_v14 = vmul.f32 %v268_v1, %v160_v6  ;;  %v53_v15 = vmul.f32 %v268_v1, %v161_v7  ;;  %v229_v34 = vld [vmem:[%s352_s0 + $0x20] sm:$0xff]  }
   0x5   :  { %v54_v20 = vmul.f32 %v268_v1, %v164_v12  ;;  %v55_v21 = vmul.f32 %v268_v1, %v165_v13  ;;  %v56_v24 = vmul.f32 %v268_v1, %v168_v16  ;;  %v57_v25 = vmul.f32 %v268_v1, %v169_v17 }
   0x6   :  { %v70_v18 = vadd.f32 %v273_v4, %v50_v10  ;;  %v71_v19 = vadd.f32 %v273_v4, %v51_v11  ;;  %v72_v22 = vadd.f32 %v273_v4, %v52_v14  ;;  %v73_v23 = vadd.f32 %v273_v4, %v53_v15 }
   0x7   :  { %v74_v28 = vadd.f32 %v273_v4, %v54_v20  ;;  %v75_v29 = vadd.f32 %v273_v4, %v55_v21  ;;  %v76_v32 = vadd.f32 %v273_v4, %v56_v24  ;;  %v77_v33 = vadd.f32 %v273_v4, %v57_v25 }
   0x8   :  { %v86_v26 = vmul.f32 0.2, %v70_v18  ;;  %v87_v27 = vmul.f32 0.2, %v71_v19  ;;  %v88_v30 = vmul.f32 0.2, %v72_v22  ;;  %v172_v47 = vunpack.c.l.bf16 %v229_v34 }
   0x9   :  { %v89_v31 = vmul.f32 0.2, %v73_v23  ;;  %v90_v37 = vmul.f32 0.2, %v74_v28  ;;  %v91_v38 = vmul.f32 0.2, %v75_v29  ;;  %v173_v52 = vunpack.c.h.bf16 %v229_v34 }
   0xa   :  { %v102_v35 = vmax.f32 %v70_v18, %v86_v26  ;;  %v103_v36 = vmax.f32 %v71_v19, %v87_v27  ;;  %v104_v39 = vmax.f32 %v72_v22, %v88_v30  ;;  %v92_v41 = vmul.f32 0.2, %v76_v32 }
   0xb   :  { %v105_v40 = vmax.f32 %v73_v23, %v89_v31  ;;  %v93_v42 = vmul.f32 0.2, %v77_v33  ;;  %v106_v45 = vmax.f32 %v74_v28, %v90_v37  ;;  %v107_v46 = vmax.f32 %v75_v29, %v91_v38 }
   0xc   :  { %v189_v44 = vpack.c.bf16 %v103_v36, %v102_v35  ;;  %v108_v50 = vmax.f32 %v76_v32, %v92_v41  ;;  %v58_v55 = vmul.f32 %v268_v1, %v172_v47  ;;  %v176_v56 = vunpack.c.l.bf16 %v230_v43 }
   0xd   :  { %v194_v49 = vpack.c.bf16 %v105_v40, %v104_v39  ;;  %v109_v51 = vmax.f32 %v77_v33, %v93_v42  ;;  %v199_v54 = vpack.c.bf16 %v107_v46, %v106_v45  ;;  %v177_v57 = vunpack.c.h.bf16 %v230_v43 }
   0xe   :  { %190 = vst [vmem:[%s355_s3] sm:$0xff] %v189_v44   ;;  %v59_v59 = vmul.f32 %v268_v1, %v173_v52  ;;  %v180_v60 = vunpack.c.l.bf16 %v231_v48  ;;  %v181_v61 = vunpack.c.h.bf16 %v231_v48  ;;  %v78_v62 = vadd.f32 %v273_v4, %v58_v55 }
   0xf   :  { %233 = vst [vmem:[%s355_s3 + $0x8] sm:$0xff] %v194_v49   ;;  %v204_v58 = vpack.c.bf16 %v109_v51, %v108_v50  ;;  %v60_v63 = vmul.f32 %v268_v1, %v176_v56  ;;  %v61_v0 = vmul.f32 %v268_v1, %v177_v57  ;;  %v184_v2 = vunpack.c.l.bf16 %v232_v53 }
  0x10   :  { %234 = vst [vmem:[%s355_s3 + $0x10] sm:$0xff] %v199_v54   ;;  %v79_v3 = vadd.f32 %v273_v4, %v59_v59  ;;  %v62_v5 = vmul.f32 %v268_v1, %v180_v60  ;;  %v63_v6 = vmul.f32 %v268_v1, %v181_v61  ;;  %v185_v7 = vunpack.c.h.bf16 %v232_v53 }
  0x11   :  { %235 = vst [vmem:[%s355_s3 + $0x18] sm:$0xff] %v204_v58   ;;  %v94_v8 = vmul.f32 0.2, %v78_v62  ;;  %v80_v9 = vadd.f32 %v273_v4, %v60_v63  ;;  %v81_v10 = vadd.f32 %v273_v4, %v61_v0  ;;  %v64_v11 = vmul.f32 %v268_v1, %v184_v2 }
  0x12   :  { %v95_v12 = vmul.f32 0.2, %v79_v3  ;;  %v82_v13 = vadd.f32 %v273_v4, %v62_v5  ;;  %v83_v14 = vadd.f32 %v273_v4, %v63_v6  ;;  %v65_v15 = vmul.f32 %v268_v1, %v185_v7 }
  0x13   :  { %v110_v16 = vmax.f32 %v78_v62, %v94_v8  ;;  %v96_v17 = vmul.f32 0.2, %v80_v9  ;;  %v97_v18 = vmul.f32 0.2, %v81_v10  ;;  %v84_v19 = vadd.f32 %v273_v4, %v64_v11 }
  0x14   :  { %v111_v20 = vmax.f32 %v79_v3, %v95_v12  ;;  %v98_v21 = vmul.f32 0.2, %v82_v13  ;;  %v99_v22 = vmul.f32 0.2, %v83_v14  ;;  %v85_v23 = vadd.f32 %v273_v4, %v65_v15 }
  0x15   :  { %v112_v24 = vmax.f32 %v80_v9, %v96_v17  ;;  %v113_v25 = vmax.f32 %v81_v10, %v97_v18  ;;  %v100_v26 = vmul.f32 0.2, %v84_v19 }
  0x16   :  { %v209_v27 = vpack.c.bf16 %v111_v20, %v110_v16  ;;  %v114_v28 = vmax.f32 %v82_v13, %v98_v21  ;;  %v115_v29 = vmax.f32 %v83_v14, %v99_v22  ;;  %v101_v30 = vmul.f32 0.2, %v85_v23 }
  0x17   :  { %v214_v31 = vpack.c.bf16 %v113_v25, %v112_v24  ;;  %v116_v32 = vmax.f32 %v84_v19, %v100_v26 }
  0x18   :  { %236 = vst [vmem:[%s355_s3 + $0x20] sm:$0xff] %v209_v27   ;;  %v219_v1 = vpack.c.bf16 %v115_v29, %v114_v28  ;;  %v117_v33 = vmax.f32 %v85_v23, %v101_v30 }
  0x19   :  { %237 = vst [vmem:[%s355_s3 + $0x28] sm:$0xff] %v214_v31  }
  0x1a   :  { %238 = vst [vmem:[%s355_s3 + $0x30] sm:$0xff] %v219_v1   ;;  %v224_v4 = vpack.c.bf16 %v117_v33, %v116_v32 }
  0x1c   :  { %239 = vst [vmem:[%s355_s3 + $0x38] sm:$0xff] %v224_v4  }

// kernel: discriminator_forward.11
= control target key start
LH: loop header
LB: loop body
LE: loop exit
PB: predicated region body
PF: predicated region fallthrough
CT: control target
= control target key end

     0   :  { %s920_s1 = inlined_call_operand.vmem [shape: bf16[256,128], index: 1, kind: input, shape index: {}]   ;;  %s921_s2 = inlined_call_operand.vmem [shape: f32[1,128], index: 2, kind: input, shape index: {}]   ;;  %s922_s0 = inlined_call_operand.vmem [shape: bf16[128,256], index: 0, kind: input, shape index: {}]   ;;  %s923_s3 = inlined_call_operand.vmem [shape: bf16[128,128], index: 3, kind: output, shape index: {0}]   ;;  %s924_s4 = inlined_call_operand.vmem [shape: f32[1,1,128], index: 4, kind: output, shape index: {1}]   ;;  %s925_s5 = inlined_call_operand.vmem [shape: f32[1,1,128], index: 5, kind: output, shape index: {2}]  }
   0x1   :  { %v598_v0 = vld [vmem:[%s920_s1 + $0x38] sm:$0xff]  ;;  %v597_v2 = vld [vmem:[%s920_s1 + $0x30] sm:$0xff]  ;;  %v596_v4 = vld [vmem:[%s920_s1 + $0x28] sm:$0xff] }
   0x2   :  { %v606_v1 = vld [vmem:[%s920_s1 + $0x78] sm:$0xff]  ;;  %245 = vmatpush.bf16.msra.mxu0 %v598_v0  ;;  %v605_v3 = vld [vmem:[%s920_s1 + $0x70] sm:$0xff]  ;;  %654 = vmatpush.bf16.msra.mxu2 %v598_v0  ;;  %v604_v5 = vld [vmem:[%s920_s1 + $0x68] sm:$0xff] }
   0x3   :  { %294 = vmatpush.bf16.msra.mxu1 %v606_v1  ;;  %662 = vmatpush.bf16.msra.mxu3 %v606_v1  ;;  %v595_v6 = vld [vmem:[%s920_s1 + $0x20] sm:$0xff]  ;;  %v594_v8 = vld [vmem:[%s920_s1 + $0x18] sm:$0xff]  ;;  %v593_v10 = vld [vmem:[%s920_s1 + $0x10] sm:$0xff] }
   0x4   :  { %v603_v7 = vld [vmem:[%s920_s1 + $0x60] sm:$0xff]  ;;  %v602_v9 = vld [vmem:[%s920_s1 + $0x58] sm:$0xff]  ;;  %v601_v11 = vld [vmem:[%s920_s1 + $0x50] sm:$0xff] }
   0x5   :  { %v592_v12 = vld [vmem:[%s920_s1 + $0x8] sm:$0xff]  ;;  %v591_v14 = vld [vmem:[%s920_s1] sm:$0xff]  ;;  %v457_v28 = vld [vmem:[%s922_s0 + $0x10] sm:$0xf] }
   0x6   :  { %246 = vmatpush.bf16.msra.mxu0 %v597_v2  ;;  %655 = vmatpush.bf16.msra.mxu2 %v597_v2  ;;  %v600_v13 = vld [vmem:[%s920_s1 + $0x48] sm:$0xff]  ;;  %v599_v15 = vld [vmem:[%s920_s1 + $0x40] sm:$0xff]  ;;  %v578_v29 = vld [vmem:[%s922_s0 + $0x14] sm:$0xf0] }
   0x7   :  { %295 = vmatpush.bf16.msra.mxu1 %v605_v3  ;;  %663 = vmatpush.bf16.msra.mxu3 %v605_v3  ;;  %v449_v16 = vld [vmem:[%s922_s0] sm:$0xf]  ;;  %v576_v17 = vld [vmem:[%s922_s0 + $0x4] sm:$0xf0]  ;;  %v575_v18 = vld [vmem:[%s922_s0 + $0x4] sm:$0xf]  ;;  %v458_v36 = vor.u32 %v578_v29, %v457_v28 }
   0x8   :  { %v451_v19 = vld [vmem:[%s922_s0 + $0x8] sm:$0xf0]  ;;  %v481_v20 = vld [vmem:[%s922_s0 + $0x40] sm:$0xf]  ;;  %v584_v21 = vld [vmem:[%s922_s0 + $0x44] sm:$0xf0]  ;;  %v450_v24 = vor.u32 %v576_v17, %v449_v16 }
   0x9   :  { %v583_v22 = vld [vmem:[%s922_s0 + $0x44] sm:$0xf]  ;;  %v483_v23 = vld [vmem:[%s922_s0 + $0x48] sm:$0xf0]  ;;  %v454_v25 = vor.u32 %v575_v18, %v451_v19  ;;  %v482_v26 = vor.u32 %v584_v21, %v481_v20  ;;  %v577_v30 = vld [vmem:[%s922_s0 + $0x14] sm:$0xf] }
   0xa   :  { %247 = vmatpush.bf16.msra.mxu0 %v596_v4  ;;  %656 = vmatpush.bf16.msra.mxu2 %v596_v4  ;;  %v486_v27 = vor.u32 %v583_v22, %v483_v23  ;;  %v459_v31 = vld [vmem:[%s922_s0 + $0x18] sm:$0xf0]  ;;  %v489_v32 = vld [vmem:[%s922_s0 + $0x50] sm:$0xf]  ;;  %v586_v33 = vld [vmem:[%s922_s0 + $0x54] sm:$0xf0] }
   0xb   :  { %296 = vmatpush.bf16.msra.mxu1 %v604_v5  ;;  %664 = vmatpush.bf16.msra.mxu3 %v604_v5  ;;  %v585_v34 = vld [vmem:[%s922_s0 + $0x54] sm:$0xf]  ;;  %v491_v35 = vld [vmem:[%s922_s0 + $0x58] sm:$0xf0]  ;;  %v462_v37 = vor.u32 %v577_v30, %v459_v31  ;;  %v490_v38 = vor.u32 %v586_v33, %v489_v32  ;;  %v465_v40 = vld [vmem:[%s922_s0 + $0x20] sm:$0xf] }
   0xc   :  { %v494_v39 = vor.u32 %v585_v34, %v491_v35  ;;  %v580_v41 = vld [vmem:[%s922_s0 + $0x24] sm:$0xf0]  ;;  %v579_v42 = vld [vmem:[%s922_s0 + $0x24] sm:$0xf]  ;;  %v467_v43 = vld [vmem:[%s922_s0 + $0x28] sm:$0xf0] }
   0xd   :  { %v497_v44 = vld [vmem:[%s922_s0 + $0x60] sm:$0xf]  ;;  %v588_v45 = vld [vmem:[%s922_s0 + $0x64] sm:$0xf0]  ;;  %v587_v46 = vld [vmem:[%s922_s0 + $0x64] sm:$0xf]  ;;  %v466_v48 = vor.u32 %v580_v41, %v465_v40  ;;  %v470_v49 = vor.u32 %v579_v42, %v467_v43 }
   0xe   :  { %248 = vmatpush.bf16.msra.mxu0 %v595_v6  ;;  %657 = vmatpush.bf16.msra.mxu2 %v595_v6  ;;  %v499_v47 = vld [vmem:[%s922_s0 + $0x68] sm:$0xf0]  ;;  %v498_v50 = vor.u32 %v588_v45, %v497_v44  ;;  %v473_v52 = vld [vmem:[%s922_s0 + $0x30] sm:$0xf]  ;;  %v582_v53 = vld [vmem:[%s922_s0 + $0x34] sm:$0xf0] }
   0xf   :  { %297 = vmatpush.bf16.msra.mxu1 %v603_v7  ;;  %665 = vmatpush.bf16.msra.mxu3 %v603_v7  ;;  %v502_v51 = vor.u32 %v587_v46, %v499_v47  ;;  %v581_v54 = vld [vmem:[%s922_s0 + $0x34] sm:$0xf]  ;;  %v475_v55 = vld [vmem:[%s922_s0 + $0x38] sm:$0xf0]  ;;  %v505_v56 = vld [vmem:[%s922_s0 + $0x70] sm:$0xf]  ;;  %v474_v60 = vor.u32 %v582_v53, %v473_v52 }
  0x10   :  { %v590_v57 = vld [vmem:[%s922_s0 + $0x74] sm:$0xf0]  ;;  %v589_v58 = vld [vmem:[%s922_s0 + $0x74] sm:$0xf]  ;;  %v507_v59 = vld [vmem:[%s922_s0 + $0x78] sm:$0xf0]  ;;  %v478_v61 = vor.u32 %v581_v54, %v475_v55 }
  0x11   :  { %v506_v62 = vor.u32 %v590_v57, %v505_v56  ;;  %v510_v63 = vor.u32 %v589_v58, %v507_v59  ;;  %v848_v2 = vld [vmem:[%s921_s2] ss:$0 sm:$0xff] }
  0x12   :  { %249 = vmatpush.bf16.msra.mxu0 %v594_v8  ;;  %658 = vmatpush.bf16.msra.mxu2 %v594_v8 }
  0x13   :  { %298 = vmatpush.bf16.msra.mxu1 %v602_v9  ;;  %666 = vmatpush.bf16.msra.mxu3 %v602_v9 }
  0x16   :  { %250 = vmatpush.bf16.msra.mxu0 %v593_v10  ;;  %659 = vmatpush.bf16.msra.mxu2 %v593_v10 }
  0x17   :  { %299 = vmatpush.bf16.msra.mxu1 %v601_v11  ;;  %667 = vmatpush.bf16.msra.mxu3 %v601_v11 }
  0x1a   :  { %251 = vmatpush.bf16.msra.mxu0 %v592_v12  ;;  %660 = vmatpush.bf16.msra.mxu2 %v592_v12 }
  0x1b   :  { %300 = vmatpush.bf16.msra.mxu1 %v600_v13  ;;  %668 = vmatpush.bf16.msra.mxu3 %v600_v13 }
  0x1e   :  { %252 = vmatpush.bf16.msra.mxu0 %v591_v14  ;;  %661 = vmatpush.bf16.msra.mxu2 %v591_v14 }
  0x1f   :  { %301 = vmatpush.bf16.msra.mxu1 %v599_v15  ;;  %669 = vmatpush.bf16.msra.mxu3 %v599_v15 }
  0x21   :  { %253 = vmatmul.bf16.vlgmr.msra.gmra.mxu0 %v450_v24  ;;  %273 = vmatmul.bf16.vlgmr.msra.gmra.mxu2 %v482_v26 }
  0x22   :  { %302 = vmatmul.bf16.vlgmr.msra.gmra.mxu1 %v454_v25  ;;  %322 = vmatmul.bf16.vlgmr.msra.gmra.mxu3 %v486_v27 }
  0x31   :  { %258 = vmatmul.bf16.gmra.mxu0 %v458_v36  ;;  %278 = vmatmul.bf16.gmra.mxu2 %v490_v38 }
  0x32   :  { %307 = vmatmul.bf16.gmra.mxu1 %v462_v37  ;;  %327 = vmatmul.bf16.gmra.mxu3 %v494_v39 }
  0x41   :  { %263 = vmatmul.bf16.gmra.mxu0 %v466_v48  ;;  %283 = vmatmul.bf16.gmra.mxu2 %v498_v50 }
  0x42   :  { %312 = vmatmul.bf16.gmra.mxu1 %v470_v49  ;;  %332 = vmatmul.bf16.gmra.mxu3 %v502_v51 }
  0x51   :  { %268 = vmatmul.bf16.gmra.mxu0 %v474_v60  ;;  %288 = vmatmul.bf16.gmra.mxu2 %v506_v62 }
  0x52   :  { %317 = vmatmul.bf16.gmra.mxu1 %v478_v61  ;;  %337 = vmatmul.bf16.gmra.mxu3 %v510_v63 }
  0x9e   :  { %v254_v0 = vpop.f32.mrf.mxu0 }
  0x9f   :  { %v303_v1 = vpop.f32.mrf.mxu1  ;;  %v255_v3 = vadd.f32 %v848_v2, %v254_v0 }
  0xa1   :  { %v304_v9 = vadd.f32 %v303_v1, %v255_v3 }
  0xa3   :  { %v365_v56 = vmul.f32 %v304_v9, %v304_v9 }
  0xa4   :  { %v274_v4 = vpop.f32.mrf.mxu2 }
  0xa5   :  { %v323_v5 = vpop.f32.mrf.mxu3  ;;  %v275_v11 = vadd.f32 %v848_v2, %v274_v4 }
  0xa6   :  { %v256_v6 = vpop.f32.mrf.mxu0 }
  0xa7   :  { %v305_v7 = vpop.f32.mrf.mxu1  ;;  %v257_v8 = vadd.f32 %v848_v2, %v256_v6  ;;  %v856_v15 = vadd.f32 %v323_v5, %v275_v11 }
  0xa9   :  { %v306_v10 = vadd.f32 %v305_v7, %v257_v8 }
  0xab   :  { %v610_v12 = vpack.c.bf16 %v306_v10, %v304_v9  ;;  %v366_v49 = vmul.f32 %v306_v10, %v306_v10  ;;  %v343_v57 = vadd.f32 %v306_v10, %v304_v9 }
  0xac   :  { %v276_v13 = vpop.f32.mrf.mxu2 }
  0xad   :  { %611 = vst [vmem:[%s923_s3] sm:$0xff] %v610_v12   ;;  %v325_v14 = vpop.f32.mrf.mxu3  ;;  %v277_v17 = vadd.f32 %v848_v2, %v276_v13  ;;  %v381_v61 = vadd.f32 %v366_v49, %v365_v56 }
  0xae   :  { %v259_v16 = vpop.f32.mrf.mxu0 }
  0xaf   :  { %v308_v18 = vpop.f32.mrf.mxu1  ;;  %v859_v19 = vadd.f32 %v325_v14, %v277_v17  ;;  %v260_v21 = vadd.f32 %v848_v2, %v259_v16 }
  0xb1   :  { %v630_v20 = vpack.c.bf16 %v859_v19, %v856_v15  ;;  %v309_v27 = vadd.f32 %v308_v18, %v260_v21 }
  0xb3   :  { %650 = vst [vmem:[%s923_s3 + $0x20] sm:$0xff] %v630_v20   ;;  %v367_v58 = vmul.f32 %v309_v27, %v309_v27  ;;  %v344_v62 = vadd.f32 %v343_v57, %v309_v27 }
  0xb4   :  { %v279_v22 = vpop.f32.mrf.mxu2 }
  0xb5   :  { %v328_v23 = vpop.f32.mrf.mxu3  ;;  %v280_v29 = vadd.f32 %v848_v2, %v279_v22  ;;  %v382_v1 = vadd.f32 %v381_v61, %v367_v58 }
  0xb6   :  { %v261_v24 = vpop.f32.mrf.mxu0 }
  0xb7   :  { %v310_v25 = vpop.f32.mrf.mxu1  ;;  %v262_v26 = vadd.f32 %v848_v2, %v261_v24  ;;  %v872_v33 = vadd.f32 %v328_v23, %v280_v29 }
  0xb9   :  { %v311_v28 = vadd.f32 %v310_v25, %v262_v26 }
  0xbb   :  { %v615_v30 = vpack.c.bf16 %v311_v28, %v309_v27  ;;  %v368_v63 = vmul.f32 %v311_v28, %v311_v28  ;;  %v345_v3 = vadd.f32 %v344_v62, %v311_v28  ;;  %v373_v27 = vmul.f32 %v856_v15, %v856_v15 }
  0xbc   :  { %v281_v31 = vpop.f32.mrf.mxu2 }
  0xbd   :  { %647 = vst [vmem:[%s923_s3 + $0x8] sm:$0xff] %v615_v30   ;;  %v330_v32 = vpop.f32.mrf.mxu3  ;;  %v282_v35 = vadd.f32 %v848_v2, %v281_v31  ;;  %v383_v6 = vadd.f32 %v382_v1, %v368_v63 }
  0xbe   :  { %v264_v34 = vpop.f32.mrf.mxu0 }
  0xbf   :  { %v313_v36 = vpop.f32.mrf.mxu1  ;;  %v875_v37 = vadd.f32 %v330_v32, %v282_v35  ;;  %v265_v39 = vadd.f32 %v848_v2, %v264_v34  ;;  %v374_v35 = vmul.f32 %v859_v19, %v859_v19 }
  0xc1   :  { %v635_v38 = vpack.c.bf16 %v875_v37, %v872_v33  ;;  %v314_v45 = vadd.f32 %v313_v36, %v265_v39 }
  0xc3   :  { %651 = vst [vmem:[%s923_s3 + $0x28] sm:$0xff] %v635_v38   ;;  %v369_v4 = vmul.f32 %v314_v45, %v314_v45  ;;  %v346_v7 = vadd.f32 %v345_v3, %v314_v45 }
  0xc4   :  { %v284_v40 = vpop.f32.mrf.mxu2 }
  0xc5   :  { %v333_v41 = vpop.f32.mrf.mxu3  ;;  %v285_v47 = vadd.f32 %v848_v2, %v284_v40  ;;  %v384_v12 = vadd.f32 %v383_v6, %v369_v4 }
  0xc6   :  { %v266_v42 = vpop.f32.mrf.mxu0 }
  0xc7   :  { %v315_v43 = vpop.f32.mrf.mxu1  ;;  %v267_v44 = vadd.f32 %v848_v2, %v266_v42  ;;  %v334_v52 = vadd.f32 %v333_v41, %v285_v47 }
  0xc9   :  { %v316_v46 = vadd.f32 %v315_v43, %v267_v44  ;;  %v376_v43 = vmul.f32 %v875_v37, %v875_v37 }
  0xcb   :  { %v620_v48 = vpack.c.bf16 %v316_v46, %v314_v45  ;;  %v370_v8 = vmul.f32 %v316_v46, %v316_v46  ;;  %v347_v13 = vadd.f32 %v346_v7, %v316_v46 }
  0xcc   :  { %v286_v50 = vpop.f32.mrf.mxu2 }
  0xcd   :  { %648 = vst [vmem:[%s923_s3 + $0x10] sm:$0xff] %v620_v48   ;;  %v335_v51 = vpop.f32.mrf.mxu3  ;;  %v287_v54 = vadd.f32 %v848_v2, %v286_v50  ;;  %v385_v18 = vadd.f32 %v384_v12, %v370_v8 }
  0xce   :  { %v269_v53 = vpop.f32.mrf.mxu0 }
  0xcf   :  { %v318_v55 = vpop.f32.mrf.mxu1  ;;  %v270_v59 = vadd.f32 %v848_v2, %v269_v53  ;;  %v336_v60 = vadd.f32 %v335_v51, %v287_v54 }
  0xd1   :  { %v640_v0 = vpack.c.bf16 %v336_v60, %v334_v52  ;;  %v319_v5 = vadd.f32 %v318_v55, %v270_v59  ;;  %v378_v47 = vmul.f32 %v336_v60, %v336_v60 }
  0xd3   :  { %652 = vst [vmem:[%s923_s3 + $0x30] sm:$0xff] %v640_v0   ;;  %v371_v14 = vmul.f32 %v319_v5, %v319_v5  ;;  %v348_v20 = vadd.f32 %v347_v13, %v319_v5 }
  0xd4   :  { %v289_v9 = vpop.f32.mrf.mxu2 }
  0xd5   :  { %v338_v10 = vpop.f32.mrf.mxu3  ;;  %v290_v22 = vadd.f32 %v848_v2, %v289_v9  ;;  %v386_v23 = vadd.f32 %v385_v18, %v371_v14 }
  0xd6   :  { %v271_v11 = vpop.f32.mrf.mxu0 }
  0xd7   :  { %v272_v16 = vadd.f32 %v848_v2, %v271_v11  ;;  %v320_v17 = vpop.f32.mrf.mxu1  ;;  %v339_v32 = vadd.f32 %v338_v10, %v290_v22 }
  0xd9   :  { %v321_v21 = vadd.f32 %v320_v17, %v272_v16 }
  0xdb   :  { %v349_v24 = vadd.f32 %v348_v20, %v321_v21  ;;  %v372_v25 = vmul.f32 %v321_v21, %v321_v21  ;;  %v625_v26 = vpack.c.bf16 %v321_v21, %v319_v5 }
  0xdc   :  { %v291_v30 = vpop.f32.mrf.mxu2 }
  0xdd   :  { %v350_v28 = vadd.f32 %v349_v24, %v856_v15  ;;  %v387_v29 = vadd.f32 %v386_v23, %v372_v25  ;;  %649 = vst [vmem:[%s923_s3 + $0x18] sm:$0xff] %v625_v26   ;;  %v340_v31 = vpop.f32.mrf.mxu3  ;;  %v292_v34 = vadd.f32 %v848_v2, %v291_v30  ;;  %v375_v15 = vmul.f32 %v872_v33, %v872_v33 }
  0xdf   :  { %v351_v36 = vadd.f32 %v350_v28, %v859_v19  ;;  %v388_v38 = vadd.f32 %v387_v29, %v373_v27  ;;  %v341_v39 = vadd.f32 %v340_v31, %v292_v34  ;;  %v377_v19 = vmul.f32 %v334_v52, %v334_v52 }
  0xe1   :  { %v352_v40 = vadd.f32 %v351_v36, %v872_v33  ;;  %v389_v41 = vadd.f32 %v388_v38, %v374_v35  ;;  %v645_v42 = vpack.c.bf16 %v341_v39, %v339_v32  ;;  %v379_v33 = vmul.f32 %v339_v32, %v339_v32 }
  0xe2   :  { %v380_v55 = vmul.f32 %v341_v39, %v341_v39 }
  0xe3   :  { %v390_v44 = vadd.f32 %v389_v41, %v375_v15  ;;  %v353_v2 = vadd.f32 %v352_v40, %v875_v37  ;;  %653 = vst [vmem:[%s923_s3 + $0x38] sm:$0xff] %v645_v42  }
  0xe5   :  { %v354_v45 = vadd.f32 %v353_v2, %v334_v52  ;;  %v391_v46 = vadd.f32 %v390_v44, %v376_v43 }
  0xe7   :  { %v355_v48 = vadd.f32 %v354_v45, %v336_v60  ;;  %v392_v49 = vadd.f32 %v391_v46, %v377_v19 }
  0xe9   :  { %v356_v50 = vadd.f32 %v355_v48, %v339_v32  ;;  %v393_v51 = vadd.f32 %v392_v49, %v378_v47 }
  0xeb   :  { %v394_v53 = vadd.f32 %v393_v51, %v379_v33  ;;  %v357_v54 = vadd.f32 %v356_v50, %v341_v39 }
  0xed   :  { %v358_v56 = vrot.slane %v357_v54, 4  ;;  %v395_v57 = vadd.f32 %v394_v53, %v380_v55 }
  0xef   :  { %v359_v58 = vadd.f32 %v358_v56, %v357_v54  ;;  %v396_v37 = vrot.slane %v395_v57, 4 }
  0xf1   :  { %v360_v59 = vrot.slane %v359_v58, 2  ;;  %v397_v61 = vadd.f32 %v396_v37, %v395_v57 }
  0xf3   :  { %v361_v62 = vadd.f32 %v360_v59, %v359_v58  ;;  %v398_v63 = vrot.slane %v397_v61, 2 }
  0xf5   :  { %v362_v0 = vrot.slane %v361_v62, 1  ;;  %v399_v52 = vadd.f32 %v398_v63, %v397_v61 }
  0xf7   :  { %v363_v1 = vadd.f32 %v362_v0, %v361_v62  ;;  %v400_v3 = vrot.slane %v399_v52, 1 }
  0xf9   :  { %364 = vst [vmem:[%s924_s4] sm:$0x1] %v363_v1  ;;  %v401_v60 = vadd.f32 %v400_v3, %v399_v52 }
  0xfb   :  { %402 = vst [vmem:[%s925_s5] sm:$0x1] %v401_v60 }

// kernel: discriminator_forward.13
= control target key start
LH: loop header
LB: loop body
LE: loop exit
PB: predicated region body
PF: predicated region fallthrough
CT: control target
= control target key end

     0   :  { %s846_s1 = inlined_call_operand.vmem [shape: bf16[512,128], index: 1, kind: input, shape index: {}]   ;;  %s847_s2 = inlined_call_operand.vmem [shape: f32[1,128], index: 2, kind: input, shape index: {}]   ;;  %s848_s0 = inlined_call_operand.vmem [shape: bf16[32,512], index: 0, kind: input, shape index: {}]   ;;  %s849_s3 = inlined_call_operand.vmem [shape: bf16[32,128], index: 3, kind: output, shape index: {0}]   ;;  %s850_s4 = inlined_call_operand.vmem [shape: f32[1,1,128], index: 4, kind: output, shape index: {1}]   ;;  %s851_s5 = inlined_call_operand.vmem [shape: f32[1,1,128], index: 5, kind: output, shape index: {2}]  }
   0x1   :  { %v620_v0 = vld [vmem:[%s846_s1 + $0x38] sm:$0xff]  ;;  %v619_v4 = vld [vmem:[%s846_s1 + $0x30] sm:$0xff]  ;;  %v618_v8 = vld [vmem:[%s846_s1 + $0x28] sm:$0xff] }
   0x2   :  { %v628_v1 = vld [vmem:[%s846_s1 + $0x78] sm:$0xff]  ;;  %325 = vmatpush.bf16.msra.mxu0 %v620_v0  ;;  %v627_v5 = vld [vmem:[%s846_s1 + $0x70] sm:$0xff]  ;;  %v626_v9 = vld [vmem:[%s846_s1 + $0x68] sm:$0xff] }
   0x3   :  { %v636_v2 = vld [vmem:[%s846_s1 + $0xb8] sm:$0xff]  ;;  %344 = vmatpush.bf16.msra.mxu1 %v628_v1  ;;  %v635_v6 = vld [vmem:[%s846_s1 + $0xb0] sm:$0xff]  ;;  %v634_v10 = vld [vmem:[%s846_s1 + $0xa8] sm:$0xff] }
   0x4   :  { %v644_v3 = vld [vmem:[%s846_s1 + $0xf8] sm:$0xff]  ;;  %363 = vmatpush.bf16.msra.mxu2 %v636_v2  ;;  %v643_v7 = vld [vmem:[%s846_s1 + $0xf0] sm:$0xff]  ;;  %v642_v11 = vld [vmem:[%s846_s1 + $0xe8] sm:$0xff] }
   0x5   :  { %382 = vmatpush.bf16.msra.mxu3 %v644_v3  ;;  %v617_v12 = vld [vmem:[%s846_s1 + $0x20] sm:$0xff]  ;;  %v616_v16 = vld [vmem:[%s846_s1 + $0x18] sm:$0xff]  ;;  %v615_v20 = vld [vmem:[%s846_s1 + $0x10] sm:$0xff] }
   0x6   :  { %326 = vmatpush.bf16.msra.mxu0 %v619_v4  ;;  %v625_v13 = vld [vmem:[%s846_s1 + $0x60] sm:$0xff]  ;;  %v624_v17 = vld [vmem:[%s846_s1 + $0x58] sm:$0xff]  ;;  %v623_v21 = vld [vmem:[%s846_s1 + $0x50] sm:$0xff] }
   0x7   :  { %345 = vmatpush.bf16.msra.mxu1 %v627_v5  ;;  %v633_v14 = vld [vmem:[%s846_s1 + $0xa0] sm:$0xff]  ;;  %v632_v18 = vld [vmem:[%s846_s1 + $0x98] sm:$0xff]  ;;  %v631_v22 = vld [vmem:[%s846_s1 + $0x90] sm:$0xff] }
   0x8   :  { %364 = vmatpush.bf16.msra.mxu2 %v635_v6  ;;  %v641_v15 = vld [vmem:[%s846_s1 + $0xe0] sm:$0xff]  ;;  %v640_v19 = vld [vmem:[%s846_s1 + $0xd8] sm:$0xff]  ;;  %v639_v23 = vld [vmem:[%s846_s1 + $0xd0] sm:$0xff] }
   0x9   :  { %383 = vmatpush.bf16.msra.mxu3 %v643_v7  ;;  %v614_v24 = vld [vmem:[%s846_s1 + $0x8] sm:$0xff]  ;;  %v613_v28 = vld [vmem:[%s846_s1] sm:$0xff]  ;;  %v607_v33 = vld [vmem:[%s848_s0 + $0xc] sm:$0xf0] }
   0xa   :  { %327 = vmatpush.bf16.msra.mxu0 %v618_v8  ;;  %v622_v25 = vld [vmem:[%s846_s1 + $0x48] sm:$0xff]  ;;  %v621_v29 = vld [vmem:[%s846_s1 + $0x40] sm:$0xff]  ;;  %v449_v35 = vld [vmem:[%s848_s0 + $0x10] sm:$0xf0] }
   0xb   :  { %346 = vmatpush.bf16.msra.mxu1 %v626_v9  ;;  %v630_v26 = vld [vmem:[%s846_s1 + $0x88] sm:$0xff]  ;;  %v629_v30 = vld [vmem:[%s846_s1 + $0x80] sm:$0xff]  ;;  %v608_v37 = vld [vmem:[%s848_s0 + $0x14] sm:$0xf0] }
   0xc   :  { %365 = vmatpush.bf16.msra.mxu2 %v634_v10  ;;  %v638_v27 = vld [vmem:[%s846_s1 + $0xc8] sm:$0xff]  ;;  %v637_v31 = vld [vmem:[%s846_s1 + $0xc0] sm:$0xff]  ;;  %v457_v39 = vld [vmem:[%s848_s0 + $0x18] sm:$0xf0] }
   0xd   :  { %384 = vmatpush.bf16.msra.mxu3 %v642_v11  ;;  %v447_v32 = vld [vmem:[%s848_s0] sm:$0xf]  ;;  %v605_v34 = vld [vmem:[%s848_s0 + $0x4] sm:$0xf]  ;;  %v455_v36 = vld [vmem:[%s848_s0 + $0x8] sm:$0xf] }
   0xe   :  { %328 = vmatpush.bf16.msra.mxu0 %v617_v12  ;;  %v606_v38 = vld [vmem:[%s848_s0 + $0xc] sm:$0xf]  ;;  %v448_v40 = vor.u32 %v607_v33, %v447_v32  ;;  %v452_v41 = vor.u32 %v605_v34, %v449_v35  ;;  %v456_v42 = vor.u32 %v608_v37, %v455_v36  ;;  %v463_v44 = vld [vmem:[%s848_s0 + $0x20] sm:$0xf]  ;;  %v611_v45 = vld [vmem:[%s848_s0 + $0x2c] sm:$0xf0] }
   0xf   :  { %347 = vmatpush.bf16.msra.mxu1 %v625_v13  ;;  %v460_v43 = vor.u32 %v606_v38, %v457_v39  ;;  %v609_v46 = vld [vmem:[%s848_s0 + $0x24] sm:$0xf]  ;;  %v465_v47 = vld [vmem:[%s848_s0 + $0x30] sm:$0xf0]  ;;  %v471_v48 = vld [vmem:[%s848_s0 + $0x28] sm:$0xf]  ;;  %v464_v52 = vor.u32 %v611_v45, %v463_v44 }
  0x10   :  { %366 = vmatpush.bf16.msra.mxu2 %v633_v14  ;;  %v612_v49 = vld [vmem:[%s848_s0 + $0x34] sm:$0xf0]  ;;  %v610_v50 = vld [vmem:[%s848_s0 + $0x2c] sm:$0xf]  ;;  %v473_v51 = vld [vmem:[%s848_s0 + $0x38] sm:$0xf0]  ;;  %v468_v53 = vor.u32 %v609_v46, %v465_v47 }
  0x11   :  { %385 = vmatpush.bf16.msra.mxu3 %v641_v15  ;;  %v472_v54 = vor.u32 %v612_v49, %v471_v48  ;;  %v476_v55 = vor.u32 %v610_v50, %v473_v51  ;;  %v656_v58 = vld [vmem:[%s847_s2] ss:$0 sm:$0xff] }
  0x12   :  { %329 = vmatpush.bf16.msra.mxu0 %v616_v16 }
  0x13   :  { %348 = vmatpush.bf16.msra.mxu1 %v624_v17 }
  0x14   :  { %367 = vmatpush.bf16.msra.mxu2 %v632_v18 }
  0x15   :  { %386 = vmatpush.bf16.msra.mxu3 %v640_v19 }
  0x16   :  { %330 = vmatpush.bf16.msra.mxu0 %v615_v20 }
  0x17   :  { %349 = vmatpush.bf16.msra.mxu1 %v623_v21 }
  0x18   :  { %368 = vmatpush.bf16.msra.mxu2 %v631_v22 }
  0x19   :  { %387 = vmatpush.bf16.msra.mxu3 %v639_v23 }
  0x1a   :  { %331 = vmatpush.bf16.msra.mxu0 %v614_v24 }
  0x1b   :  { %350 = vmatpush.bf16.msra.mxu1 %v622_v25 }
  0x1c   :  { %369 = vmatpush.bf16.msra.mxu2 %v630_v26 }
  0x1d   :  { %388 = vmatpush.bf16.msra.mxu3 %v638_v27 }
  0x1e   :  { %332 = vmatpush.bf16.msra.mxu0 %v613_v28 }
  0x1f   :  { %351 = vmatpush.bf16.msra.mxu1 %v621_v29 }
  0x20   :  { %370 = vmatpush.bf16.msra.mxu2 %v629_v30 }
  0x21   :  { %389 = vmatpush.bf16.msra.mxu3 %v637_v31  ;;  %333 = vmatmul.bf16.vlgmr.msra.gmra.mxu0 %v448_v40 }
  0x22   :  { %352 = vmatmul.bf16.vlgmr.msra.gmra.mxu1 %v452_v41 }
  0x23   :  { %371 = vmatmul.bf16.vlgmr.msra.gmra.mxu2 %v456_v42 }
  0x24   :  { %390 = vmatmul.bf16.vlgmr.msra.gmra.mxu3 %v460_v43 }
  0x31   :  { %338 = vmatmul.bf16.gmra.mxu0 %v464_v52 }
  0x32   :  { %357 = vmatmul.bf16.gmra.mxu1 %v468_v53 }
  0x33   :  { %376 = vmatmul.bf16.gmra.mxu2 %v472_v54 }
  0x34   :  { %395 = vmatmul.bf16.gmra.mxu3 %v476_v55 }
  0x9e   :  { %v334_v56 = vpop.f32.mrf.mxu0 }
  0x9f   :  { %v353_v57 = vpop.f32.mrf.mxu1  ;;  %v335_v59 = vadd.f32 %v656_v58, %v334_v56 }
  0xa1   :  { %v354_v0 = vadd.f32 %v353_v57, %v335_v59 }
  0xa6   :  { %v372_v60 = vpop.f32.mrf.mxu2  ;;  %v336_v62 = vpop.f32.mrf.mxu0 }
  0xa7   :  { %v391_v61 = vpop.f32.mrf.mxu3  ;;  %v355_v63 = vpop.f32.mrf.mxu1  ;;  %v337_v1 = vadd.f32 %v656_v58, %v336_v62  ;;  %v373_v2 = vadd.f32 %v372_v60, %v354_v0 }
  0xa9   :  { %v356_v3 = vadd.f32 %v355_v63, %v337_v1  ;;  %v392_v9 = vadd.f32 %v391_v61, %v373_v2 }
  0xab   :  { %v411_v24 = vmul.f32 %v392_v9, %v392_v9 }
  0xae   :  { %v374_v4 = vpop.f32.mrf.mxu2  ;;  %v339_v7 = vpop.f32.mrf.mxu0 }
  0xaf   :  { %v393_v5 = vpop.f32.mrf.mxu3  ;;  %v375_v6 = vadd.f32 %v374_v4, %v356_v3  ;;  %v340_v8 = vadd.f32 %v656_v58, %v339_v7  ;;  %v358_v11 = vpop.f32.mrf.mxu1 }
  0xb1   :  { %v394_v10 = vadd.f32 %v393_v5, %v375_v6  ;;  %v359_v13 = vadd.f32 %v358_v11, %v340_v8 }
  0xb3   :  { %v648_v12 = vpack.c.bf16 %v394_v10, %v392_v9  ;;  %v412_v21 = vmul.f32 %v394_v10, %v394_v10  ;;  %v401_v25 = vadd.f32 %v394_v10, %v392_v9 }
  0xb5   :  { %649 = vst [vmem:[%s849_s3] sm:$0xff] %v648_v12   ;;  %v415_v29 = vadd.f32 %v412_v21, %v411_v24 }
  0xb6   :  { %v377_v14 = vpop.f32.mrf.mxu2  ;;  %v341_v17 = vpop.f32.mrf.mxu0 }
  0xb7   :  { %v396_v15 = vpop.f32.mrf.mxu3  ;;  %v378_v16 = vadd.f32 %v377_v14, %v359_v13  ;;  %v342_v18 = vadd.f32 %v656_v58, %v341_v17  ;;  %v360_v20 = vpop.f32.mrf.mxu1 }
  0xb9   :  { %v397_v19 = vadd.f32 %v396_v15, %v378_v16  ;;  %v361_v22 = vadd.f32 %v360_v20, %v342_v18 }
  0xbb   :  { %v413_v26 = vmul.f32 %v397_v19, %v397_v19  ;;  %v402_v30 = vadd.f32 %v401_v25, %v397_v19 }
  0xbd   :  { %v416_v32 = vadd.f32 %v415_v29, %v413_v26 }
  0xbe   :  { %v379_v23 = vpop.f32.mrf.mxu2 }
  0xbf   :  { %v380_v27 = vadd.f32 %v379_v23, %v361_v22  ;;  %v398_v28 = vpop.f32.mrf.mxu3 }
  0xc1   :  { %v399_v31 = vadd.f32 %v398_v28, %v380_v27 }
  0xc3   :  { %v403_v33 = vadd.f32 %v402_v30, %v399_v31  ;;  %v414_v34 = vmul.f32 %v399_v31, %v399_v31  ;;  %v653_v35 = vpack.c.bf16 %v399_v31, %v397_v19 }
  0xc5   :  { %v404_v36 = vrot.slane %v403_v33, 4  ;;  %v417_v37 = vadd.f32 %v416_v32, %v414_v34  ;;  %655 = vst [vmem:[%s849_s3 + $0x8] sm:$0xff] %v653_v35  }
  0xc7   :  { %v405_v38 = vadd.f32 %v404_v36, %v403_v33  ;;  %v418_v39 = vrot.slane %v417_v37, 4 }
  0xc9   :  { %v406_v40 = vrot.slane %v405_v38, 2  ;;  %v419_v41 = vadd.f32 %v418_v39, %v417_v37 }
  0xcb   :  { %v407_v42 = vadd.f32 %v406_v40, %v405_v38  ;;  %v420_v43 = vrot.slane %v419_v41, 2 }
  0xcd   :  { %v408_v44 = vrot.slane %v407_v42, 1  ;;  %v421_v45 = vadd.f32 %v420_v43, %v419_v41 }
  0xcf   :  { %v409_v46 = vadd.f32 %v408_v44, %v407_v42  ;;  %v422_v47 = vrot.slane %v421_v45, 1 }
  0xd1   :  { %410 = vst [vmem:[%s850_s4] sm:$0x1] %v409_v46  ;;  %v423_v48 = vadd.f32 %v422_v47, %v421_v45 }
  0xd3   :  { %424 = vst [vmem:[%s851_s5] sm:$0x1] %v423_v48 }

// kernel: discriminator_forward.14
= control target key start
LH: loop header
LB: loop body
LE: loop exit
PB: predicated region body
PF: predicated region fallthrough
CT: control target
= control target key end

     0   :  { %s118_s0 = inlined_call_operand.vmem [shape: bf16[32,128], index: 0, kind: input, shape index: {}]   ;;  %s119_s1 = inlined_call_operand.vmem [shape: f32[1,128], index: 1, kind: input, shape index: {}]   ;;  %s120_s2 = inlined_call_operand.vmem [shape: f32[1,128], index: 2, kind: input, shape index: {}]   ;;  %s121_s3 = inlined_call_operand.vmem [shape: bf16[32,128], index: 3, kind: output, shape index: {}]  }
   0x1   :  { %v59_v0 = vld [vmem:[%s118_s0] sm:$0xff]   ;;  %v76_v5 = vld [vmem:[%s118_s0 + $0x8] sm:$0xff]  }
   0x2   :  { %v78_v1 = vld [vmem:[%s119_s1] ss:$0 sm:$0xff]  ;;  %v60_v2 = vunpack.c.l.bf16 %v59_v0  ;;  %v61_v3 = vunpack.c.h.bf16 %v59_v0  ;;  %v64_v6 = vunpack.c.l.bf16 %v76_v5  ;;  %v65_v7 = vunpack.c.h.bf16 %v76_v5 }
   0x3   :  { %v79_v4 = vld [vmem:[%s120_s2] ss:$0 sm:$0xff] }
   0x4   :  { %v26_v8 = vmul.f32 %v78_v1, %v60_v2  ;;  %v27_v9 = vmul.f32 %v78_v1, %v61_v3  ;;  %v28_v10 = vmul.f32 %v78_v1, %v64_v6  ;;  %v29_v11 = vmul.f32 %v78_v1, %v65_v7 }
   0x6   :  { %v34_v12 = vadd.f32 %v79_v4, %v26_v8  ;;  %v35_v13 = vadd.f32 %v79_v4, %v27_v9  ;;  %v36_v14 = vadd.f32 %v79_v4, %v28_v10  ;;  %v37_v15 = vadd.f32 %v79_v4, %v29_v11 }
   0x8   :  { %v38_v16 = vmul.f32 0.2, %v34_v12  ;;  %v39_v17 = vmul.f32 0.2, %v35_v13  ;;  %v40_v18 = vmul.f32 0.2, %v36_v14 }
   0x9   :  { %v41_v19 = vmul.f32 0.2, %v37_v15 }
   0xa   :  { %v42_v20 = vmax.f32 %v34_v12, %v38_v16  ;;  %v43_v21 = vmax.f32 %v35_v13, %v39_v17  ;;  %v44_v22 = vmax.f32 %v36_v14, %v40_v18 }
   0xb   :  { %v45_v23 = vmax.f32 %v37_v15, %v41_v19 }
   0xc   :  { %v69_v24 = vpack.c.bf16 %v43_v21, %v42_v20 }
   0xd   :  { %v74_v25 = vpack.c.bf16 %v45_v23, %v44_v22 }
   0xe   :  { %70 = vst [vmem:[%s121_s3] sm:$0xff] %v69_v24  }
   0xf   :  { %77 = vst [vmem:[%s121_s3 + $0x8] sm:$0xff] %v74_v25  }

// kernel: discriminator_forward.15
= control target key start
LH: loop header
LB: loop body
LE: loop exit
PB: predicated region body
PF: predicated region fallthrough
CT: control target
= control target key end

     0   :  { %s1413_s1 = inlined_call_operand.vmem [shape: bf16[1024,128], index: 1, kind: input, shape index: {}]   ;;  %s1414_s2 = inlined_call_operand.vmem [shape: f32[1,128], index: 2, kind: input, shape index: {}]   ;;  %s1415_s0 = inlined_call_operand.vmem [shape: bf16[8,1024], index: 0, kind: input, shape index: {}]   ;;  %s1416_s4 = inlined_call_operand.vmem [shape: f32[1,128], index: 4, kind: input, shape index: {}]   ;;  %s1417_s3 = inlined_call_operand.vmem [shape: bf16[128,128], index: 3, kind: input, shape index: {}]   ;;  %s1418_s5 = inlined_call_operand.vmem [shape: f32[8,128], index: 5, kind: output, shape index: {}]  }
   0x1   :  { %v1075_v0 = vld [vmem:[%s1413_s1 + $0x38] sm:$0xff]  ;;  %v1074_v4 = vld [vmem:[%s1413_s1 + $0x30] sm:$0xff]  ;;  %v1073_v8 = vld [vmem:[%s1413_s1 + $0x28] sm:$0xff] }
   0x2   :  { %v1083_v1 = vld [vmem:[%s1413_s1 + $0x78] sm:$0xff]  ;;  %568 = vmatpush.bf16.msra.mxu0 %v1075_v0  ;;  %v1082_v5 = vld [vmem:[%s1413_s1 + $0x70] sm:$0xff]  ;;  %v1081_v9 = vld [vmem:[%s1413_s1 + $0x68] sm:$0xff] }
   0x3   :  { %v1091_v2 = vld [vmem:[%s1413_s1 + $0xb8] sm:$0xff]  ;;  %581 = vmatpush.bf16.msra.mxu1 %v1083_v1  ;;  %v1090_v6 = vld [vmem:[%s1413_s1 + $0xb0] sm:$0xff]  ;;  %v1089_v10 = vld [vmem:[%s1413_s1 + $0xa8] sm:$0xff] }
   0x4   :  { %v1099_v3 = vld [vmem:[%s1413_s1 + $0xf8] sm:$0xff]  ;;  %594 = vmatpush.bf16.msra.mxu2 %v1091_v2  ;;  %v1098_v7 = vld [vmem:[%s1413_s1 + $0xf0] sm:$0xff]  ;;  %v1097_v11 = vld [vmem:[%s1413_s1 + $0xe8] sm:$0xff] }
   0x5   :  { %607 = vmatpush.bf16.msra.mxu3 %v1099_v3  ;;  %v1072_v12 = vld [vmem:[%s1413_s1 + $0x20] sm:$0xff]  ;;  %v1071_v16 = vld [vmem:[%s1413_s1 + $0x18] sm:$0xff]  ;;  %v1070_v20 = vld [vmem:[%s1413_s1 + $0x10] sm:$0xff] }
   0x6   :  { %569 = vmatpush.bf16.msra.mxu0 %v1074_v4  ;;  %v1080_v13 = vld [vmem:[%s1413_s1 + $0x60] sm:$0xff]  ;;  %v1079_v17 = vld [vmem:[%s1413_s1 + $0x58] sm:$0xff]  ;;  %v1078_v21 = vld [vmem:[%s1413_s1 + $0x50] sm:$0xff] }
   0x7   :  { %582 = vmatpush.bf16.msra.mxu1 %v1082_v5  ;;  %v1088_v14 = vld [vmem:[%s1413_s1 + $0xa0] sm:$0xff]  ;;  %v1087_v18 = vld [vmem:[%s1413_s1 + $0x98] sm:$0xff]  ;;  %v1086_v22 = vld [vmem:[%s1413_s1 + $0x90] sm:$0xff] }
   0x8   :  { %595 = vmatpush.bf16.msra.mxu2 %v1090_v6  ;;  %v1096_v15 = vld [vmem:[%s1413_s1 + $0xe0] sm:$0xff]  ;;  %v1095_v19 = vld [vmem:[%s1413_s1 + $0xd8] sm:$0xff]  ;;  %v1094_v23 = vld [vmem:[%s1413_s1 + $0xd0] sm:$0xff] }
   0x9   :  { %608 = vmatpush.bf16.msra.mxu3 %v1098_v7  ;;  %v1069_v24 = vld [vmem:[%s1413_s1 + $0x8] sm:$0xff]  ;;  %v20_v29 = vld [vmem:[%s1415_s0] sm:$0xff]  ;;  %v1107_v38 = vld [vmem:[%s1413_s1 + $0x138] sm:$0xff] }
   0xa   :  { %570 = vmatpush.bf16.msra.mxu0 %v1073_v8  ;;  %v1077_v25 = vld [vmem:[%s1413_s1 + $0x48] sm:$0xff]  ;;  %v1068_v30 = vld [vmem:[%s1413_s1] sm:$0xff]  ;;  %v160_v33 = vunpack.c.l.b16 %v20_v29  ;;  %v161_v37 = vunpack.c.h.b16 %v20_v29  ;;  %v1115_v39 = vld [vmem:[%s1413_s1 + $0x178] sm:$0xff] }
   0xb   :  { %583 = vmatpush.bf16.msra.mxu1 %v1081_v9  ;;  %v1085_v26 = vld [vmem:[%s1413_s1 + $0x88] sm:$0xff]  ;;  %v1076_v31 = vld [vmem:[%s1413_s1 + $0x40] sm:$0xff]  ;;  %v1123_v40 = vld [vmem:[%s1413_s1 + $0x1b8] sm:$0xff] }
   0xc   :  { %596 = vmatpush.bf16.msra.mxu2 %v1089_v10  ;;  %v1093_v27 = vld [vmem:[%s1413_s1 + $0xc8] sm:$0xff]  ;;  %v1084_v34 = vld [vmem:[%s1413_s1 + $0x80] sm:$0xff]  ;;  %v1131_v41 = vld [vmem:[%s1413_s1 + $0x1f8] sm:$0xff]  ;;  %v168_v43 = vpack.c.b16 %v160_v33, %v160_v33  ;;  %v169_v45 = vpack.c.b16 %v161_v37, %v161_v37 }
   0xd   :  { %609 = vmatpush.bf16.msra.mxu3 %v1097_v11  ;;  %v21_v28 = vld [vmem:[%s1415_s0 + $0x8] sm:$0xff]  ;;  %v1092_v35 = vld [vmem:[%s1413_s1 + $0xc0] sm:$0xff]  ;;  %v1106_v46 = vld [vmem:[%s1413_s1 + $0x130] sm:$0xff] }
   0xe   :  { %571 = vmatpush.bf16.msra.mxu0 %v1072_v12  ;;  %v162_v32 = vunpack.c.l.b16 %v21_v28  ;;  %v163_v36 = vunpack.c.h.b16 %v21_v28  ;;  %v1114_v47 = vld [vmem:[%s1413_s1 + $0x170] sm:$0xff]  ;;  %v1105_v50 = vld [vmem:[%s1413_s1 + $0x128] sm:$0xff]  ;;  %v1104_v54 = vld [vmem:[%s1413_s1 + $0x120] sm:$0xff] }
   0xf   :  { %584 = vmatpush.bf16.msra.mxu1 %v1080_v13  ;;  %v1122_v48 = vld [vmem:[%s1413_s1 + $0x1b0] sm:$0xff]  ;;  %v1113_v51 = vld [vmem:[%s1413_s1 + $0x168] sm:$0xff]  ;;  %v1112_v55 = vld [vmem:[%s1413_s1 + $0x160] sm:$0xff] }
  0x10   :  { %597 = vmatpush.bf16.msra.mxu2 %v1088_v14  ;;  %v170_v42 = vpack.c.b16 %v162_v32, %v162_v32  ;;  %v171_v44 = vpack.c.b16 %v163_v36, %v163_v36  ;;  %v1130_v49 = vld [vmem:[%s1413_s1 + $0x1f0] sm:$0xff]  ;;  %v1121_v52 = vld [vmem:[%s1413_s1 + $0x1a8] sm:$0xff]  ;;  %v1120_v56 = vld [vmem:[%s1413_s1 + $0x1a0] sm:$0xff] }
  0x11   :  { %610 = vmatpush.bf16.msra.mxu3 %v1096_v15  ;;  %v1129_v53 = vld [vmem:[%s1413_s1 + $0x1e8] sm:$0xff]  ;;  %v1128_v57 = vld [vmem:[%s1413_s1 + $0x1e0] sm:$0xff]  ;;  %v1103_v58 = vld [vmem:[%s1413_s1 + $0x118] sm:$0xff] }
  0x12   :  { %572 = vmatpush.bf16.msra.mxu0 %v1071_v16  ;;  %v1111_v59 = vld [vmem:[%s1413_s1 + $0x158] sm:$0xff]  ;;  %v1102_v62 = vld [vmem:[%s1413_s1 + $0x110] sm:$0xff]  ;;  %v1101_v2 = vld [vmem:[%s1413_s1 + $0x108] sm:$0xff] }
  0x13   :  { %585 = vmatpush.bf16.msra.mxu1 %v1079_v17  ;;  %v1119_v60 = vld [vmem:[%s1413_s1 + $0x198] sm:$0xff]  ;;  %v1110_v63 = vld [vmem:[%s1413_s1 + $0x150] sm:$0xff]  ;;  %v1109_v3 = vld [vmem:[%s1413_s1 + $0x148] sm:$0xff] }
  0x14   :  { %598 = vmatpush.bf16.msra.mxu2 %v1087_v18  ;;  %v1127_v61 = vld [vmem:[%s1413_s1 + $0x1d8] sm:$0xff]  ;;  %v1118_v0 = vld [vmem:[%s1413_s1 + $0x190] sm:$0xff]  ;;  %v1117_v5 = vld [vmem:[%s1413_s1 + $0x188] sm:$0xff] }
  0x15   :  { %611 = vmatpush.bf16.msra.mxu3 %v1095_v19  ;;  %v1126_v1 = vld [vmem:[%s1413_s1 + $0x1d0] sm:$0xff]  ;;  %v1125_v6 = vld [vmem:[%s1413_s1 + $0x1c8] sm:$0xff]  ;;  %v23_v7 = vld [vmem:[%s1415_s0 + $0x18] sm:$0xff] }
  0x16   :  { %573 = vmatpush.bf16.msra.mxu0 %v1070_v20  ;;  %v22_v4 = vld [vmem:[%s1415_s0 + $0x10] sm:$0xff]  ;;  %v1100_v10 = vld [vmem:[%s1413_s1 + $0x100] sm:$0xff]  ;;  %v166_v12 = vunpack.c.l.b16 %v23_v7  ;;  %v167_v13 = vunpack.c.h.b16 %v23_v7  ;;  %v1139_v20 = vld [vmem:[%s1417_s3 + $0x38] sm:$0xff] }
  0x17   :  { %586 = vmatpush.bf16.msra.mxu1 %v1078_v21  ;;  %v164_v8 = vunpack.c.l.b16 %v22_v4  ;;  %v165_v9 = vunpack.c.h.b16 %v22_v4  ;;  %v1108_v11 = vld [vmem:[%s1413_s1 + $0x140] sm:$0xff]  ;;  %v1138_v21 = vld [vmem:[%s1417_s3 + $0x30] sm:$0xff]  ;;  %v1133_v29 = vld [vmem:[%s1417_s3 + $0x8] sm:$0xff] }
  0x18   :  { %599 = vmatpush.bf16.msra.mxu2 %v1086_v22  ;;  %v1116_v14 = vld [vmem:[%s1413_s1 + $0x180] sm:$0xff]  ;;  %v174_v18 = vpack.c.b16 %v166_v12, %v166_v12  ;;  %v175_v19 = vpack.c.b16 %v167_v13, %v167_v13  ;;  %v1137_v22 = vld [vmem:[%s1417_s3 + $0x28] sm:$0xff] }
  0x19   :  { %612 = vmatpush.bf16.msra.mxu3 %v1094_v23  ;;  %v1124_v15 = vld [vmem:[%s1413_s1 + $0x1c0] sm:$0xff]  ;;  %v172_v16 = vpack.c.b16 %v164_v8, %v164_v8  ;;  %v173_v17 = vpack.c.b16 %v165_v9, %v165_v9 }
  0x1a   :  { %574 = vmatpush.bf16.msra.mxu0 %v1069_v24  ;;  %v1136_v23 = vld [vmem:[%s1417_s3 + $0x20] sm:$0xff]  ;;  %v1135_v24 = vld [vmem:[%s1417_s3 + $0x18] sm:$0xff] }
  0x1b   :  { %587 = vmatpush.bf16.msra.mxu1 %v1077_v25  ;;  %v1132_v33 = vld [vmem:[%s1417_s3] sm:$0xff] }
  0x1c   :  { %600 = vmatpush.bf16.msra.mxu2 %v1085_v26 }
  0x1d   :  { %613 = vmatpush.bf16.msra.mxu3 %v1093_v27  ;;  %v1134_v27 = vld [vmem:[%s1417_s3 + $0x10] sm:$0xff] }
  0x1e   :  { %575 = vmatpush.bf16.msra.mxu0 %v1068_v30 }
  0x1f   :  { %588 = vmatpush.bf16.msra.mxu1 %v1076_v31 }
  0x20   :  { %601 = vmatpush.bf16.msra.mxu2 %v1084_v34  ;;  %v1140_v34 = vld [vmem:[%s1414_s2] ss:$0 sm:$0xff] }
  0x21   :  { %614 = vmatpush.bf16.msra.mxu3 %v1092_v35  ;;  %576 = vmatmul.bf16.vlgmr.msra.gmra.mxu0 %v168_v43 }
  0x22   :  { %620 = vmatpush.bf16.msrb.mxu0 %v1107_v38  ;;  %589 = vmatmul.bf16.vlgmr.msra.gmra.mxu1 %v169_v45 }
  0x23   :  { %633 = vmatpush.bf16.msrb.mxu1 %v1115_v39  ;;  %602 = vmatmul.bf16.vlgmr.msra.gmra.mxu2 %v170_v42 }
  0x24   :  { %646 = vmatpush.bf16.msrb.mxu2 %v1123_v40  ;;  %615 = vmatmul.bf16.vlgmr.msra.gmra.mxu3 %v171_v44 }
  0x25   :  { %659 = vmatpush.bf16.msrb.mxu3 %v1131_v41 }
  0x26   :  { %621 = vmatpush.bf16.msrb.mxu0 %v1106_v46 }
  0x27   :  { %634 = vmatpush.bf16.msrb.mxu1 %v1114_v47 }
  0x28   :  { %647 = vmatpush.bf16.msrb.mxu2 %v1122_v48 }
  0x29   :  { %660 = vmatpush.bf16.msrb.mxu3 %v1130_v49 }
  0x2a   :  { %622 = vmatpush.bf16.msrb.mxu0 %v1105_v50 }
  0x2b   :  { %635 = vmatpush.bf16.msrb.mxu1 %v1113_v51 }
  0x2c   :  { %648 = vmatpush.bf16.msrb.mxu2 %v1121_v52 }
  0x2d   :  { %661 = vmatpush.bf16.msrb.mxu3 %v1129_v53 }
  0x2e   :  { %623 = vmatpush.bf16.msrb.mxu0 %v1104_v54 }
  0x2f   :  { %636 = vmatpush.bf16.msrb.mxu1 %v1112_v55 }
  0x30   :  { %649 = vmatpush.bf16.msrb.mxu2 %v1120_v56  ;;  %v1141_v56 = vld [vmem:[%s1416_s4] ss:$0 sm:$0xff] }
  0x31   :  { %662 = vmatpush.bf16.msrb.mxu3 %v1128_v57 }
  0x32   :  { %624 = vmatpush.bf16.msrb.mxu0 %v1103_v58 }
  0x33   :  { %637 = vmatpush.bf16.msrb.mxu1 %v1111_v59 }
  0x34   :  { %650 = vmatpush.bf16.msrb.mxu2 %v1119_v60 }
  0x35   :  { %663 = vmatpush.bf16.msrb.mxu3 %v1127_v61 }
  0x36   :  { %625 = vmatpush.bf16.msrb.mxu0 %v1102_v62 }
  0x37   :  { %638 = vmatpush.bf16.msrb.mxu1 %v1110_v63 }
  0x38   :  { %651 = vmatpush.bf16.msrb.mxu2 %v1118_v0 }
  0x39   :  { %664 = vmatpush.bf16.msrb.mxu3 %v1126_v1 }
  0x3a   :  { %626 = vmatpush.bf16.msrb.mxu0 %v1101_v2 }
  0x3b   :  { %639 = vmatpush.bf16.msrb.mxu1 %v1109_v3 }
  0x3c   :  { %652 = vmatpush.bf16.msrb.mxu2 %v1117_v5 }
  0x3d   :  { %665 = vmatpush.bf16.msrb.mxu3 %v1125_v6 }
  0x3e   :  { %627 = vmatpush.bf16.msrb.mxu0 %v1100_v10 }
  0x3f   :  { %640 = vmatpush.bf16.msrb.mxu1 %v1108_v11 }
  0x40   :  { %653 = vmatpush.bf16.msrb.mxu2 %v1116_v14 }
  0x41   :  { %666 = vmatpush.bf16.msrb.mxu3 %v1124_v15  ;;  %628 = vmatmul.bf16.vlgmr.msrb.gmra.mxu0 %v172_v16 }
  0x42   :  { %641 = vmatmul.bf16.vlgmr.msrb.gmra.mxu1 %v173_v17  ;;  %743 = vmatpush.bf16.msra.mxu0 %v1139_v20 }
  0x43   :  { %654 = vmatmul.bf16.vlgmr.msrb.gmra.mxu2 %v174_v18 }
  0x44   :  { %667 = vmatmul.bf16.vlgmr.msrb.gmra.mxu3 %v175_v19 }
  0x46   :  { %744 = vmatpush.bf16.msra.mxu0 %v1138_v21 }
  0x4a   :  { %745 = vmatpush.bf16.msra.mxu0 %v1137_v22 }
  0x4e   :  { %746 = vmatpush.bf16.msra.mxu0 %v1136_v23 }
  0x52   :  { %747 = vmatpush.bf16.msra.mxu0 %v1135_v24 }
  0x56   :  { %748 = vmatpush.bf16.msra.mxu0 %v1134_v27 }
  0x5a   :  { %749 = vmatpush.bf16.msra.mxu0 %v1133_v29 }
  0x5e   :  { %750 = vmatpush.bf16.msra.mxu0 %v1132_v33 }
  0x9e   :  { %v577_v25 = vpop.f32.mrf.mxu0 }
  0x9f   :  { %v590_v26 = vpop.f32.mrf.mxu1  ;;  %v578_v37 = vadd.f32 %v1140_v34, %v577_v25 }
  0xa1   :  { %v591_v38 = vadd.f32 %v590_v26, %v578_v37 }
  0xa6   :  { %v603_v28 = vpop.f32.mrf.mxu2  ;;  %v579_v31 = vpop.f32.mrf.mxu0 }
  0xa7   :  { %v616_v30 = vpop.f32.mrf.mxu3  ;;  %v592_v32 = vpop.f32.mrf.mxu1  ;;  %v604_v39 = vadd.f32 %v603_v28, %v591_v38 }
  0xa9   :  { %v617_v40 = vadd.f32 %v616_v30, %v604_v39 }
  0xae   :  { %v605_v35 = vpop.f32.mrf.mxu2 }
  0xaf   :  { %v618_v36 = vpop.f32.mrf.mxu3 }
  0xbe   :  { %v629_v41 = vpop.f32.mrf.mxu0 }
  0xbf   :  { %v642_v42 = vpop.f32.mrf.mxu1  ;;  %v630_v43 = vadd.f32 %v629_v41, %v617_v40 }
  0xc1   :  { %v643_v44 = vadd.f32 %v642_v42, %v630_v43 }
  0xc6   :  { %v655_v45 = vpop.f32.mrf.mxu2  ;;  %v631_v48 = vpop.f32.mrf.mxu0 }
  0xc7   :  { %v668_v46 = vpop.f32.mrf.mxu3  ;;  %v656_v47 = vadd.f32 %v655_v45, %v643_v44  ;;  %v644_v49 = vpop.f32.mrf.mxu1 }
  0xc9   :  { %v669_v50 = vadd.f32 %v668_v46, %v656_v47 }
  0xcb   :  { %v672_v51 = vmul.f32 0.2, %v669_v50 }
  0xcd   :  { %v673_v52 = vmax.f32 %v669_v50, %v672_v51 }
  0xce   :  { %v657_v53 = vpop.f32.mrf.mxu2 }
  0xcf   :  { %v670_v54 = vpop.f32.mrf.mxu3  ;;  %v674_v55 = vpack.c.bf16 %v673_v52, %v673_v52 }
  0xd1   :  { %751 = vmatmul.bf16.vlgmr.msra.gmra.mxu0 %v674_v55 }
 0x14e   :  { %v752_v57 = vpop.f32.mrf.mxu0 }
 0x14f   :  { %v753_v58 = vadd.f32 %v1141_v56, %v752_v57 }
 0x151   :  { %v756_v59 = vsub.f32 0.0, %v753_v58 }
 0x153   :  { %v757_v60 = vmul.f32 1.442695, %v756_v59 }
 0x155   :  { %1142 = vpow2.f32 %v757_v60 }
 0x156   :  { %v754_v61 = vpop.f32.mrf.mxu0 }
 0x15b   :  { %v1143_v62 = vpop.eup %1142 }
 0x15c   :  { %v759_v63 = vadd.f32 1.0, %v1143_v62 }
 0x15e   :  { %1144 = vrcp.f32 %v759_v63  ;;  %v771_v3 = vand.u32 2147483648, %v759_v63  ;;  %v769_v5 = vand.u32 2147483647, %v759_v63  ;;  %vm765_vm1 = vweird.f32 %v759_v63 }
 0x160   :  { %v772_v7 = vor.u32 1.1754944e-38, %v771_v3  ;;  %vm770_vm3 = vcmp.eq.f32.partialorder %v769_v5, 8.507059e+37 }
 0x164   :  { %v1145_v0 = vpop.eup %1144 }
 0x165   :  { %v761_v1 = vmul.f32 %v1145_v0, %v759_v63  ;;  %vm766_vm0 = vweird.f32 %v1145_v0 }
 0x166   :  { %vm767_vm2 = vmor %vm765_vm1, %vm766_vm0 }
 0x167   :  { %v762_v2 = vsub.f32 1.0, %v761_v1 }
 0x169   :  { %v763_v4 = vmul.f32 %v1145_v0, %v762_v2 }
 0x16b   :  { %v764_v6 = vadd.f32 %v1145_v0, %v763_v4 }
 0x16d   :  { %v768_v8 = vsel %vm767_vm2, %v1145_v0, %v764_v6 }
 0x16e   :  { %v773_v9 = vsel %vm770_vm3, %v772_v7, %v768_v8 }
 0x16f   :  { %775 = vst [vmem:[%s1418_s5] sm:$0xff] %v773_v9 }

</bundles_post_ra>
